<compile_context>
chip_gen: v7x
topology: tpu7x:2x2x1
jax: 0.10.0
libtpu: 0.0.40
codegen_flags: <defaults>
</compile_context>

<pallas_src>
import functools

import jax
import jax.numpy as jnp
import numpy as np
from jax import lax
from jax.experimental import pallas as pl
from jax.experimental.pallas import tpu as pltpu


# ---------------------------------------------------------------------------
# helpers
# ---------------------------------------------------------------------------
def _largest_divisor_leq(n, cap, multiple_of=1):
    for d in range(min(n, cap), 0, -1):
        if n % d == 0 and d % multiple_of == 0:
            return d
    return n


# ---------------------------------------------------------------------------
# Fused row-tiled projection kernel:  out = sum_k in_k @ W_k + b
# Used to hoist the LSTM input projection (both directions at once) out of the
# sequential recurrence, and to avoid materializing the fwd/bwd concat.
# ---------------------------------------------------------------------------
def _proj_kernel(*refs, n_in):
    ins = refs[:n_in]
    ws = refs[n_in:2 * n_in]
    b_ref = refs[2 * n_in]
    out_ref = refs[2 * n_in + 1]
    acc = jnp.dot(ins[0][...], ws[0][...], preferred_element_type=jnp.float32)
    for k in range(1, n_in):
        acc = acc + jnp.dot(ins[k][...], ws[k][...],
                            preferred_element_type=jnp.float32)
    out_ref[...] = acc + b_ref[...]


def fused_projection(inputs, weights, bias, tile_rows):
    R = inputs[0].shape[0]
    OUT = weights[0].shape[1]
    n = len(inputs)
    row = lambda r: (r, 0)
    const = lambda r: (0, 0)
    in_specs = ([pl.BlockSpec((tile_rows, x.shape[1]), row) for x in inputs]
                + [pl.BlockSpec(w.shape, const) for w in weights]
                + [pl.BlockSpec((1, OUT), const)])
    return pl.pallas_call(
        functools.partial(_proj_kernel, n_in=n),
        out_shape=jax.ShapeDtypeStruct((R, OUT), jnp.float32),
        grid=(R // tile_rows,),
        in_specs=in_specs,
        out_specs=pl.BlockSpec((tile_rows, OUT), row),
        compiler_params=pltpu.CompilerParams(
            dimension_semantics=("parallel",)),
    )(*inputs, *weights, bias)


# ---------------------------------------------------------------------------
# Bidirectional LSTM recurrence kernel.
#   grid = (2, T // Tc): axis 0 = direction (parallel), axis 1 = time chunks
#   (sequential / arbitrary).  Gate pre-activations from the hoisted input
#   projection arrive as (T, B, 8H) with cols [0:4H]=fwd, [4H:8H]=bwd; the
#   direction grid index selects the half via the block index_map.
#   Output is (2, T, B, H); the backward direction's chunks are delivered /
#   written in reversed time order via the index_maps.
# ---------------------------------------------------------------------------
def _chunk_scan(gin_ref, out_ref, whh, h_ref, c_ref, H, steps):
    h = h_ref[...]
    c = c_ref[...]
    for s in steps:                      # static python indices
        g = gin_ref[s] + jnp.dot(h, whh, preferred_element_type=jnp.float32)
        i_g = jax.nn.sigmoid(g[:, 0 * H:1 * H])
        f_g = jax.nn.sigmoid(g[:, 1 * H:2 * H])
        g_g = jnp.tanh(g[:, 2 * H:3 * H])
        o_g = jax.nn.sigmoid(g[:, 3 * H:4 * H])
        c = f_g * c + i_g * g_g
        h = o_g * jnp.tanh(c)
        out_ref[s] = h
    h_ref[...] = h
    c_ref[...] = c


def _bilstm_kernel(gin_ref, whh_ref, out_ref, h_ref, c_ref, *, Tc, H):
    d = pl.program_id(0)                 # 0 = forward in time, 1 = backward
    t = pl.program_id(1)                 # time-chunk index (sequential)

    @pl.when(t == 0)
    def _():
        h_ref[...] = jnp.zeros_like(h_ref)
        c_ref[...] = jnp.zeros_like(c_ref)

    whh = whh_ref[...]

    @pl.when(d == 0)
    def _():
        _chunk_scan(gin_ref, out_ref, whh, h_ref, c_ref, H, list(range(Tc)))

    @pl.when(d == 1)
    def _():
        _chunk_scan(gin_ref, out_ref, whh, h_ref, c_ref, H,
                    list(range(Tc - 1, -1, -1)))


def bilstm_recurrence(gates_tb, w_hh_stacked, chunk):
    T, B, G2 = gates_tb.shape
    H = w_hh_stacked.shape[1]
    G = 4 * H
    assert G2 == 2 * G
    # 4H must be lane-aligned so the direction is selected by block index.
    assert G % 128 == 0, "hidden_dim must be a multiple of 32 (pad if needed)"
    assert T % chunk == 0
    NC = T // chunk

    def t_rev(d, t):                     # t for fwd, NC-1-t for bwd
        return t + d * (NC - 1 - 2 * t)

    return pl.pallas_call(
        functools.partial(_bilstm_kernel, Tc=chunk, H=H),
        out_shape=jax.ShapeDtypeStruct((2, T, B, H), jnp.float32),
        grid_spec=pltpu.PrefetchScalarGridSpec(
            num_scalar_prefetch=0,
            grid=(2, NC),
            in_specs=[
                pl.BlockSpec((chunk, B, G), lambda d, t: (t_rev(d, t), 0, d)),
                pl.BlockSpec((None, H, G), lambda d, t: (d, 0, 0)),
            ],
            out_specs=pl.BlockSpec((None, chunk, B, H),
                                   lambda d, t: (d, t_rev(d, t), 0, 0)),
            scratch_shapes=[pltpu.VMEM((B, H), jnp.float32),
                            pltpu.VMEM((B, H), jnp.float32)],
        ),
        compiler_params=pltpu.CompilerParams(
            dimension_semantics=("parallel", "arbitrary")),
    )(gates_tb, w_hh_stacked)


# ---------------------------------------------------------------------------
# Heads kernel (row-tiled): fc_dc + grouped L2 norm (via grp matmuls, rsqrt on
# the EUP), fc_mi + sigmoid (output padded to a lane-dense width).
# Takes fwd/bwd halves separately so the rnn concat never hits HBM.
# ---------------------------------------------------------------------------
def _heads_kernel(fwd_ref, bwd_ref, wdcf_ref, wdcb_ref, bdc_ref,
                  wmif_ref, wmib_ref, bmi_ref, grp_ref, grpT_ref,
                  emb_ref, mask_ref):
    f = fwd_ref[...]
    b = bwd_ref[...]
    emb = (jnp.dot(f, wdcf_ref[...], preferred_element_type=jnp.float32)
           + jnp.dot(b, wdcb_ref[...], preferred_element_type=jnp.float32)
           + bdc_ref[...])
    sq = emb * emb
    group_sums = jnp.dot(sq, grp_ref[...],
                         preferred_element_type=jnp.float32)      # (TR, F)
    sums_full = jnp.dot(group_sums, grpT_ref[...],
                        preferred_element_type=jnp.float32)       # (TR, DC)
    # F.normalize(p=2, eps=1e-12): x / max(||x||, eps) == x * rsqrt(max(||x||^2, eps^2))
    emb_ref[...] = emb * lax.rsqrt(jnp.maximum(sums_full, 1e-24))
    mi = (jnp.dot(f, wmif_ref[...], preferred_element_type=jnp.float32)
          + jnp.dot(b, wmib_ref[...], preferred_element_type=jnp.float32)
          + bmi_ref[...])
    mask_ref[...] = jax.nn.sigmoid(mi)


def heads(fwd_rows, bwd_rows, wdc_f, wdc_b, b_dc, wmi_f, wmi_b, b_mi,
          freq, emb_dim, tile_rows):
    R, H = fwd_rows.shape
    DC = wdc_f.shape[1]
    MIp = wmi_f.shape[1]
    # grp[k, f] = 1 iff column k of the embedding belongs to frequency f
    grp = jnp.repeat(jnp.eye(freq, dtype=jnp.float32), emb_dim, axis=0)
    row = lambda r: (r, 0)
    const = lambda r: (0, 0)
    return pl.pallas_call(
        _heads_kernel,
        out_shape=(jax.ShapeDtypeStruct((R, DC), jnp.float32),
                   jax.ShapeDtypeStruct((R, MIp), jnp.float32)),
        grid=(R // tile_rows,),
        in_specs=[pl.BlockSpec((tile_rows, H), row),
                  pl.BlockSpec((tile_rows, H), row),
                  pl.BlockSpec((H, DC), const),
                  pl.BlockSpec((H, DC), const),
                  pl.BlockSpec((1, DC), const),
                  pl.BlockSpec((H, MIp), const),
                  pl.BlockSpec((H, MIp), const),
                  pl.BlockSpec((1, MIp), const),
                  pl.BlockSpec((DC, freq), const),
                  pl.BlockSpec((freq, DC), const)],
        out_specs=(pl.BlockSpec((tile_rows, DC), row),
                   pl.BlockSpec((tile_rows, MIp), row)),
        compiler_params=pltpu.CompilerParams(
            dimension_semantics=("parallel",)),
    )(fwd_rows, bwd_rows, wdc_f, wdc_b, b_dc, wmi_f, wmi_b, b_mi, grp, grp.T)


# ---------------------------------------------------------------------------
# Parameter init (PyTorch-style uniform) and packing into kernel layouts.
# ---------------------------------------------------------------------------
def init_raw_params(key, input_dim, hidden_dim, num_layers, embedding_dim,
                    num_speaker):
    H = hidden_dim
    k = 1.0 / np.sqrt(H)
    raw = {"lstm": []}
    for layer in range(num_layers):
        in_size = input_dim if layer == 0 else 2 * H
        lp = {}
        for d in ("fwd", "bwd"):
            key, k1, k2, k3, k4 = jax.random.split(key, 5)
            lp[d] = {
                "w_ih": jax.random.uniform(k1, (4 * H, in_size), jnp.float32, -k, k),
                "w_hh": jax.random.uniform(k2, (4 * H, H), jnp.float32, -k, k),
                "b_ih": jax.random.uniform(k3, (4 * H,), jnp.float32, -k, k),
                "b_hh": jax.random.uniform(k4, (4 * H,), jnp.float32, -k, k),
            }
        raw["lstm"].append(lp)

    fan_in = 2 * H
    kf = 1.0 / np.sqrt(fan_in)
    key, k1, k2, k3, k4 = jax.random.split(key, 5)
    raw["w_dc"] = jax.random.uniform(
        k1, (input_dim * embedding_dim, fan_in), jnp.float32, -kf, kf)
    raw["b_dc"] = jax.random.uniform(
        k2, (input_dim * embedding_dim,), jnp.float32, -kf, kf)
    raw["w_mi"] = jax.random.uniform(
        k3, (input_dim * num_speaker, fan_in), jnp.float32, -kf, kf)
    raw["b_mi"] = jax.random.uniform(
        k4, (input_dim * num_speaker,), jnp.float32, -kf, kf)
    return raw


def pack_params(raw, hidden_dim):
    H = hidden_dim
    packed = {"lstm": []}
    for li, lp in enumerate(raw["lstm"]):
        wf, wb = lp["fwd"], lp["bwd"]
        # (in, 8H): columns [0:4H] = forward gates, [4H:8H] = backward gates.
        w_ih_cat = jnp.concatenate([wf["w_ih"].T, wb["w_ih"].T], axis=1)
        b_cat = jnp.concatenate([wf["b_ih"] + wf["b_hh"],
                                 wb["b_ih"] + wb["b_hh"]])[None, :]
        if li == 0:
            w_in = [w_ih_cat]
        else:
            # next-layer input is [h_fwd | h_bwd]; split rows so the concat is
            # never materialized.
            w_in = [w_ih_cat[:H], w_ih_cat[H:]]
        w_hh = jnp.stack([wf["w_hh"].T, wb["w_hh"].T])            # (2, H, 4H)
        packed["lstm"].append({"w_in": w_in, "b": b_cat, "w_hh": w_hh})

    MI = raw["w_mi"].shape[0]
    MIp = -(-MI // 128) * 128            # pad mask head to lane-dense width
    w_dc_t = raw["w_dc"].T               # (2H, DC)
    w_mi_t = jnp.pad(raw["w_mi"].T, ((0, 0), (0, MIp - MI)))
    packed["heads"] = {
        "w_dc_f": w_dc_t[:H], "w_dc_b": w_dc_t[H:],
        "b_dc": raw["b_dc"][None, :],
        "w_mi_f": w_mi_t[:H], "w_mi_b": w_mi_t[H:],
        "b_mi": jnp.pad(raw["b_mi"], (0, MIp - MI))[None, :],
    }
    return packed


# ---------------------------------------------------------------------------
# Full forward (Pallas kernels + minimal JAX glue).
# ---------------------------------------------------------------------------
def chimera_forward(x, packed, *, hidden_dim, embedding_dim, num_speaker):
    x = x.astype(jnp.float32)
    B, T, F = x.shape
    H = hidden_dim
    R = T * B
    tile_rows = _largest_divisor_leq(R, 512, multiple_of=8)
    chunk = _largest_divisor_leq(T, 64)

    # time-major rows (t, b); only the small input gets transposed.
    x_rows = jnp.transpose(x, (1, 0, 2)).reshape(R, F)

    inputs = [x_rows]
    for lp in packed["lstm"]:
        # 1) hoisted input projection for both directions: one big MXU matmul
        gates = fused_projection(inputs, lp["w_in"], lp["b"], tile_rows)  # (R, 8H)
        # 2) chunked sequential recurrence; direction on a parallel grid axis,
        #    backward time handled by index_maps (no reversed HBM copies).
        h_pair = bilstm_recurrence(gates.reshape(T, B, 8 * H), lp["w_hh"], chunk)
        inputs = [h_pair[0].reshape(R, H), h_pair[1].reshape(R, H)]
        # TODO(synk): nn.LSTM inter-layer dropout only applies in training
        # mode; eval semantics (no dropout) are implemented here.

    hp = packed["heads"]
    emb_rows, mask_rows = heads(inputs[0], inputs[1],
                                hp["w_dc_f"], hp["w_dc_b"], hp["b_dc"],
                                hp["w_mi_f"], hp["w_mi_b"], hp["b_mi"],
                                F, embedding_dim, tile_rows)
    MI = F * num_speaker
    embedding = emb_rows.reshape(T, B, F, embedding_dim).transpose(1, 0, 2, 3)
    masks = mask_rows[:, :MI].reshape(T, B, F, num_speaker).transpose(1, 0, 2, 3)
    return embedding, masks[..., 0], masks[..., 1]


# ---------------------------------------------------------------------------
# Pure-JAX reference (operates on the raw PyTorch-layout params).
# ---------------------------------------------------------------------------
def reference_forward(x, raw, *, hidden_dim, embedding_dim, num_speaker):
    x = x.astype(jnp.float32)
    B, T, F = x.shape
    H = hidden_dim
    h = jnp.transpose(x, (1, 0, 2))                                # (T, B, F)

    def run_dir(seq, p):
        w_ih_t, w_hh_t = p["w_ih"].T, p["w_hh"].T
        b = (p["b_ih"] + p["b_hh"])[None, :]

        def step(carry, xt):
            hp, cp = carry
            gates = xt @ w_ih_t + hp @ w_hh_t + b
            i = jax.nn.sigmoid(gates[:, :H])
            f = jax.nn.sigmoid(gates[:, H:2 * H])
            g = jnp.tanh(gates[:, 2 * H:3 * H])
            o = jax.nn.sigmoid(gates[:, 3 * H:])
            c = f * cp + i * g
            hn = o * jnp.tanh(c)
            return (hn, c), hn

        init = (jnp.zeros((B, H), jnp.float32), jnp.zeros((B, H), jnp.float32))
        _, ys = lax.scan(step, init, seq)
        return ys

    for lp in raw["lstm"]:
        fwd = run_dir(h, lp["fwd"])
        bwd = run_dir(h[::-1], lp["bwd"])[::-1]
        h = jnp.concatenate([fwd, bwd], axis=-1)
    rnn_out = jnp.transpose(h, (1, 0, 2))                          # (B, T, 2H)
    emb = rnn_out @ raw["w_dc"].T + raw["b_dc"]
    emb = emb.reshape(B, T * F, embedding_dim)
    norm = jnp.sqrt(jnp.sum(emb * emb, axis=-1, keepdims=True))
    emb = (emb / jnp.maximum(norm, 1e-12)).reshape(B, T, F, embedding_dim)
    masks = jax.nn.sigmoid(rnn_out @ raw["w_mi"].T + raw["b_mi"])
    masks = masks.reshape(B, T, F, num_speaker)
    return emb, masks[..., 0], masks[..., 1]


if __name__ == "__main__":
    # small shapes consistent with the module: x is (batch, frame, frequency)
    B, T, FREQ = 2, 8, 16
    HIDDEN, LAYERS, EMB, NSPK = 32, 3, 20, 2

    key = jax.random.PRNGKey(0)
    key, xk, pk = jax.random.split(key, 3)
    x = jax.random.normal(xk, (B, T, FREQ), jnp.float32)
    raw = init_raw_params(pk, FREQ, HIDDEN, LAYERS, EMB, NSPK)
    packed = pack_params(raw, HIDDEN)

    run = jax.jit(functools.partial(chimera_forward, hidden_dim=HIDDEN,
                                    embedding_dim=EMB, num_speaker=NSPK))
    embedding, mask_a, mask_b = run(x, packed)
    jax.block_until_ready((embedding, mask_a, mask_b))

    assert embedding.shape == (B, T, FREQ, EMB)
    assert mask_a.shape == (B, T, FREQ)
    assert mask_b.shape == (B, T, FREQ)

    # sanity check against the pure-JAX reference
    ref_emb, ref_a, ref_b = reference_forward(
        x, raw, hidden_dim=HIDDEN, embedding_dim=EMB, num_speaker=NSPK)
    err = max(float(jnp.max(jnp.abs(embedding - ref_emb))),
              float(jnp.max(jnp.abs(mask_a - ref_a))),
              float(jnp.max(jnp.abs(mask_b - ref_b))))
    if err > 5e-3:
        raise AssertionError(f"Pallas vs reference mismatch: max abs err {err}")

    print("KERNEL_OK")
</pallas_src>

<mosaic_0001>
module attributes {stable_mosaic.version = 11 : i64} {
  func.func @_proj_kernel(%arg0: i32, %arg1: memref<16x16xf32, #tpu.memory_space<vmem>>, %arg2: memref<16x256xf32, #tpu.memory_space<vmem>>, %arg3: memref<1x256xf32, #tpu.memory_space<vmem>>, %arg4: memref<16x256xf32, #tpu.memory_space<vmem>>) attributes {dimension_semantics = [#tpu.dimension_semantics<parallel>], iteration_bounds = array<i64: 1>, scalar_prefetch = 0 : i64, scratch_operands = 0 : i64, tpu.core_type = #tpu.core_type<tc>, window_params = [{transform_indices = @transform_0, window_bounds = array<i64: 16, 16>}, {pipeline_mode = #tpu.pipeline_mode<synchronous>, transform_indices = @transform_1, window_bounds = array<i64: 16, 256>}, {pipeline_mode = #tpu.pipeline_mode<synchronous>, transform_indices = @transform_2, window_bounds = array<i64: 1, 256>}, {transform_indices = @transform_3, window_bounds = array<i64: 16, 256>}]} {
    %c0 = arith.constant 0 : index
    %c0_0 = arith.constant 0 : index
    %0 = vector.load %arg1[%c0, %c0_0] : memref<16x16xf32, #tpu.memory_space<vmem>>, vector<16x16xf32>
    %c0_1 = arith.constant 0 : index
    %c0_2 = arith.constant 0 : index
    %1 = vector.load %arg2[%c0_1, %c0_2] : memref<16x256xf32, #tpu.memory_space<vmem>>, vector<16x256xf32>
    %cst = arith.constant dense<0.000000e+00> : vector<16x256xf32>
    %2 = tpu.matmul %0, %1, %cst {dimension_numbers = #tpu.dot_dimension_numbers<[1], [0], [0], [1], [0, 0, 1, 1], [], []>} : vector<16x16xf32>, vector<16x256xf32>, vector<16x256xf32> -> vector<16x256xf32>
    %c0_3 = arith.constant 0 : index
    %c0_4 = arith.constant 0 : index
    %3 = vector.load %arg3[%c0_3, %c0_4] : memref<1x256xf32, #tpu.memory_space<vmem>>, vector<1x256xf32>
    %4 = vector.broadcast %3 : vector<1x256xf32> to vector<16x256xf32>
    %5 = arith.addf %2, %4 : vector<16x256xf32>
    %c0_5 = arith.constant 0 : index
    %c0_6 = arith.constant 0 : index
    %6 = vector.load %arg4[%c0_5, %c0_6] : memref<16x256xf32, #tpu.memory_space<vmem>>, vector<16x256xf32>
    tpu.vector_store %arg4[%c0_5, %c0_6], %5 {strides = array<i32>} : memref<16x256xf32, #tpu.memory_space<vmem>>, vector<16x256xf32>,
    return
  }
  func.func @transform_0(%arg0: i32) -> (i32, i32) {
    %c0_i32 = arith.constant 0 : i32
    %c0_i32_0 = arith.constant 0 : i32
    return %arg0, %c0_i32 : i32, i32
  }
  func.func @transform_1(%arg0: i32) -> (i32, i32) {
    %c0_i32 = arith.constant 0 : i32
    %c0_i32_0 = arith.constant 0 : i32
    %c0_i32_1 = arith.constant 0 : i32
    return %c0_i32, %c0_i32_0 : i32, i32
  }
  func.func @transform_2(%arg0: i32) -> (i32, i32) {
    %c0_i32 = arith.constant 0 : i32
    %c0_i32_0 = arith.constant 0 : i32
    %c0_i32_1 = arith.constant 0 : i32
    return %c0_i32, %c0_i32_0 : i32, i32
  }
  func.func @transform_3(%arg0: i32) -> (i32, i32) {
    %c0_i32 = arith.constant 0 : i32
    %c0_i32_0 = arith.constant 0 : i32
    return %arg0, %c0_i32 : i32, i32
  }
}

module attributes {stable_mosaic.version = 11 : i64} {
  func.func @_proj_kernel(%arg0: i32, %arg1: memref<16x32xf32, #tpu.memory_space<vmem>>, %arg2: memref<16x32xf32, #tpu.memory_space<vmem>>, %arg3: memref<32x256xf32, #tpu.memory_space<vmem>>, %arg4: memref<32x256xf32, #tpu.memory_space<vmem>>, %arg5: memref<1x256xf32, #tpu.memory_space<vmem>>, %arg6: memref<16x256xf32, #tpu.memory_space<vmem>>) attributes {dimension_semantics = [#tpu.dimension_semantics<parallel>], iteration_bounds = array<i64: 1>, scalar_prefetch = 0 : i64, scratch_operands = 0 : i64, tpu.core_type = #tpu.core_type<tc>, window_params = [{transform_indices = @transform_0, window_bounds = array<i64: 16, 32>}, {transform_indices = @transform_1, window_bounds = array<i64: 16, 32>}, {pipeline_mode = #tpu.pipeline_mode<synchronous>, transform_indices = @transform_2, window_bounds = array<i64: 32, 256>}, {pipeline_mode = #tpu.pipeline_mode<synchronous>, transform_indices = @transform_3, window_bounds = array<i64: 32, 256>}, {pipeline_mode = #tpu.pipeline_mode<synchronous>, transform_indices = @transform_4, window_bounds = array<i64: 1, 256>}, {transform_indices = @transform_5, window_bounds = array<i64: 16, 256>}]} {
    %c0 = arith.constant 0 : index
    %c0_0 = arith.constant 0 : index
    %0 = vector.load %arg1[%c0, %c0_0] : memref<16x32xf32, #tpu.memory_space<vmem>>, vector<16x32xf32>
    %c0_1 = arith.constant 0 : index
    %c0_2 = arith.constant 0 : index
    %1 = vector.load %arg3[%c0_1, %c0_2] : memref<32x256xf32, #tpu.memory_space<vmem>>, vector<32x256xf32>
    %cst = arith.constant dense<0.000000e+00> : vector<16x256xf32>
    %2 = tpu.matmul %0, %1, %cst {dimension_numbers = #tpu.dot_dimension_numbers<[1], [0], [0], [1], [0, 0, 1, 1], [], []>} : vector<16x32xf32>, vector<32x256xf32>, vector<16x256xf32> -> vector<16x256xf32>
    %c0_3 = arith.constant 0 : index
    %c0_4 = arith.constant 0 : index
    %3 = vector.load %arg2[%c0_3, %c0_4] : memref<16x32xf32, #tpu.memory_space<vmem>>, vector<16x32xf32>
    %c0_5 = arith.constant 0 : index
    %c0_6 = arith.constant 0 : index
    %4 = vector.load %arg4[%c0_5, %c0_6] : memref<32x256xf32, #tpu.memory_space<vmem>>, vector<32x256xf32>
    %cst_7 = arith.constant dense<0.000000e+00> : vector<16x256xf32>
    %5 = tpu.matmul %3, %4, %cst_7 {dimension_numbers = #tpu.dot_dimension_numbers<[1], [0], [0], [1], [0, 0, 1, 1], [], []>} : vector<16x32xf32>, vector<32x256xf32>, vector<16x256xf32> -> vector<16x256xf32>
    %6 = arith.addf %2, %5 : vector<16x256xf32>
    %c0_8 = arith.constant 0 : index
    %c0_9 = arith.constant 0 : index
    %7 = vector.load %arg5[%c0_8, %c0_9] : memref<1x256xf32, #tpu.memory_space<vmem>>, vector<1x256xf32>
    %8 = vector.broadcast %7 : vector<1x256xf32> to vector<16x256xf32>
    %9 = arith.addf %6, %8 : vector<16x256xf32>
    %c0_10 = arith.constant 0 : index
    %c0_11 = arith.constant 0 : index
    %10 = vector.load %arg6[%c0_10, %c0_11] : memref<16x256xf32, #tpu.memory_space<vmem>>, vector<16x256xf32>
    tpu.vector_store %arg6[%c0_10, %c0_11], %9 {strides = array<i32>} : memref<16x256xf32, #tpu.memory_space<vmem>>, vector<16x256xf32>,
    return
  }
  func.func @transform_0(%arg0: i32) -> (i32, i32) {
    %c0_i32 = arith.constant 0 : i32
    %c0_i32_0 = arith.constant 0 : i32
    return %arg0, %c0_i32 : i32, i32
  }
  func.func @transform_1(%arg0: i32) -> (i32, i32) {
    %c0_i32 = arith.constant 0 : i32
    %c0_i32_0 = arith.constant 0 : i32
    return %arg0, %c0_i32 : i32, i32
  }
  func.func @transform_2(%arg0: i32) -> (i32, i32) {
    %c0_i32 = arith.constant 0 : i32
    %c0_i32_0 = arith.constant 0 : i32
    %c0_i32_1 = arith.constant 0 : i32
    return %c0_i32, %c0_i32_0 : i32, i32
  }
  func.func @transform_3(%arg0: i32) -> (i32, i32) {
    %c0_i32 = arith.constant 0 : i32
    %c0_i32_0 = arith.constant 0 : i32
    %c0_i32_1 = arith.constant 0 : i32
    return %c0_i32, %c0_i32_0 : i32, i32
  }
  func.func @transform_4(%arg0: i32) -> (i32, i32) {
    %c0_i32 = arith.constant 0 : i32
    %c0_i32_0 = arith.constant 0 : i32
    %c0_i32_1 = arith.constant 0 : i32
    return %c0_i32, %c0_i32_0 : i32, i32
  }
  func.func @transform_5(%arg0: i32) -> (i32, i32) {
    %c0_i32 = arith.constant 0 : i32
    %c0_i32_0 = arith.constant 0 : i32
    return %arg0, %c0_i32 : i32, i32
  }
}

module attributes {stable_mosaic.version = 11 : i64} {
  func.func @_bilstm_kernel(%arg0: i32, %arg1: i32, %arg2: memref<8x2x128xf32, #tpu.memory_space<vmem>>, %arg3: memref<1x32x128xf32, #tpu.memory_space<vmem>>, %arg4: memref<1x8x2x32xf32, #tpu.memory_space<vmem>>, %arg5: memref<2x32xf32, #tpu.memory_space<vmem>>, %arg6: memref<2x32xf32, #tpu.memory_space<vmem>>) attributes {dimension_semantics = [#tpu.dimension_semantics<parallel>, #tpu.dimension_semantics<arbitrary>], iteration_bounds = array<i64: 2, 1>, scalar_prefetch = 0 : i64, scratch_operands = 2 : i64, tpu.core_type = #tpu.core_type<tc>, window_params = [{transform_indices = @transform_0, window_bounds = array<i64: 8, 2, 128>}, {transform_indices = @transform_1, window_bounds = array<i64: 1, 32, 128>}, {transform_indices = @transform_2, window_bounds = array<i64: 1, 8, 2, 32>}]} {
    %c0_i32 = arith.constant 0 : i32
    %0 = arith.cmpi eq, %arg1, %c0_i32 : i32
    %1 = arith.extui %0 : i1 to i32
    %c0_i32_0 = arith.constant 0 : i32
    %2 = arith.cmpi ne, %1, %c0_i32_0 : i32
    scf.if %2 {
      %cst = arith.constant 0.000000e+00 : f32
      %11 = vector.broadcast %cst : f32 to vector<2x32xf32>
      %c0_6 = arith.constant 0 : index
      %c0_7 = arith.constant 0 : index
      %12 = vector.load %arg5[%c0_6, %c0_7] : memref<2x32xf32, #tpu.memory_space<vmem>>, vector<2x32xf32>
      tpu.vector_store %arg5[%c0_6, %c0_7], %11 {strides = array<i32>} : memref<2x32xf32, #tpu.memory_space<vmem>>, vector<2x32xf32>,
      %cst_8 = arith.constant 0.000000e+00 : f32
      %13 = vector.broadcast %cst_8 : f32 to vector<2x32xf32>
      %c0_9 = arith.constant 0 : index
      %c0_10 = arith.constant 0 : index
      %14 = vector.load %arg6[%c0_9, %c0_10] : memref<2x32xf32, #tpu.memory_space<vmem>>, vector<2x32xf32>
      tpu.vector_store %arg6[%c0_9, %c0_10], %13 {strides = array<i32>} : memref<2x32xf32, #tpu.memory_space<vmem>>, vector<2x32xf32>,
    } else {
    }
    %c0 = arith.constant 0 : index
    %c0_1 = arith.constant 0 : index
    %c0_2 = arith.constant 0 : index
    %3 = vector.load %arg3[%c0, %c0_1, %c0_2] : memref<1x32x128xf32, #tpu.memory_space<vmem>>, vector<1x32x128xf32>
    %4 = vector.shape_cast %3 : vector<1x32x128xf32> to vector<32x128xf32>
    %c0_i32_3 = arith.constant 0 : i32
    %5 = arith.cmpi eq, %arg0, %c0_i32_3 : i32
    %6 = arith.extui %5 : i1 to i32
    %c0_i32_4 = arith.constant 0 : i32
    %7 = arith.cmpi ne, %6, %c0_i32_4 : i32
    scf.if %7 {
      %c0_6 = arith.constant 0 : index
      %c0_7 = arith.constant 0 : index
      %11 = vector.load %arg5[%c0_6, %c0_7] : memref<2x32xf32, #tpu.memory_space<vmem>>, vector<2x32xf32>
      %c0_8 = arith.constant 0 : index
      %c0_9 = arith.constant 0 : index
      %12 = vector.load %arg6[%c0_8, %c0_9] : memref<2x32xf32, #tpu.memory_space<vmem>>, vector<2x32xf32>
      %c0_10 = arith.constant 0 : index
      %c0_11 = arith.constant 0 : index
      %c0_12 = arith.constant 0 : index
      %13 = vector.load %arg2[%c0_10, %c0_11, %c0_12] : memref<8x2x128xf32, #tpu.memory_space<vmem>>, vector<1x2x128xf32>
      %14 = vector.shape_cast %13 : vector<1x2x128xf32> to vector<2x128xf32>
      %cst = arith.constant dense<0.000000e+00> : vector<2x128xf32>
      %15 = tpu.matmul %11, %4, %cst {dimension_numbers = #tpu.dot_dimension_numbers<[1], [0], [0], [1], [0, 0, 1, 1], [], []>} : vector<2x32xf32>, vector<32x128xf32>, vector<2x128xf32> -> vector<2x128xf32>
      %16 = arith.addf %14, %15 : vector<2x128xf32>
      %17 = vector.extract_strided_slice %16 {offsets = [0, 0], sizes = [2, 32], strides = [1, 1]} : vector<2x128xf32> to vector<2x32xf32>
      %18 = arith.negf %17 : vector<2x32xf32>
      %19 = math.exp %18 : vector<2x32xf32>
      %cst_13 = arith.constant 1.000000e+00 : f32
      %20 = vector.broadcast %cst_13 : f32 to vector<2x32xf32>
      %21 = arith.addf %20, %19 : vector<2x32xf32>
      %22 = arith.divf %20, %21 : vector<2x32xf32>
      %23 = vector.extract_strided_slice %16 {offsets = [0, 32], sizes = [2, 32], strides = [1, 1]} : vector<2x128xf32> to vector<2x32xf32>
      %24 = arith.negf %23 : vector<2x32xf32>
      %25 = math.exp %24 : vector<2x32xf32>
      %cst_14 = arith.constant 1.000000e+00 : f32
      %26 = vector.broadcast %cst_14 : f32 to vector<2x32xf32>
      %27 = arith.addf %26, %25 : vector<2x32xf32>
      %28 = arith.divf %26, %27 : vector<2x32xf32>
      %29 = vector.extract_strided_slice %16 {offsets = [0, 64], sizes = [2, 32], strides = [1, 1]} : vector<2x128xf32> to vector<2x32xf32>
      %30 = math.tanh %29 : vector<2x32xf32>
      %31 = vector.extract_strided_slice %16 {offsets = [0, 96], sizes = [2, 32], strides = [1, 1]} : vector<2x128xf32> to vector<2x32xf32>
      %32 = arith.negf %31 : vector<2x32xf32>
      %33 = math.exp %32 : vector<2x32xf32>
      %cst_15 = arith.constant 1.000000e+00 : f32
      %34 = vector.broadcast %cst_15 : f32 to vector<2x32xf32>
      %35 = arith.addf %34, %33 : vector<2x32xf32>
      %36 = arith.divf %34, %35 : vector<2x32xf32>
      %37 = arith.mulf %28, %12 : vector<2x32xf32>
      %38 = arith.mulf %22, %30 : vector<2x32xf32>
      %39 = arith.addf %37, %38 : vector<2x32xf32>
      %40 = math.tanh %39 : vector<2x32xf32>
      %41 = arith.mulf %36, %40 : vector<2x32xf32>
      %c0_16 = arith.constant 0 : index
      %c0_17 = arith.constant 0 : index
      %c0_18 = arith.constant 0 : index
      %c0_19 = arith.constant 0 : index
      %42 = vector.load %arg4[%c0_16, %c0_17, %c0_18, %c0_19] : memref<1x8x2x32xf32, #tpu.memory_space<vmem>>, vector<1x1x2x32xf32>
      %43 = vector.shape_cast %42 : vector<1x1x2x32xf32> to vector<2x32xf32>
      %44 = vector.shape_cast %41 : vector<2x32xf32> to vector<1x1x2x32xf32>
      tpu.vector_store %arg4[%c0_16, %c0_17, %c0_18, %c0_19], %44 {strides = array<i32>} : memref<1x8x2x32xf32, #tpu.memory_space<vmem>>, vector<1x1x2x32xf32>,
      %c1 = arith.constant 1 : index
      %c0_20 = arith.constant 0 : index
      %c0_21 = arith.constant 0 : index
      %45 = vector.load %arg2[%c1, %c0_20, %c0_21] : memref<8x2x128xf32, #tpu.memory_space<vmem>>, vector<1x2x128xf32>
      %46 = vector.shape_cast %45 : vector<1x2x128xf32> to vector<2x128xf32>
      %cst_22 = arith.constant dense<0.000000e+00> : vector<2x128xf32>
      %47 = tpu.matmul %41, %4, %cst_22 {dimension_numbers = #tpu.dot_dimension_numbers<[1], [0], [0], [1], [0, 0, 1, 1], [], []>} : vector<2x32xf32>, vector<32x128xf32>, vector<2x128xf32> -> vector<2x128xf32>
      %48 = arith.addf %46, %47 : vector<2x128xf32>
      %49 = vector.extract_strided_slice %48 {offsets = [0, 0], sizes = [2, 32], strides = [1, 1]} : vector<2x128xf32> to vector<2x32xf32>
      %50 = arith.negf %49 : vector<2x32xf32>
      %51 = math.exp %50 : vector<2x32xf32>
      %cst_23 = arith.constant 1.000000e+00 : f32
      %52 = vector.broadcast %cst_23 : f32 to vector<2x32xf32>
      %53 = arith.addf %52, %51 : vector<2x32xf32>
      %54 = arith.divf %52, %53 : vector<2x32xf32>
      %55 = vector.extract_strided_slice %48 {offsets = [0, 32], sizes = [2, 32], strides = [1, 1]} : vector<2x128xf32> to vector<2x32xf32>
      %56 = arith.negf %55 : vector<2x32xf32>
      %57 = math.exp %56 : vector<2x32xf32>
      %cst_24 = arith.constant 1.000000e+00 : f32
      %58 = vector.broadcast %cst_24 : f32 to vector<2x32xf32>
      %59 = arith.addf %58, %57 : vector<2x32xf32>
      %60 = arith.divf %58, %59 : vector<2x32xf32>
      %61 = vector.extract_strided_slice %48 {offsets = [0, 64], sizes = [2, 32], strides = [1, 1]} : vector<2x128xf32> to vector<2x32xf32>
      %62 = math.tanh %61 : vector<2x32xf32>
      %63 = vector.extract_strided_slice %48 {offsets = [0, 96], sizes = [2, 32], strides = [1, 1]} : vector<2x128xf32> to vector<2x32xf32>
      %64 = arith.negf %63 : vector<2x32xf32>
      %65 = math.exp %64 : vector<2x32xf32>
      %cst_25 = arith.constant 1.000000e+00 : f32
      %66 = vector.broadcast %cst_25 : f32 to vector<2x32xf32>
      %67 = arith.addf %66, %65 : vector<2x32xf32>
      %68 = arith.divf %66, %67 : vector<2x32xf32>
      %69 = arith.mulf %60, %39 : vector<2x32xf32>
      %70 = arith.mulf %54, %62 : vector<2x32xf32>
      %71 = arith.addf %69, %70 : vector<2x32xf32>
      %72 = math.tanh %71 : vector<2x32xf32>
      %73 = arith.mulf %68, %72 : vector<2x32xf32>
      %c0_26 = arith.constant 0 : index
      %c1_27 = arith.constant 1 : index
      %c0_28 = arith.constant 0 : index
      %c0_29 = arith.constant 0 : index
      %74 = vector.load %arg4[%c0_26, %c1_27, %c0_28, %c0_29] : memref<1x8x2x32xf32, #tpu.memory_space<vmem>>, vector<1x1x2x32xf32>
      %75 = vector.shape_cast %74 : vector<1x1x2x32xf32> to vector<2x32xf32>
      %76 = vector.shape_cast %73 : vector<2x32xf32> to vector<1x1x2x32xf32>
      tpu.vector_store %arg4[%c0_26, %c1_27, %c0_28, %c0_29], %76 {strides = array<i32>} : memref<1x8x2x32xf32, #tpu.memory_space<vmem>>, vector<1x1x2x32xf32>,
      %c2 = arith.constant 2 : index
      %c0_30 = arith.constant 0 : index
      %c0_31 = arith.constant 0 : index
      %77 = vector.load %arg2[%c2, %c0_30, %c0_31] : memref<8x2x128xf32, #tpu.memory_space<vmem>>, vector<1x2x128xf32>
      %78 = vector.shape_cast %77 : vector<1x2x128xf32> to vector<2x128xf32>
      %cst_32 = arith.constant dense<0.000000e+00> : vector<2x128xf32>
      %79 = tpu.matmul %73, %4, %cst_32 {dimension_numbers = #tpu.dot_dimension_numbers<[1], [0], [0], [1], [0, 0, 1, 1], [], []>} : vector<2x32xf32>, vector<32x128xf32>, vector<2x128xf32> -> vector<2x128xf32>
      %80 = arith.addf %78, %79 : vector<2x128xf32>
      %81 = vector.extract_strided_slice %80 {offsets = [0, 0], sizes = [2, 32], strides = [1, 1]} : vector<2x128xf32> to vector<2x32xf32>
      %82 = arith.negf %81 : vector<2x32xf32>
      %83 = math.exp %82 : vector<2x32xf32>
      %cst_33 = arith.constant 1.000000e+00 : f32
      %84 = vector.broadcast %cst_33 : f32 to vector<2x32xf32>
      %85 = arith.addf %84, %83 : vector<2x32xf32>
      %86 = arith.divf %84, %85 : vector<2x32xf32>
      %87 = vector.extract_strided_slice %80 {offsets = [0, 32], sizes = [2, 32], strides = [1, 1]} : vector<2x128xf32> to vector<2x32xf32>
      %88 = arith.negf %87 : vector<2x32xf32>
      %89 = math.exp %88 : vector<2x32xf32>
      %cst_34 = arith.constant 1.000000e+00 : f32
      %90 = vector.broadcast %cst_34 : f32 to vector<2x32xf32>
      %91 = arith.addf %90, %89 : vector<2x32xf32>
      %92 = arith.divf %90, %91 : vector<2x32xf32>
      %93 = vector.extract_strided_slice %80 {offsets = [0, 64], sizes = [2, 32], strides = [1, 1]} : vector<2x128xf32> to vector<2x32xf32>
      %94 = math.tanh %93 : vector<2x32xf32>
      %95 = vector.extract_strided_slice %80 {offsets = [0, 96], sizes = [2, 32], strides = [1, 1]} : vector<2x128xf32> to vector<2x32xf32>
      %96 = arith.negf %95 : vector<2x32xf32>
      %97 = math.exp %96 : vector<2x32xf32>
      %cst_35 = arith.constant 1.000000e+00 : f32
      %98 = vector.broadcast %cst_35 : f32 to vector<2x32xf32>
      %99 = arith.addf %98, %97 : vector<2x32xf32>
      %100 = arith.divf %98, %99 : vector<2x32xf32>
      %101 = arith.mulf %92, %71 : vector<2x32xf32>
      %102 = arith.mulf %86, %94 : vector<2x32xf32>
      %103 = arith.addf %101, %102 : vector<2x32xf32>
      %104 = math.tanh %103 : vector<2x32xf32>
      %105 = arith.mulf %100, %104 : vector<2x32xf32>
      %c0_36 = arith.constant 0 : index
      %c2_37 = arith.constant 2 : index
      %c0_38 = arith.constant 0 : index
      %c0_39 = arith.constant 0 : index
      %106 = vector.load %arg4[%c0_36, %c2_37, %c0_38, %c0_39] : memref<1x8x2x32xf32, #tpu.memory_space<vmem>>, vector<1x1x2x32xf32>
      %107 = vector.shape_cast %106 : vector<1x1x2x32xf32> to vector<2x32xf32>
      %108 = vector.shape_cast %105 : vector<2x32xf32> to vector<1x1x2x32xf32>
      tpu.vector_store %arg4[%c0_36, %c2_37, %c0_38, %c0_39], %108 {strides = array<i32>} : memref<1x8x2x32xf32, #tpu.memory_space<vmem>>, vector<1x1x2x32xf32>,
      %c3 = arith.constant 3 : index
      %c0_40 = arith.constant 0 : index
      %c0_41 = arith.constant 0 : index
      %109 = vector.load %arg2[%c3, %c0_40, %c0_41] : memref<8x2x128xf32, #tpu.memory_space<vmem>>, vector<1x2x128xf32>
      %110 = vector.shape_cast %109 : vector<1x2x128xf32> to vector<2x128xf32>
      %cst_42 = arith.constant dense<0.000000e+00> : vector<2x128xf32>
      %111 = tpu.matmul %105, %4, %cst_42 {dimension_numbers = #tpu.dot_dimension_numbers<[1], [0], [0], [1], [0, 0, 1, 1], [], []>} : vector<2x32xf32>, vector<32x128xf32>, vector<2x128xf32> -> vector<2x128xf32>
      %112 = arith.addf %110, %111 : vector<2x128xf32>
      %113 = vector.extract_strided_slice %112 {offsets = [0, 0], sizes = [2, 32], strides = [1, 1]} : vector<2x128xf32> to vector<2x32xf32>
      %114 = arith.negf %113 : vector<2x32xf32>
      %115 = math.exp %114 : vector<2x32xf32>
      %cst_43 = arith.constant 1.000000e+00 : f32
      %116 = vector.broadcast %cst_43 : f32 to vector<2x32xf32>
      %117 = arith.addf %116, %115 : vector<2x32xf32>
      %118 = arith.divf %116, %117 : vector<2x32xf32>
      %119 = vector.extract_strided_slice %112 {offsets = [0, 32], sizes = [2, 32], strides = [1, 1]} : vector<2x128xf32> to vector<2x32xf32>
      %120 = arith.negf %119 : vector<2x32xf32>
      %121 = math.exp %120 : vector<2x32xf32>
      %cst_44 = arith.constant 1.000000e+00 : f32
      %122 = vector.broadcast %cst_44 : f32 to vector<2x32xf32>
      %123 = arith.addf %122, %121 : vector<2x32xf32>
      %124 = arith.divf %122, %123 : vector<2x32xf32>
      %125 = vector.extract_strided_slice %112 {offsets = [0, 64], sizes = [2, 32], strides = [1, 1]} : vector<2x128xf32> to vector<2x32xf32>
      %126 = math.tanh %125 : vector<2x32xf32>
      %127 = vector.extract_strided_slice %112 {offsets = [0, 96], sizes = [2, 32], strides = [1, 1]} : vector<2x128xf32> to vector<2x32xf32>
      %128 = arith.negf %127 : vector<2x32xf32>
      %129 = math.exp %128 : vector<2x32xf32>
      %cst_45 = arith.constant 1.000000e+00 : f32
      %130 = vector.broadcast %cst_45 : f32 to vector<2x32xf32>
      %131 = arith.addf %130, %129 : vector<2x32xf32>
      %132 = arith.divf %130, %131 : vector<2x32xf32>
      %133 = arith.mulf %124, %103 : vector<2x32xf32>
      %134 = arith.mulf %118, %126 : vector<2x32xf32>
      %135 = arith.addf %133, %134 : vector<2x32xf32>
      %136 = math.tanh %135 : vector<2x32xf32>
      %137 = arith.mulf %132, %136 : vector<2x32xf32>
      %c0_46 = arith.constant 0 : index
      %c3_47 = arith.constant 3 : index
      %c0_48 = arith.constant 0 : index
      %c0_49 = arith.constant 0 : index
      %138 = vector.load %arg4[%c0_46, %c3_47, %c0_48, %c0_49] : memref<1x8x2x32xf32, #tpu.memory_space<vmem>>, vector<1x1x2x32xf32>
      %139 = vector.shape_cast %138 : vector<1x1x2x32xf32> to vector<2x32xf32>
      %140 = vector.shape_cast %137 : vector<2x32xf32> to vector<1x1x2x32xf32>
      tpu.vector_store %arg4[%c0_46, %c3_47, %c0_48, %c0_49], %140 {strides = array<i32>} : memref<1x8x2x32xf32, #tpu.memory_space<vmem>>, vector<1x1x2x32xf32>,
      %c4 = arith.constant 4 : index
      %c0_50 = arith.constant 0 : index
      %c0_51 = arith.constant 0 : index
      %141 = vector.load %arg2[%c4, %c0_50, %c0_51] : memref<8x2x128xf32, #tpu.memory_space<vmem>>, vector<1x2x128xf32>
      %142 = vector.shape_cast %141 : vector<1x2x128xf32> to vector<2x128xf32>
      %cst_52 = arith.constant dense<0.000000e+00> : vector<2x128xf32>
      %143 = tpu.matmul %137, %4, %cst_52 {dimension_numbers = #tpu.dot_dimension_numbers<[1], [0], [0], [1], [0, 0, 1, 1], [], []>} : vector<2x32xf32>, vector<32x128xf32>, vector<2x128xf32> -> vector<2x128xf32>
      %144 = arith.addf %142, %143 : vector<2x128xf32>
      %145 = vector.extract_strided_slice %144 {offsets = [0, 0], sizes = [2, 32], strides = [1, 1]} : vector<2x128xf32> to vector<2x32xf32>
      %146 = arith.negf %145 : vector<2x32xf32>
      %147 = math.exp %146 : vector<2x32xf32>
      %cst_53 = arith.constant 1.000000e+00 : f32
      %148 = vector.broadcast %cst_53 : f32 to vector<2x32xf32>
      %149 = arith.addf %148, %147 : vector<2x32xf32>
      %150 = arith.divf %148, %149 : vector<2x32xf32>
      %151 = vector.extract_strided_slice %144 {offsets = [0, 32], sizes = [2, 32], strides = [1, 1]} : vector<2x128xf32> to vector<2x32xf32>
      %152 = arith.negf %151 : vector<2x32xf32>
      %153 = math.exp %152 : vector<2x32xf32>
      %cst_54 = arith.constant 1.000000e+00 : f32
      %154 = vector.broadcast %cst_54 : f32 to vector<2x32xf32>
      %155 = arith.addf %154, %153 : vector<2x32xf32>
      %156 = arith.divf %154, %155 : vector<2x32xf32>
      %157 = vector.extract_strided_slice %144 {offsets = [0, 64], sizes = [2, 32], strides = [1, 1]} : vector<2x128xf32> to vector<2x32xf32>
      %158 = math.tanh %157 : vector<2x32xf32>
      %159 = vector.extract_strided_slice %144 {offsets = [0, 96], sizes = [2, 32], strides = [1, 1]} : vector<2x128xf32> to vector<2x32xf32>
      %160 = arith.negf %159 : vector<2x32xf32>
      %161 = math.exp %160 : vector<2x32xf32>
      %cst_55 = arith.constant 1.000000e+00 : f32
      %162 = vector.broadcast %cst_55 : f32 to vector<2x32xf32>
      %163 = arith.addf %162, %161 : vector<2x32xf32>
      %164 = arith.divf %162, %163 : vector<2x32xf32>
      %165 = arith.mulf %156, %135 : vector<2x32xf32>
      %166 = arith.mulf %150, %158 : vector<2x32xf32>
      %167 = arith.addf %165, %166 : vector<2x32xf32>
      %168 = math.tanh %167 : vector<2x32xf32>
      %169 = arith.mulf %164, %168 : vector<2x32xf32>
      %c0_56 = arith.constant 0 : index
      %c4_57 = arith.constant 4 : index
      %c0_58 = arith.constant 0 : index
      %c0_59 = arith.constant 0 : index
      %170 = vector.load %arg4[%c0_56, %c4_57, %c0_58, %c0_59] : memref<1x8x2x32xf32, #tpu.memory_space<vmem>>, vector<1x1x2x32xf32>
      %171 = vector.shape_cast %170 : vector<1x1x2x32xf32> to vector<2x32xf32>
      %172 = vector.shape_cast %169 : vector<2x32xf32> to vector<1x1x2x32xf32>
      tpu.vector_store %arg4[%c0_56, %c4_57, %c0_58, %c0_59], %172 {strides = array<i32>} : memref<1x8x2x32xf32, #tpu.memory_space<vmem>>, vector<1x1x2x32xf32>,
      %c5 = arith.constant 5 : index
      %c0_60 = arith.constant 0 : index
      %c0_61 = arith.constant 0 : index
      %173 = vector.load %arg2[%c5, %c0_60, %c0_61] : memref<8x2x128xf32, #tpu.memory_space<vmem>>, vector<1x2x128xf32>
      %174 = vector.shape_cast %173 : vector<1x2x128xf32> to vector<2x128xf32>
      %cst_62 = arith.constant dense<0.000000e+00> : vector<2x128xf32>
      %175 = tpu.matmul %169, %4, %cst_62 {dimension_numbers = #tpu.dot_dimension_numbers<[1], [0], [0], [1], [0, 0, 1, 1], [], []>} : vector<2x32xf32>, vector<32x128xf32>, vector<2x128xf32> -> vector<2x128xf32>
      %176 = arith.addf %174, %175 : vector<2x128xf32>
      %177 = vector.extract_strided_slice %176 {offsets = [0, 0], sizes = [2, 32], strides = [1, 1]} : vector<2x128xf32> to vector<2x32xf32>
      %178 = arith.negf %177 : vector<2x32xf32>
      %179 = math.exp %178 : vector<2x32xf32>
      %cst_63 = arith.constant 1.000000e+00 : f32
      %180 = vector.broadcast %cst_63 : f32 to vector<2x32xf32>
      %181 = arith.addf %180, %179 : vector<2x32xf32>
      %182 = arith.divf %180, %181 : vector<2x32xf32>
      %183 = vector.extract_strided_slice %176 {offsets = [0, 32], sizes = [2, 32], strides = [1, 1]} : vector<2x128xf32> to vector<2x32xf32>
      %184 = arith.negf %183 : vector<2x32xf32>
      %185 = math.exp %184 : vector<2x32xf32>
      %cst_64 = arith.constant 1.000000e+00 : f32
      %186 = vector.broadcast %cst_64 : f32 to vector<2x32xf32>
      %187 = arith.addf %186, %185 : vector<2x32xf32>
      %188 = arith.divf %186, %187 : vector<2x32xf32>
      %189 = vector.extract_strided_slice %176 {offsets = [0, 64], sizes = [2, 32], strides = [1, 1]} : vector<2x128xf32> to vector<2x32xf32>
      %190 = math.tanh %189 : vector<2x32xf32>
      %191 = vector.extract_strided_slice %176 {offsets = [0, 96], sizes = [2, 32], strides = [1, 1]} : vector<2x128xf32> to vector<2x32xf32>
      %192 = arith.negf %191 : vector<2x32xf32>
      %193 = math.exp %192 : vector<2x32xf32>
      %cst_65 = arith.constant 1.000000e+00 : f32
      %194 = vector.broadcast %cst_65 : f32 to vector<2x32xf32>
      %195 = arith.addf %194, %193 : vector<2x32xf32>
      %196 = arith.divf %194, %195 : vector<2x32xf32>
      %197 = arith.mulf %188, %167 : vector<2x32xf32>
      %198 = arith.mulf %182, %190 : vector<2x32xf32>
      %199 = arith.addf %197, %198 : vector<2x32xf32>
      %200 = math.tanh %199 : vector<2x32xf32>
      %201 = arith.mulf %196, %200 : vector<2x32xf32>
      %c0_66 = arith.constant 0 : index
      %c5_67 = arith.constant 5 : index
      %c0_68 = arith.constant 0 : index
      %c0_69 = arith.constant 0 : index
      %202 = vector.load %arg4[%c0_66, %c5_67, %c0_68, %c0_69] : memref<1x8x2x32xf32, #tpu.memory_space<vmem>>, vector<1x1x2x32xf32>
      %203 = vector.shape_cast %202 : vector<1x1x2x32xf32> to vector<2x32xf32>
      %204 = vector.shape_cast %201 : vector<2x32xf32> to vector<1x1x2x32xf32>
      tpu.vector_store %arg4[%c0_66, %c5_67, %c0_68, %c0_69], %204 {strides = array<i32>} : memref<1x8x2x32xf32, #tpu.memory_space<vmem>>, vector<1x1x2x32xf32>,
      %c6 = arith.constant 6 : index
      %c0_70 = arith.constant 0 : index
      %c0_71 = arith.constant 0 : index
      %205 = vector.load %arg2[%c6, %c0_70, %c0_71] : memref<8x2x128xf32, #tpu.memory_space<vmem>>, vector<1x2x128xf32>
      %206 = vector.shape_cast %205 : vector<1x2x128xf32> to vector<2x128xf32>
      %cst_72 = arith.constant dense<0.000000e+00> : vector<2x128xf32>
      %207 = tpu.matmul %201, %4, %cst_72 {dimension_numbers = #tpu.dot_dimension_numbers<[1], [0], [0], [1], [0, 0, 1, 1], [], []>} : vector<2x32xf32>, vector<32x128xf32>, vector<2x128xf32> -> vector<2x128xf32>
      %208 = arith.addf %206, %207 : vector<2x128xf32>
      %209 = vector.extract_strided_slice %208 {offsets = [0, 0], sizes = [2, 32], strides = [1, 1]} : vector<2x128xf32> to vector<2x32xf32>
      %210 = arith.negf %209 : vector<2x32xf32>
      %211 = math.exp %210 : vector<2x32xf32>
      %cst_73 = arith.constant 1.000000e+00 : f32
      %212 = vector.broadcast %cst_73 : f32 to vector<2x32xf32>
      %213 = arith.addf %212, %211 : vector<2x32xf32>
      %214 = arith.divf %212, %213 : vector<2x32xf32>
      %215 = vector.extract_strided_slice %208 {offsets = [0, 32], sizes = [2, 32], strides = [1, 1]} : vector<2x128xf32> to vector<2x32xf32>
      %216 = arith.negf %215 : vector<2x32xf32>
      %217 = math.exp %216 : vector<2x32xf32>
      %cst_74 = arith.constant 1.000000e+00 : f32
      %218 = vector.broadcast %cst_74 : f32 to vector<2x32xf32>
      %219 = arith.addf %218, %217 : vector<2x32xf32>
      %220 = arith.divf %218, %219 : vector<2x32xf32>
      %221 = vector.extract_strided_slice %208 {offsets = [0, 64], sizes = [2, 32], strides = [1, 1]} : vector<2x128xf32> to vector<2x32xf32>
      %222 = math.tanh %221 : vector<2x32xf32>
      %223 = vector.extract_strided_slice %208 {offsets = [0, 96], sizes = [2, 32], strides = [1, 1]} : vector<2x128xf32> to vector<2x32xf32>
      %224 = arith.negf %223 : vector<2x32xf32>
      %225 = math.exp %224 : vector<2x32xf32>
      %cst_75 = arith.constant 1.000000e+00 : f32
      %226 = vector.broadcast %cst_75 : f32 to vector<2x32xf32>
      %227 = arith.addf %226, %225 : vector<2x32xf32>
      %228 = arith.divf %226, %227 : vector<2x32xf32>
      %229 = arith.mulf %220, %199 : vector<2x32xf32>
      %230 = arith.mulf %214, %222 : vector<2x32xf32>
      %231 = arith.addf %229, %230 : vector<2x32xf32>
      %232 = math.tanh %231 : vector<2x32xf32>
      %233 = arith.mulf %228, %232 : vector<2x32xf32>
      %c0_76 = arith.constant 0 : index
      %c6_77 = arith.constant 6 : index
      %c0_78 = arith.constant 0 : index
      %c0_79 = arith.constant 0 : index
      %234 = vector.load %arg4[%c0_76, %c6_77, %c0_78, %c0_79] : memref<1x8x2x32xf32, #tpu.memory_space<vmem>>, vector<1x1x2x32xf32>
      %235 = vector.shape_cast %234 : vector<1x1x2x32xf32> to vector<2x32xf32>
      %236 = vector.shape_cast %233 : vector<2x32xf32> to vector<1x1x2x32xf32>
      tpu.vector_store %arg4[%c0_76, %c6_77, %c0_78, %c0_79], %236 {strides = array<i32>} : memref<1x8x2x32xf32, #tpu.memory_space<vmem>>, vector<1x1x2x32xf32>,
      %c7 = arith.constant 7 : index
      %c0_80 = arith.constant 0 : index
      %c0_81 = arith.constant 0 : index
      %237 = vector.load %arg2[%c7, %c0_80, %c0_81] : memref<8x2x128xf32, #tpu.memory_space<vmem>>, vector<1x2x128xf32>
      %238 = vector.shape_cast %237 : vector<1x2x128xf32> to vector<2x128xf32>
      %cst_82 = arith.constant dense<0.000000e+00> : vector<2x128xf32>
      %239 = tpu.matmul %233, %4, %cst_82 {dimension_numbers = #tpu.dot_dimension_numbers<[1], [0], [0], [1], [0, 0, 1, 1], [], []>} : vector<2x32xf32>, vector<32x128xf32>, vector<2x128xf32> -> vector<2x128xf32>
      %240 = arith.addf %238, %239 : vector<2x128xf32>
      %241 = vector.extract_strided_slice %240 {offsets = [0, 0], sizes = [2, 32], strides = [1, 1]} : vector<2x128xf32> to vector<2x32xf32>
      %242 = arith.negf %241 : vector<2x32xf32>
      %243 = math.exp %242 : vector<2x32xf32>
      %cst_83 = arith.constant 1.000000e+00 : f32
      %244 = vector.broadcast %cst_83 : f32 to vector<2x32xf32>
      %245 = arith.addf %244, %243 : vector<2x32xf32>
      %246 = arith.divf %244, %245 : vector<2x32xf32>
      %247 = vector.extract_strided_slice %240 {offsets = [0, 32], sizes = [2, 32], strides = [1, 1]} : vector<2x128xf32> to vector<2x32xf32>
      %248 = arith.negf %247 : vector<2x32xf32>
      %249 = math.exp %248 : vector<2x32xf32>
      %cst_84 = arith.constant 1.000000e+00 : f32
      %250 = vector.broadcast %cst_84 : f32 to vector<2x32xf32>
      %251 = arith.addf %250, %249 : vector<2x32xf32>
      %252 = arith.divf %250, %251 : vector<2x32xf32>
      %253 = vector.extract_strided_slice %240 {offsets = [0, 64], sizes = [2, 32], strides = [1, 1]} : vector<2x128xf32> to vector<2x32xf32>
      %254 = math.tanh %253 : vector<2x32xf32>
      %255 = vector.extract_strided_slice %240 {offsets = [0, 96], sizes = [2, 32], strides = [1, 1]} : vector<2x128xf32> to vector<2x32xf32>
      %256 = arith.negf %255 : vector<2x32xf32>
      %257 = math.exp %256 : vector<2x32xf32>
      %cst_85 = arith.constant 1.000000e+00 : f32
      %258 = vector.broadcast %cst_85 : f32 to vector<2x32xf32>
      %259 = arith.addf %258, %257 : vector<2x32xf32>
      %260 = arith.divf %258, %259 : vector<2x32xf32>
      %261 = arith.mulf %252, %231 : vector<2x32xf32>
      %262 = arith.mulf %246, %254 : vector<2x32xf32>
      %263 = arith.addf %261, %262 : vector<2x32xf32>
      %264 = math.tanh %263 : vector<2x32xf32>
      %265 = arith.mulf %260, %264 : vector<2x32xf32>
      %c0_86 = arith.constant 0 : index
      %c7_87 = arith.constant 7 : index
      %c0_88 = arith.constant 0 : index
      %c0_89 = arith.constant 0 : index
      %266 = vector.load %arg4[%c0_86, %c7_87, %c0_88, %c0_89] : memref<1x8x2x32xf32, #tpu.memory_space<vmem>>, vector<1x1x2x32xf32>
      %267 = vector.shape_cast %266 : vector<1x1x2x32xf32> to vector<2x32xf32>
      %268 = vector.shape_cast %265 : vector<2x32xf32> to vector<1x1x2x32xf32>
      tpu.vector_store %arg4[%c0_86, %c7_87, %c0_88, %c0_89], %268 {strides = array<i32>} : memref<1x8x2x32xf32, #tpu.memory_space<vmem>>, vector<1x1x2x32xf32>,
      %c0_90 = arith.constant 0 : index
      %c0_91 = arith.constant 0 : index
      %269 = vector.load %arg5[%c0_90, %c0_91] : memref<2x32xf32, #tpu.memory_space<vmem>>, vector<2x32xf32>
      tpu.vector_store %arg5[%c0_90, %c0_91], %265 {strides = array<i32>} : memref<2x32xf32, #tpu.memory_space<vmem>>, vector<2x32xf32>,
      %c0_92 = arith.constant 0 : index
      %c0_93 = arith.constant 0 : index
      %270 = vector.load %arg6[%c0_92, %c0_93] : memref<2x32xf32, #tpu.memory_space<vmem>>, vector<2x32xf32>
      tpu.vector_store %arg6[%c0_92, %c0_93], %263 {strides = array<i32>} : memref<2x32xf32, #tpu.memory_space<vmem>>, vector<2x32xf32>,
    } else {
    }
    %c1_i32 = arith.constant 1 : i32
    %8 = arith.cmpi eq, %arg0, %c1_i32 : i32
    %9 = arith.extui %8 : i1 to i32
    %c0_i32_5 = arith.constant 0 : i32
    %10 = arith.cmpi ne, %9, %c0_i32_5 : i32
    scf.if %10 {
      %c0_6 = arith.constant 0 : index
      %c0_7 = arith.constant 0 : index
      %11 = vector.load %arg5[%c0_6, %c0_7] : memref<2x32xf32, #tpu.memory_space<vmem>>, vector<2x32xf32>
      %c0_8 = arith.constant 0 : index
      %c0_9 = arith.constant 0 : index
      %12 = vector.load %arg6[%c0_8, %c0_9] : memref<2x32xf32, #tpu.memory_space<vmem>>, vector<2x32xf32>
      %c7 = arith.constant 7 : index
      %c0_10 = arith.constant 0 : index
      %c0_11 = arith.constant 0 : index
      %13 = vector.load %arg2[%c7, %c0_10, %c0_11] : memref<8x2x128xf32, #tpu.memory_space<vmem>>, vector<1x2x128xf32>
      %14 = vector.shape_cast %13 : vector<1x2x128xf32> to vector<2x128xf32>
      %cst = arith.constant dense<0.000000e+00> : vector<2x128xf32>
      %15 = tpu.matmul %11, %4, %cst {dimension_numbers = #tpu.dot_dimension_numbers<[1], [0], [0], [1], [0, 0, 1, 1], [], []>} : vector<2x32xf32>, vector<32x128xf32>, vector<2x128xf32> -> vector<2x128xf32>
      %16 = arith.addf %14, %15 : vector<2x128xf32>
      %17 = vector.extract_strided_slice %16 {offsets = [0, 0], sizes = [2, 32], strides = [1, 1]} : vector<2x128xf32> to vector<2x32xf32>
      %18 = arith.negf %17 : vector<2x32xf32>
      %19 = math.exp %18 : vector<2x32xf32>
      %cst_12 = arith.constant 1.000000e+00 : f32
      %20 = vector.broadcast %cst_12 : f32 to vector<2x32xf32>
      %21 = arith.addf %20, %19 : vector<2x32xf32>
      %22 = arith.divf %20, %21 : vector<2x32xf32>
      %23 = vector.extract_strided_slice %16 {offsets = [0, 32], sizes = [2, 32], strides = [1, 1]} : vector<2x128xf32> to vector<2x32xf32>
      %24 = arith.negf %23 : vector<2x32xf32>
      %25 = math.exp %24 : vector<2x32xf32>
      %cst_13 = arith.constant 1.000000e+00 : f32
      %26 = vector.broadcast %cst_13 : f32 to vector<2x32xf32>
      %27 = arith.addf %26, %25 : vector<2x32xf32>
      %28 = arith.divf %26, %27 : vector<2x32xf32>
      %29 = vector.extract_strided_slice %16 {offsets = [0, 64], sizes = [2, 32], strides = [1, 1]} : vector<2x128xf32> to vector<2x32xf32>
      %30 = math.tanh %29 : vector<2x32xf32>
      %31 = vector.extract_strided_slice %16 {offsets = [0, 96], sizes = [2, 32], strides = [1, 1]} : vector<2x128xf32> to vector<2x32xf32>
      %32 = arith.negf %31 : vector<2x32xf32>
      %33 = math.exp %32 : vector<2x32xf32>
      %cst_14 = arith.constant 1.000000e+00 : f32
      %34 = vector.broadcast %cst_14 : f32 to vector<2x32xf32>
      %35 = arith.addf %34, %33 : vector<2x32xf32>
      %36 = arith.divf %34, %35 : vector<2x32xf32>
      %37 = arith.mulf %28, %12 : vector<2x32xf32>
      %38 = arith.mulf %22, %30 : vector<2x32xf32>
      %39 = arith.addf %37, %38 : vector<2x32xf32>
      %40 = math.tanh %39 : vector<2x32xf32>
      %41 = arith.mulf %36, %40 : vector<2x32xf32>
      %c0_15 = arith.constant 0 : index
      %c7_16 = arith.constant 7 : index
      %c0_17 = arith.constant 0 : index
      %c0_18 = arith.constant 0 : index
      %42 = vector.load %arg4[%c0_15, %c7_16, %c0_17, %c0_18] : memref<1x8x2x32xf32, #tpu.memory_space<vmem>>, vector<1x1x2x32xf32>
      %43 = vector.shape_cast %42 : vector<1x1x2x32xf32> to vector<2x32xf32>
      %44 = vector.shape_cast %41 : vector<2x32xf32> to vector<1x1x2x32xf32>
      tpu.vector_store %arg4[%c0_15, %c7_16, %c0_17, %c0_18], %44 {strides = array<i32>} : memref<1x8x2x32xf32, #tpu.memory_space<vmem>>, vector<1x1x2x32xf32>,
      %c6 = arith.constant 6 : index
      %c0_19 = arith.constant 0 : index
      %c0_20 = arith.constant 0 : index
      %45 = vector.load %arg2[%c6, %c0_19, %c0_20] : memref<8x2x128xf32, #tpu.memory_space<vmem>>, vector<1x2x128xf32>
      %46 = vector.shape_cast %45 : vector<1x2x128xf32> to vector<2x128xf32>
      %cst_21 = arith.constant dense<0.000000e+00> : vector<2x128xf32>
      %47 = tpu.matmul %41, %4, %cst_21 {dimension_numbers = #tpu.dot_dimension_numbers<[1], [0], [0], [1], [0, 0, 1, 1], [], []>} : vector<2x32xf32>, vector<32x128xf32>, vector<2x128xf32> -> vector<2x128xf32>
      %48 = arith.addf %46, %47 : vector<2x128xf32>
      %49 = vector.extract_strided_slice %48 {offsets = [0, 0], sizes = [2, 32], strides = [1, 1]} : vector<2x128xf32> to vector<2x32xf32>
      %50 = arith.negf %49 : vector<2x32xf32>
      %51 = math.exp %50 : vector<2x32xf32>
      %cst_22 = arith.constant 1.000000e+00 : f32
      %52 = vector.broadcast %cst_22 : f32 to vector<2x32xf32>
      %53 = arith.addf %52, %51 : vector<2x32xf32>
      %54 = arith.divf %52, %53 : vector<2x32xf32>
      %55 = vector.extract_strided_slice %48 {offsets = [0, 32], sizes = [2, 32], strides = [1, 1]} : vector<2x128xf32> to vector<2x32xf32>
      %56 = arith.negf %55 : vector<2x32xf32>
      %57 = math.exp %56 : vector<2x32xf32>
      %cst_23 = arith.constant 1.000000e+00 : f32
      %58 = vector.broadcast %cst_23 : f32 to vector<2x32xf32>
      %59 = arith.addf %58, %57 : vector<2x32xf32>
      %60 = arith.divf %58, %59 : vector<2x32xf32>
      %61 = vector.extract_strided_slice %48 {offsets = [0, 64], sizes = [2, 32], strides = [1, 1]} : vector<2x128xf32> to vector<2x32xf32>
      %62 = math.tanh %61 : vector<2x32xf32>
      %63 = vector.extract_strided_slice %48 {offsets = [0, 96], sizes = [2, 32], strides = [1, 1]} : vector<2x128xf32> to vector<2x32xf32>
      %64 = arith.negf %63 : vector<2x32xf32>
      %65 = math.exp %64 : vector<2x32xf32>
      %cst_24 = arith.constant 1.000000e+00 : f32
      %66 = vector.broadcast %cst_24 : f32 to vector<2x32xf32>
      %67 = arith.addf %66, %65 : vector<2x32xf32>
      %68 = arith.divf %66, %67 : vector<2x32xf32>
      %69 = arith.mulf %60, %39 : vector<2x32xf32>
      %70 = arith.mulf %54, %62 : vector<2x32xf32>
      %71 = arith.addf %69, %70 : vector<2x32xf32>
      %72 = math.tanh %71 : vector<2x32xf32>
      %73 = arith.mulf %68, %72 : vector<2x32xf32>
      %c0_25 = arith.constant 0 : index
      %c6_26 = arith.constant 6 : index
      %c0_27 = arith.constant 0 : index
      %c0_28 = arith.constant 0 : index
      %74 = vector.load %arg4[%c0_25, %c6_26, %c0_27, %c0_28] : memref<1x8x2x32xf32, #tpu.memory_space<vmem>>, vector<1x1x2x32xf32>
      %75 = vector.shape_cast %74 : vector<1x1x2x32xf32> to vector<2x32xf32>
      %76 = vector.shape_cast %73 : vector<2x32xf32> to vector<1x1x2x32xf32>
      tpu.vector_store %arg4[%c0_25, %c6_26, %c0_27, %c0_28], %76 {strides = array<i32>} : memref<1x8x2x32xf32, #tpu.memory_space<vmem>>, vector<1x1x2x32xf32>,
      %c5 = arith.constant 5 : index
      %c0_29 = arith.constant 0 : index
      %c0_30 = arith.constant 0 : index
      %77 = vector.load %arg2[%c5, %c0_29, %c0_30] : memref<8x2x128xf32, #tpu.memory_space<vmem>>, vector<1x2x128xf32>
      %78 = vector.shape_cast %77 : vector<1x2x128xf32> to vector<2x128xf32>
      %cst_31 = arith.constant dense<0.000000e+00> : vector<2x128xf32>
      %79 = tpu.matmul %73, %4, %cst_31 {dimension_numbers = #tpu.dot_dimension_numbers<[1], [0], [0], [1], [0, 0, 1, 1], [], []>} : vector<2x32xf32>, vector<32x128xf32>, vector<2x128xf32> -> vector<2x128xf32>
      %80 = arith.addf %78, %79 : vector<2x128xf32>
      %81 = vector.extract_strided_slice %80 {offsets = [0, 0], sizes = [2, 32], strides = [1, 1]} : vector<2x128xf32> to vector<2x32xf32>
      %82 = arith.negf %81 : vector<2x32xf32>
      %83 = math.exp %82 : vector<2x32xf32>
      %cst_32 = arith.constant 1.000000e+00 : f32
      %84 = vector.broadcast %cst_32 : f32 to vector<2x32xf32>
      %85 = arith.addf %84, %83 : vector<2x32xf32>
      %86 = arith.divf %84, %85 : vector<2x32xf32>
      %87 = vector.extract_strided_slice %80 {offsets = [0, 32], sizes = [2, 32], strides = [1, 1]} : vector<2x128xf32> to vector<2x32xf32>
      %88 = arith.negf %87 : vector<2x32xf32>
      %89 = math.exp %88 : vector<2x32xf32>
      %cst_33 = arith.constant 1.000000e+00 : f32
      %90 = vector.broadcast %cst_33 : f32 to vector<2x32xf32>
      %91 = arith.addf %90, %89 : vector<2x32xf32>
      %92 = arith.divf %90, %91 : vector<2x32xf32>
      %93 = vector.extract_strided_slice %80 {offsets = [0, 64], sizes = [2, 32], strides = [1, 1]} : vector<2x128xf32> to vector<2x32xf32>
      %94 = math.tanh %93 : vector<2x32xf32>
      %95 = vector.extract_strided_slice %80 {offsets = [0, 96], sizes = [2, 32], strides = [1, 1]} : vector<2x128xf32> to vector<2x32xf32>
      %96 = arith.negf %95 : vector<2x32xf32>
      %97 = math.exp %96 : vector<2x32xf32>
      %cst_34 = arith.constant 1.000000e+00 : f32
      %98 = vector.broadcast %cst_34 : f32 to vector<2x32xf32>
      %99 = arith.addf %98, %97 : vector<2x32xf32>
      %100 = arith.divf %98, %99 : vector<2x32xf32>
      %101 = arith.mulf %92, %71 : vector<2x32xf32>
      %102 = arith.mulf %86, %94 : vector<2x32xf32>
      %103 = arith.addf %101, %102 : vector<2x32xf32>
      %104 = math.tanh %103 : vector<2x32xf32>
      %105 = arith.mulf %100, %104 : vector<2x32xf32>
      %c0_35 = arith.constant 0 : index
      %c5_36 = arith.constant 5 : index
      %c0_37 = arith.constant 0 : index
      %c0_38 = arith.constant 0 : index
      %106 = vector.load %arg4[%c0_35, %c5_36, %c0_37, %c0_38] : memref<1x8x2x32xf32, #tpu.memory_space<vmem>>, vector<1x1x2x32xf32>
      %107 = vector.shape_cast %106 : vector<1x1x2x32xf32> to vector<2x32xf32>
      %108 = vector.shape_cast %105 : vector<2x32xf32> to vector<1x1x2x32xf32>
      tpu.vector_store %arg4[%c0_35, %c5_36, %c0_37, %c0_38], %108 {strides = array<i32>} : memref<1x8x2x32xf32, #tpu.memory_space<vmem>>, vector<1x1x2x32xf32>,
      %c4 = arith.constant 4 : index
      %c0_39 = arith.constant 0 : index
      %c0_40 = arith.constant 0 : index
      %109 = vector.load %arg2[%c4, %c0_39, %c0_40] : memref<8x2x128xf32, #tpu.memory_space<vmem>>, vector<1x2x128xf32>
      %110 = vector.shape_cast %109 : vector<1x2x128xf32> to vector<2x128xf32>
      %cst_41 = arith.constant dense<0.000000e+00> : vector<2x128xf32>
      %111 = tpu.matmul %105, %4, %cst_41 {dimension_numbers = #tpu.dot_dimension_numbers<[1], [0], [0], [1], [0, 0, 1, 1], [], []>} : vector<2x32xf32>, vector<32x128xf32>, vector<2x128xf32> -> vector<2x128xf32>
      %112 = arith.addf %110, %111 : vector<2x128xf32>
      %113 = vector.extract_strided_slice %112 {offsets = [0, 0], sizes = [2, 32], strides = [1, 1]} : vector<2x128xf32> to vector<2x32xf32>
      %114 = arith.negf %113 : vector<2x32xf32>
      %115 = math.exp %114 : vector<2x32xf32>
      %cst_42 = arith.constant 1.000000e+00 : f32
      %116 = vector.broadcast %cst_42 : f32 to vector<2x32xf32>
      %117 = arith.addf %116, %115 : vector<2x32xf32>
      %118 = arith.divf %116, %117 : vector<2x32xf32>
      %119 = vector.extract_strided_slice %112 {offsets = [0, 32], sizes = [2, 32], strides = [1, 1]} : vector<2x128xf32> to vector<2x32xf32>
      %120 = arith.negf %119 : vector<2x32xf32>
      %121 = math.exp %120 : vector<2x32xf32>
      %cst_43 = arith.constant 1.000000e+00 : f32
      %122 = vector.broadcast %cst_43 : f32 to vector<2x32xf32>
      %123 = arith.addf %122, %121 : vector<2x32xf32>
      %124 = arith.divf %122, %123 : vector<2x32xf32>
      %125 = vector.extract_strided_slice %112 {offsets = [0, 64], sizes = [2, 32], strides = [1, 1]} : vector<2x128xf32> to vector<2x32xf32>
      %126 = math.tanh %125 : vector<2x32xf32>
      %127 = vector.extract_strided_slice %112 {offsets = [0, 96], sizes = [2, 32], strides = [1, 1]} : vector<2x128xf32> to vector<2x32xf32>
      %128 = arith.negf %127 : vector<2x32xf32>
      %129 = math.exp %128 : vector<2x32xf32>
      %cst_44 = arith.constant 1.000000e+00 : f32
      %130 = vector.broadcast %cst_44 : f32 to vector<2x32xf32>
      %131 = arith.addf %130, %129 : vector<2x32xf32>
      %132 = arith.divf %130, %131 : vector<2x32xf32>
      %133 = arith.mulf %124, %103 : vector<2x32xf32>
      %134 = arith.mulf %118, %126 : vector<2x32xf32>
      %135 = arith.addf %133, %134 : vector<2x32xf32>
      %136 = math.tanh %135 : vector<2x32xf32>
      %137 = arith.mulf %132, %136 : vector<2x32xf32>
      %c0_45 = arith.constant 0 : index
      %c4_46 = arith.constant 4 : index
      %c0_47 = arith.constant 0 : index
      %c0_48 = arith.constant 0 : index
      %138 = vector.load %arg4[%c0_45, %c4_46, %c0_47, %c0_48] : memref<1x8x2x32xf32, #tpu.memory_space<vmem>>, vector<1x1x2x32xf32>
      %139 = vector.shape_cast %138 : vector<1x1x2x32xf32> to vector<2x32xf32>
      %140 = vector.shape_cast %137 : vector<2x32xf32> to vector<1x1x2x32xf32>
      tpu.vector_store %arg4[%c0_45, %c4_46, %c0_47, %c0_48], %140 {strides = array<i32>} : memref<1x8x2x32xf32, #tpu.memory_space<vmem>>, vector<1x1x2x32xf32>,
      %c3 = arith.constant 3 : index
      %c0_49 = arith.constant 0 : index
      %c0_50 = arith.constant 0 : index
      %141 = vector.load %arg2[%c3, %c0_49, %c0_50] : memref<8x2x128xf32, #tpu.memory_space<vmem>>, vector<1x2x128xf32>
      %142 = vector.shape_cast %141 : vector<1x2x128xf32> to vector<2x128xf32>
      %cst_51 = arith.constant dense<0.000000e+00> : vector<2x128xf32>
      %143 = tpu.matmul %137, %4, %cst_51 {dimension_numbers = #tpu.dot_dimension_numbers<[1], [0], [0], [1], [0, 0, 1, 1], [], []>} : vector<2x32xf32>, vector<32x128xf32>, vector<2x128xf32> -> vector<2x128xf32>
      %144 = arith.addf %142, %143 : vector<2x128xf32>
      %145 = vector.extract_strided_slice %144 {offsets = [0, 0], sizes = [2, 32], strides = [1, 1]} : vector<2x128xf32> to vector<2x32xf32>
      %146 = arith.negf %145 : vector<2x32xf32>
      %147 = math.exp %146 : vector<2x32xf32>
      %cst_52 = arith.constant 1.000000e+00 : f32
      %148 = vector.broadcast %cst_52 : f32 to vector<2x32xf32>
      %149 = arith.addf %148, %147 : vector<2x32xf32>
      %150 = arith.divf %148, %149 : vector<2x32xf32>
      %151 = vector.extract_strided_slice %144 {offsets = [0, 32], sizes = [2, 32], strides = [1, 1]} : vector<2x128xf32> to vector<2x32xf32>
      %152 = arith.negf %151 : vector<2x32xf32>
      %153 = math.exp %152 : vector<2x32xf32>
      %cst_53 = arith.constant 1.000000e+00 : f32
      %154 = vector.broadcast %cst_53 : f32 to vector<2x32xf32>
      %155 = arith.addf %154, %153 : vector<2x32xf32>
      %156 = arith.divf %154, %155 : vector<2x32xf32>
      %157 = vector.extract_strided_slice %144 {offsets = [0, 64], sizes = [2, 32], strides = [1, 1]} : vector<2x128xf32> to vector<2x32xf32>
      %158 = math.tanh %157 : vector<2x32xf32>
      %159 = vector.extract_strided_slice %144 {offsets = [0, 96], sizes = [2, 32], strides = [1, 1]} : vector<2x128xf32> to vector<2x32xf32>
      %160 = arith.negf %159 : vector<2x32xf32>
      %161 = math.exp %160 : vector<2x32xf32>
      %cst_54 = arith.constant 1.000000e+00 : f32
      %162 = vector.broadcast %cst_54 : f32 to vector<2x32xf32>
      %163 = arith.addf %162, %161 : vector<2x32xf32>
      %164 = arith.divf %162, %163 : vector<2x32xf32>
      %165 = arith.mulf %156, %135 : vector<2x32xf32>
      %166 = arith.mulf %150, %158 : vector<2x32xf32>
      %167 = arith.addf %165, %166 : vector<2x32xf32>
      %168 = math.tanh %167 : vector<2x32xf32>
      %169 = arith.mulf %164, %168 : vector<2x32xf32>
      %c0_55 = arith.constant 0 : index
      %c3_56 = arith.constant 3 : index
      %c0_57 = arith.constant 0 : index
      %c0_58 = arith.constant 0 : index
      %170 = vector.load %arg4[%c0_55, %c3_56, %c0_57, %c0_58] : memref<1x8x2x32xf32, #tpu.memory_space<vmem>>, vector<1x1x2x32xf32>
      %171 = vector.shape_cast %170 : vector<1x1x2x32xf32> to vector<2x32xf32>
      %172 = vector.shape_cast %169 : vector<2x32xf32> to vector<1x1x2x32xf32>
      tpu.vector_store %arg4[%c0_55, %c3_56, %c0_57, %c0_58], %172 {strides = array<i32>} : memref<1x8x2x32xf32, #tpu.memory_space<vmem>>, vector<1x1x2x32xf32>,
      %c2 = arith.constant 2 : index
      %c0_59 = arith.constant 0 : index
      %c0_60 = arith.constant 0 : index
      %173 = vector.load %arg2[%c2, %c0_59, %c0_60] : memref<8x2x128xf32, #tpu.memory_space<vmem>>, vector<1x2x128xf32>
      %174 = vector.shape_cast %173 : vector<1x2x128xf32> to vector<2x128xf32>
      %cst_61 = arith.constant dense<0.000000e+00> : vector<2x128xf32>
      %175 = tpu.matmul %169, %4, %cst_61 {dimension_numbers = #tpu.dot_dimension_numbers<[1], [0], [0], [1], [0, 0, 1, 1], [], []>} : vector<2x32xf32>, vector<32x128xf32>, vector<2x128xf32> -> vector<2x128xf32>
      %176 = arith.addf %174, %175 : vector<2x128xf32>
      %177 = vector.extract_strided_slice %176 {offsets = [0, 0], sizes = [2, 32], strides = [1, 1]} : vector<2x128xf32> to vector<2x32xf32>
      %178 = arith.negf %177 : vector<2x32xf32>
      %179 = math.exp %178 : vector<2x32xf32>
      %cst_62 = arith.constant 1.000000e+00 : f32
      %180 = vector.broadcast %cst_62 : f32 to vector<2x32xf32>
      %181 = arith.addf %180, %179 : vector<2x32xf32>
      %182 = arith.divf %180, %181 : vector<2x32xf32>
      %183 = vector.extract_strided_slice %176 {offsets = [0, 32], sizes = [2, 32], strides = [1, 1]} : vector<2x128xf32> to vector<2x32xf32>
      %184 = arith.negf %183 : vector<2x32xf32>
      %185 = math.exp %184 : vector<2x32xf32>
      %cst_63 = arith.constant 1.000000e+00 : f32
      %186 = vector.broadcast %cst_63 : f32 to vector<2x32xf32>
      %187 = arith.addf %186, %185 : vector<2x32xf32>
      %188 = arith.divf %186, %187 : vector<2x32xf32>
      %189 = vector.extract_strided_slice %176 {offsets = [0, 64], sizes = [2, 32], strides = [1, 1]} : vector<2x128xf32> to vector<2x32xf32>
      %190 = math.tanh %189 : vector<2x32xf32>
      %191 = vector.extract_strided_slice %176 {offsets = [0, 96], sizes = [2, 32], strides = [1, 1]} : vector<2x128xf32> to vector<2x32xf32>
      %192 = arith.negf %191 : vector<2x32xf32>
      %193 = math.exp %192 : vector<2x32xf32>
      %cst_64 = arith.constant 1.000000e+00 : f32
      %194 = vector.broadcast %cst_64 : f32 to vector<2x32xf32>
      %195 = arith.addf %194, %193 : vector<2x32xf32>
      %196 = arith.divf %194, %195 : vector<2x32xf32>
      %197 = arith.mulf %188, %167 : vector<2x32xf32>
      %198 = arith.mulf %182, %190 : vector<2x32xf32>
      %199 = arith.addf %197, %198 : vector<2x32xf32>
      %200 = math.tanh %199 : vector<2x32xf32>
      %201 = arith.mulf %196, %200 : vector<2x32xf32>
      %c0_65 = arith.constant 0 : index
      %c2_66 = arith.constant 2 : index
      %c0_67 = arith.constant 0 : index
      %c0_68 = arith.constant 0 : index
      %202 = vector.load %arg4[%c0_65, %c2_66, %c0_67, %c0_68] : memref<1x8x2x32xf32, #tpu.memory_space<vmem>>, vector<1x1x2x32xf32>
      %203 = vector.shape_cast %202 : vector<1x1x2x32xf32> to vector<2x32xf32>
      %204 = vector.shape_cast %201 : vector<2x32xf32> to vector<1x1x2x32xf32>
      tpu.vector_store %arg4[%c0_65, %c2_66, %c0_67, %c0_68], %204 {strides = array<i32>} : memref<1x8x2x32xf32, #tpu.memory_space<vmem>>, vector<1x1x2x32xf32>,
      %c1 = arith.constant 1 : index
      %c0_69 = arith.constant 0 : index
      %c0_70 = arith.constant 0 : index
      %205 = vector.load %arg2[%c1, %c0_69, %c0_70] : memref<8x2x128xf32, #tpu.memory_space<vmem>>, vector<1x2x128xf32>
      %206 = vector.shape_cast %205 : vector<1x2x128xf32> to vector<2x128xf32>
      %cst_71 = arith.constant dense<0.000000e+00> : vector<2x128xf32>
      %207 = tpu.matmul %201, %4, %cst_71 {dimension_numbers = #tpu.dot_dimension_numbers<[1], [0], [0], [1], [0, 0, 1, 1], [], []>} : vector<2x32xf32>, vector<32x128xf32>, vector<2x128xf32> -> vector<2x128xf32>
      %208 = arith.addf %206, %207 : vector<2x128xf32>
      %209 = vector.extract_strided_slice %208 {offsets = [0, 0], sizes = [2, 32], strides = [1, 1]} : vector<2x128xf32> to vector<2x32xf32>
      %210 = arith.negf %209 : vector<2x32xf32>
      %211 = math.exp %210 : vector<2x32xf32>
      %cst_72 = arith.constant 1.000000e+00 : f32
      %212 = vector.broadcast %cst_72 : f32 to vector<2x32xf32>
      %213 = arith.addf %212, %211 : vector<2x32xf32>
      %214 = arith.divf %212, %213 : vector<2x32xf32>
      %215 = vector.extract_strided_slice %208 {offsets = [0, 32], sizes = [2, 32], strides = [1, 1]} : vector<2x128xf32> to vector<2x32xf32>
      %216 = arith.negf %215 : vector<2x32xf32>
      %217 = math.exp %216 : vector<2x32xf32>
      %cst_73 = arith.constant 1.000000e+00 : f32
      %218 = vector.broadcast %cst_73 : f32 to vector<2x32xf32>
      %219 = arith.addf %218, %217 : vector<2x32xf32>
      %220 = arith.divf %218, %219 : vector<2x32xf32>
      %221 = vector.extract_strided_slice %208 {offsets = [0, 64], sizes = [2, 32], strides = [1, 1]} : vector<2x128xf32> to vector<2x32xf32>
      %222 = math.tanh %221 : vector<2x32xf32>
      %223 = vector.extract_strided_slice %208 {offsets = [0, 96], sizes = [2, 32], strides = [1, 1]} : vector<2x128xf32> to vector<2x32xf32>
      %224 = arith.negf %223 : vector<2x32xf32>
      %225 = math.exp %224 : vector<2x32xf32>
      %cst_74 = arith.constant 1.000000e+00 : f32
      %226 = vector.broadcast %cst_74 : f32 to vector<2x32xf32>
      %227 = arith.addf %226, %225 : vector<2x32xf32>
      %228 = arith.divf %226, %227 : vector<2x32xf32>
      %229 = arith.mulf %220, %199 : vector<2x32xf32>
      %230 = arith.mulf %214, %222 : vector<2x32xf32>
      %231 = arith.addf %229, %230 : vector<2x32xf32>
      %232 = math.tanh %231 : vector<2x32xf32>
      %233 = arith.mulf %228, %232 : vector<2x32xf32>
      %c0_75 = arith.constant 0 : index
      %c1_76 = arith.constant 1 : index
      %c0_77 = arith.constant 0 : index
      %c0_78 = arith.constant 0 : index
      %234 = vector.load %arg4[%c0_75, %c1_76, %c0_77, %c0_78] : memref<1x8x2x32xf32, #tpu.memory_space<vmem>>, vector<1x1x2x32xf32>
      %235 = vector.shape_cast %234 : vector<1x1x2x32xf32> to vector<2x32xf32>
      %236 = vector.shape_cast %233 : vector<2x32xf32> to vector<1x1x2x32xf32>
      tpu.vector_store %arg4[%c0_75, %c1_76, %c0_77, %c0_78], %236 {strides = array<i32>} : memref<1x8x2x32xf32, #tpu.memory_space<vmem>>, vector<1x1x2x32xf32>,
      %c0_79 = arith.constant 0 : index
      %c0_80 = arith.constant 0 : index
      %c0_81 = arith.constant 0 : index
      %237 = vector.load %arg2[%c0_79, %c0_80, %c0_81] : memref<8x2x128xf32, #tpu.memory_space<vmem>>, vector<1x2x128xf32>
      %238 = vector.shape_cast %237 : vector<1x2x128xf32> to vector<2x128xf32>
      %cst_82 = arith.constant dense<0.000000e+00> : vector<2x128xf32>
      %239 = tpu.matmul %233, %4, %cst_82 {dimension_numbers = #tpu.dot_dimension_numbers<[1], [0], [0], [1], [0, 0, 1, 1], [], []>} : vector<2x32xf32>, vector<32x128xf32>, vector<2x128xf32> -> vector<2x128xf32>
      %240 = arith.addf %238, %239 : vector<2x128xf32>
      %241 = vector.extract_strided_slice %240 {offsets = [0, 0], sizes = [2, 32], strides = [1, 1]} : vector<2x128xf32> to vector<2x32xf32>
      %242 = arith.negf %241 : vector<2x32xf32>
      %243 = math.exp %242 : vector<2x32xf32>
      %cst_83 = arith.constant 1.000000e+00 : f32
      %244 = vector.broadcast %cst_83 : f32 to vector<2x32xf32>
      %245 = arith.addf %244, %243 : vector<2x32xf32>
      %246 = arith.divf %244, %245 : vector<2x32xf32>
      %247 = vector.extract_strided_slice %240 {offsets = [0, 32], sizes = [2, 32], strides = [1, 1]} : vector<2x128xf32> to vector<2x32xf32>
      %248 = arith.negf %247 : vector<2x32xf32>
      %249 = math.exp %248 : vector<2x32xf32>
      %cst_84 = arith.constant 1.000000e+00 : f32
      %250 = vector.broadcast %cst_84 : f32 to vector<2x32xf32>
      %251 = arith.addf %250, %249 : vector<2x32xf32>
      %252 = arith.divf %250, %251 : vector<2x32xf32>
      %253 = vector.extract_strided_slice %240 {offsets = [0, 64], sizes = [2, 32], strides = [1, 1]} : vector<2x128xf32> to vector<2x32xf32>
      %254 = math.tanh %253 : vector<2x32xf32>
      %255 = vector.extract_strided_slice %240 {offsets = [0, 96], sizes = [2, 32], strides = [1, 1]} : vector<2x128xf32> to vector<2x32xf32>
      %256 = arith.negf %255 : vector<2x32xf32>
      %257 = math.exp %256 : vector<2x32xf32>
      %cst_85 = arith.constant 1.000000e+00 : f32
      %258 = vector.broadcast %cst_85 : f32 to vector<2x32xf32>
      %259 = arith.addf %258, %257 : vector<2x32xf32>
      %260 = arith.divf %258, %259 : vector<2x32xf32>
      %261 = arith.mulf %252, %231 : vector<2x32xf32>
      %262 = arith.mulf %246, %254 : vector<2x32xf32>
      %263 = arith.addf %261, %262 : vector<2x32xf32>
      %264 = math.tanh %263 : vector<2x32xf32>
      %265 = arith.mulf %260, %264 : vector<2x32xf32>
      %c0_86 = arith.constant 0 : index
      %c0_87 = arith.constant 0 : index
      %c0_88 = arith.constant 0 : index
      %c0_89 = arith.constant 0 : index
      %266 = vector.load %arg4[%c0_86, %c0_87, %c0_88, %c0_89] : memref<1x8x2x32xf32, #tpu.memory_space<vmem>>, vector<1x1x2x32xf32>
      %267 = vector.shape_cast %266 : vector<1x1x2x32xf32> to vector<2x32xf32>
      %268 = vector.shape_cast %265 : vector<2x32xf32> to vector<1x1x2x32xf32>
      tpu.vector_store %arg4[%c0_86, %c0_87, %c0_88, %c0_89], %268 {strides = array<i32>} : memref<1x8x2x32xf32, #tpu.memory_space<vmem>>, vector<1x1x2x32xf32>,
      %c0_90 = arith.constant 0 : index
      %c0_91 = arith.constant 0 : index
      %269 = vector.load %arg5[%c0_90, %c0_91] : memref<2x32xf32, #tpu.memory_space<vmem>>, vector<2x32xf32>
      tpu.vector_store %arg5[%c0_90, %c0_91], %265 {strides = array<i32>} : memref<2x32xf32, #tpu.memory_space<vmem>>, vector<2x32xf32>,
      %c0_92 = arith.constant 0 : index
      %c0_93 = arith.constant 0 : index
      %270 = vector.load %arg6[%c0_92, %c0_93] : memref<2x32xf32, #tpu.memory_space<vmem>>, vector<2x32xf32>
      tpu.vector_store %arg6[%c0_92, %c0_93], %263 {strides = array<i32>} : memref<2x32xf32, #tpu.memory_space<vmem>>, vector<2x32xf32>,
    } else {
    }
    return
  }
  func.func @transform_0(%arg0: i32, %arg1: i32) -> (i32, i32, i32) {
    %c2_i32 = arith.constant 2 : i32
    %0 = arith.muli %c2_i32, %arg1 : i32
    %c0_i32 = arith.constant 0 : i32
    %1 = arith.subi %c0_i32, %0 : i32
    %2 = arith.muli %arg0, %1 : i32
    %3 = arith.addi %arg1, %2 : i32
    %c0_i32_0 = arith.constant 0 : i32
    %c0_i32_1 = arith.constant 0 : i32
    return %3, %c0_i32_0, %arg0 : i32, i32, i32
  }
  func.func @transform_1(%arg0: i32, %arg1: i32) -> (i32, i32, i32) {
    %c0_i32 = arith.constant 0 : i32
    %c0_i32_0 = arith.constant 0 : i32
    %c0_i32_1 = arith.constant 0 : i32
    return %arg0, %c0_i32, %c0_i32_0 : i32, i32, i32
  }
  func.func @transform_2(%arg0: i32, %arg1: i32) -> (i32, i32, i32, i32) {
    %c2_i32 = arith.constant 2 : i32
    %0 = arith.muli %c2_i32, %arg1 : i32
    %c0_i32 = arith.constant 0 : i32
    %1 = arith.subi %c0_i32, %0 : i32
    %2 = arith.muli %arg0, %1 : i32
    %3 = arith.addi %arg1, %2 : i32
    %c0_i32_0 = arith.constant 0 : i32
    %c0_i32_1 = arith.constant 0 : i32
    %c0_i32_2 = arith.constant 0 : i32
    return %arg0, %3, %c0_i32_0, %c0_i32_1 : i32, i32, i32, i32
  }
}

module attributes {stable_mosaic.version = 11 : i64} {
  func.func @_heads_kernel(%arg0: i32, %arg1: memref<16x32xf32, #tpu.memory_space<vmem>>, %arg2: memref<16x32xf32, #tpu.memory_space<vmem>>, %arg3: memref<32x320xf32, #tpu.memory_space<vmem>>, %arg4: memref<32x320xf32, #tpu.memory_space<vmem>>, %arg5: memref<1x320xf32, #tpu.memory_space<vmem>>, %arg6: memref<32x128xf32, #tpu.memory_space<vmem>>, %arg7: memref<32x128xf32, #tpu.memory_space<vmem>>, %arg8: memref<1x128xf32, #tpu.memory_space<vmem>>, %arg9: memref<320x16xf32, #tpu.memory_space<vmem>>, %arg10: memref<16x320xf32, #tpu.memory_space<vmem>>, %arg11: memref<16x320xf32, #tpu.memory_space<vmem>>, %arg12: memref<16x128xf32, #tpu.memory_space<vmem>>) attributes {dimension_semantics = [#tpu.dimension_semantics<parallel>], iteration_bounds = array<i64: 1>, scalar_prefetch = 0 : i64, scratch_operands = 0 : i64, tpu.core_type = #tpu.core_type<tc>, window_params = [{transform_indices = @transform_0, window_bounds = array<i64: 16, 32>}, {transform_indices = @transform_1, window_bounds = array<i64: 16, 32>}, {pipeline_mode = #tpu.pipeline_mode<synchronous>, transform_indices = @transform_2, window_bounds = array<i64: 32, 320>}, {pipeline_mode = #tpu.pipeline_mode<synchronous>, transform_indices = @transform_3, window_bounds = array<i64: 32, 320>}, {pipeline_mode = #tpu.pipeline_mode<synchronous>, transform_indices = @transform_4, window_bounds = array<i64: 1, 320>}, {pipeline_mode = #tpu.pipeline_mode<synchronous>, transform_indices = @transform_5, window_bounds = array<i64: 32, 128>}, {pipeline_mode = #tpu.pipeline_mode<synchronous>, transform_indices = @transform_6, window_bounds = array<i64: 32, 128>}, {pipeline_mode = #tpu.pipeline_mode<synchronous>, transform_indices = @transform_7, window_bounds = array<i64: 1, 128>}, {pipeline_mode = #tpu.pipeline_mode<synchronous>, transform_indices = @transform_8, window_bounds = array<i64: 320, 16>}, {pipeline_mode = #tpu.pipeline_mode<synchronous>, transform_indices = @transform_9, window_bounds = array<i64: 16, 320>}, {transform_indices = @transform_10, window_bounds = array<i64: 16, 320>}, {transform_indices = @transform_11, window_bounds = array<i64: 16, 128>}]} {
    %c0 = arith.constant 0 : index
    %c0_0 = arith.constant 0 : index
    %0 = vector.load %arg1[%c0, %c0_0] : memref<16x32xf32, #tpu.memory_space<vmem>>, vector<16x32xf32>
    %c0_1 = arith.constant 0 : index
    %c0_2 = arith.constant 0 : index
    %1 = vector.load %arg2[%c0_1, %c0_2] : memref<16x32xf32, #tpu.memory_space<vmem>>, vector<16x32xf32>
    %c0_3 = arith.constant 0 : index
    %c0_4 = arith.constant 0 : index
    %2 = vector.load %arg3[%c0_3, %c0_4] : memref<32x320xf32, #tpu.memory_space<vmem>>, vector<32x320xf32>
    %cst = arith.constant dense<0.000000e+00> : vector<16x320xf32>
    %3 = tpu.matmul %0, %2, %cst {dimension_numbers = #tpu.dot_dimension_numbers<[1], [0], [0], [1], [0, 0, 1, 1], [], []>} : vector<16x32xf32>, vector<32x320xf32>, vector<16x320xf32> -> vector<16x320xf32>
    %c0_5 = arith.constant 0 : index
    %c0_6 = arith.constant 0 : index
    %4 = vector.load %arg4[%c0_5, %c0_6] : memref<32x320xf32, #tpu.memory_space<vmem>>, vector<32x320xf32>
    %cst_7 = arith.constant dense<0.000000e+00> : vector<16x320xf32>
    %5 = tpu.matmul %1, %4, %cst_7 {dimension_numbers = #tpu.dot_dimension_numbers<[1], [0], [0], [1], [0, 0, 1, 1], [], []>} : vector<16x32xf32>, vector<32x320xf32>, vector<16x320xf32> -> vector<16x320xf32>
    %6 = arith.addf %3, %5 : vector<16x320xf32>
    %c0_8 = arith.constant 0 : index
    %c0_9 = arith.constant 0 : index
    %7 = vector.load %arg5[%c0_8, %c0_9] : memref<1x320xf32, #tpu.memory_space<vmem>>, vector<1x320xf32>
    %8 = vector.broadcast %7 : vector<1x320xf32> to vector<16x320xf32>
    %9 = arith.addf %6, %8 : vector<16x320xf32>
    %10 = arith.mulf %9, %9 : vector<16x320xf32>
    %c0_10 = arith.constant 0 : index
    %c0_11 = arith.constant 0 : index
    %11 = vector.load %arg9[%c0_10, %c0_11] : memref<320x16xf32, #tpu.memory_space<vmem>>, vector<320x16xf32>
    %cst_12 = arith.constant dense<0.000000e+00> : vector<16x16xf32>
    %12 = tpu.matmul %10, %11, %cst_12 {dimension_numbers = #tpu.dot_dimension_numbers<[1], [0], [0], [1], [0, 0, 1, 1], [], []>} : vector<16x320xf32>, vector<320x16xf32>, vector<16x16xf32> -> vector<16x16xf32>
    %c0_13 = arith.constant 0 : index
    %c0_14 = arith.constant 0 : index
    %13 = vector.load %arg10[%c0_13, %c0_14] : memref<16x320xf32, #tpu.memory_space<vmem>>, vector<16x320xf32>
    %cst_15 = arith.constant dense<0.000000e+00> : vector<16x320xf32>
    %14 = tpu.matmul %12, %13, %cst_15 {dimension_numbers = #tpu.dot_dimension_numbers<[1], [0], [0], [1], [0, 0, 1, 1], [], []>} : vector<16x16xf32>, vector<16x320xf32>, vector<16x320xf32> -> vector<16x320xf32>
    %cst_16 = arith.constant 1.000000e-24 : f32
    %15 = vector.broadcast %cst_16 : f32 to vector<16x320xf32>
    %16 = arith.maximumf %14, %15 : vector<16x320xf32>
    %17 = math.rsqrt %16 : vector<16x320xf32>
    %18 = arith.mulf %9, %17 : vector<16x320xf32>
    %c0_17 = arith.constant 0 : index
    %c0_18 = arith.constant 0 : index
    %19 = vector.load %arg11[%c0_17, %c0_18] : memref<16x320xf32, #tpu.memory_space<vmem>>, vector<16x320xf32>
    tpu.vector_store %arg11[%c0_17, %c0_18], %18 {strides = array<i32>} : memref<16x320xf32, #tpu.memory_space<vmem>>, vector<16x320xf32>,
    %c0_19 = arith.constant 0 : index
    %c0_20 = arith.constant 0 : index
    %20 = vector.load %arg6[%c0_19, %c0_20] : memref<32x128xf32, #tpu.memory_space<vmem>>, vector<32x128xf32>
    %cst_21 = arith.constant dense<0.000000e+00> : vector<16x128xf32>
    %21 = tpu.matmul %0, %20, %cst_21 {dimension_numbers = #tpu.dot_dimension_numbers<[1], [0], [0], [1], [0, 0, 1, 1], [], []>} : vector<16x32xf32>, vector<32x128xf32>, vector<16x128xf32> -> vector<16x128xf32>
    %c0_22 = arith.constant 0 : index
    %c0_23 = arith.constant 0 : index
    %22 = vector.load %arg7[%c0_22, %c0_23] : memref<32x128xf32, #tpu.memory_space<vmem>>, vector<32x128xf32>
    %cst_24 = arith.constant dense<0.000000e+00> : vector<16x128xf32>
    %23 = tpu.matmul %1, %22, %cst_24 {dimension_numbers = #tpu.dot_dimension_numbers<[1], [0], [0], [1], [0, 0, 1, 1], [], []>} : vector<16x32xf32>, vector<32x128xf32>, vector<16x128xf32> -> vector<16x128xf32>
    %24 = arith.addf %21, %23 : vector<16x128xf32>
    %c0_25 = arith.constant 0 : index
    %c0_26 = arith.constant 0 : index
    %25 = vector.load %arg8[%c0_25, %c0_26] : memref<1x128xf32, #tpu.memory_space<vmem>>, vector<1x128xf32>
    %26 = vector.broadcast %25 : vector<1x128xf32> to vector<16x128xf32>
    %27 = arith.addf %24, %26 : vector<16x128xf32>
    %28 = arith.negf %27 : vector<16x128xf32>
    %29 = math.exp %28 : vector<16x128xf32>
    %cst_27 = arith.constant 1.000000e+00 : f32
    %30 = vector.broadcast %cst_27 : f32 to vector<16x128xf32>
    %31 = arith.addf %30, %29 : vector<16x128xf32>
    %32 = arith.divf %30, %31 : vector<16x128xf32>
    %c0_28 = arith.constant 0 : index
    %c0_29 = arith.constant 0 : index
    %33 = vector.load %arg12[%c0_28, %c0_29] : memref<16x128xf32, #tpu.memory_space<vmem>>, vector<16x128xf32>
    tpu.vector_store %arg12[%c0_28, %c0_29], %32 {strides = array<i32>} : memref<16x128xf32, #tpu.memory_space<vmem>>, vector<16x128xf32>,
    return
  }
  func.func @transform_0(%arg0: i32) -> (i32, i32) {
    %c0_i32 = arith.constant 0 : i32
    %c0_i32_0 = arith.constant 0 : i32
    return %arg0, %c0_i32 : i32, i32
  }
  func.func @transform_1(%arg0: i32) -> (i32, i32) {
    %c0_i32 = arith.constant 0 : i32
    %c0_i32_0 = arith.constant 0 : i32
    return %arg0, %c0_i32 : i32, i32
  }
  func.func @transform_2(%arg0: i32) -> (i32, i32) {
    %c0_i32 = arith.constant 0 : i32
    %c0_i32_0 = arith.constant 0 : i32
    %c0_i32_1 = arith.constant 0 : i32
    return %c0_i32, %c0_i32_0 : i32, i32
  }
  func.func @transform_3(%arg0: i32) -> (i32, i32) {
    %c0_i32 = arith.constant 0 : i32
    %c0_i32_0 = arith.constant 0 : i32
    %c0_i32_1 = arith.constant 0 : i32
    return %c0_i32, %c0_i32_0 : i32, i32
  }
  func.func @transform_4(%arg0: i32) -> (i32, i32) {
    %c0_i32 = arith.constant 0 : i32
    %c0_i32_0 = arith.constant 0 : i32
    %c0_i32_1 = arith.constant 0 : i32
    return %c0_i32, %c0_i32_0 : i32, i32
  }
  func.func @transform_5(%arg0: i32) -> (i32, i32) {
    %c0_i32 = arith.constant 0 : i32
    %c0_i32_0 = arith.constant 0 : i32
    %c0_i32_1 = arith.constant 0 : i32
    return %c0_i32, %c0_i32_0 : i32, i32
  }
  func.func @transform_6(%arg0: i32) -> (i32, i32) {
    %c0_i32 = arith.constant 0 : i32
    %c0_i32_0 = arith.constant 0 : i32
    %c0_i32_1 = arith.constant 0 : i32
    return %c0_i32, %c0_i32_0 : i32, i32
  }
  func.func @transform_7(%arg0: i32) -> (i32, i32) {
    %c0_i32 = arith.constant 0 : i32
    %c0_i32_0 = arith.constant 0 : i32
    %c0_i32_1 = arith.constant 0 : i32
    return %c0_i32, %c0_i32_0 : i32, i32
  }
  func.func @transform_8(%arg0: i32) -> (i32, i32) {
    %c0_i32 = arith.constant 0 : i32
    %c0_i32_0 = arith.constant 0 : i32
    %c0_i32_1 = arith.constant 0 : i32
    return %c0_i32, %c0_i32_0 : i32, i32
  }
  func.func @transform_9(%arg0: i32) -> (i32, i32) {
    %c0_i32 = arith.constant 0 : i32
    %c0_i32_0 = arith.constant 0 : i32
    %c0_i32_1 = arith.constant 0 : i32
    return %c0_i32, %c0_i32_0 : i32, i32
  }
  func.func @transform_10(%arg0: i32) -> (i32, i32) {
    %c0_i32 = arith.constant 0 : i32
    %c0_i32_0 = arith.constant 0 : i32
    return %arg0, %c0_i32 : i32, i32
  }
  func.func @transform_11(%arg0: i32) -> (i32, i32) {
    %c0_i32 = arith.constant 0 : i32
    %c0_i32_0 = arith.constant 0 : i32
    return %arg0, %c0_i32 : i32, i32
  }
}

</mosaic_0001>

<bundles_post_ra>
// kernel: chimera_forward.9
= control target key start
LH: loop header
LB: loop body
LE: loop exit
PB: predicated region body
PF: predicated region fallthrough
CT: control target
= control target key end

     0   :  { %v256_v3 = vmov 0.0   ;;  %vm40_vm0 = vcmask 261120   ;;  %v209_v29 = vlaneseq  ;;  %s362_s3 = inlined_call_operand.vmem [shape: f32[32,256], index: 3, kind: input, shape index: {}]   ;;  %s363_s2 = inlined_call_operand.vmem [shape: f32[32,256], index: 2, kind: input, shape index: {}]   ;;  %s364_s1 = inlined_call_operand.vmem [shape: f32[16,32], index: 1, kind: input, shape index: {}]   ;;  %s365_s0 = inlined_call_operand.vmem [shape: f32[16,32], index: 0, kind: input, shape index: {}]   ;;  %s366_s4 = inlined_call_operand.vmem [shape: f32[1,256], index: 4, kind: input, shape index: {}]   ;;  %s367_s5 = inlined_call_operand.vmem [shape: f32[16,256], index: 5, kind: output, shape index: {}]  }
   0x1   :  { %v33_v0 = vld [vmem:[%s362_s3 + $0x8] sm:$0xff]  ;;  %v35_v1 = vld [vmem:[%s362_s3 + $0x18] sm:$0xff]  ;;  %111 = vmatprep.mubr.f32.mxu1 %v256_v3  ;;  %194 = vmatprep.mubr.f32.mxu0 %v256_v3  ;;  %v32_v6 = vld [vmem:[%s362_s3] sm:$0xff] }
   0x2   :  { %v23_v2 = vld [vmem:[%s363_s2 + $0x8] sm:$0xff]  ;;  %v235_v4 = vpack.c.bf16 %v35_v1, %v33_v0  ;;  %v25_v5 = vld [vmem:[%s363_s2 + $0x18] sm:$0xff]  ;;  %v34_v7 = vld [vmem:[%s362_s3 + $0x10] sm:$0xff]  ;;  %v210_v30 = vshrl.u32 %v209_v29, 7 }
   0x3   :  { %v243_v8 = vpack.c.bf16 %v25_v5, %v23_v2  ;;  %v237_v9 = vpack.c.bf16 %v34_v7, %v32_v6  ;;  %v22_v10 = vld [vmem:[%s363_s2] sm:$0xff]  ;;  %v24_v11 = vld [vmem:[%s363_s2 + $0x10] sm:$0xff]  ;;  %v37_v12 = vld [vmem:[%s362_s3 + $0x28] sm:$0xff] }
   0x4   :  { %236 = vmatprep.subr.bf16.mxu1 %v235_v4  ;;  %v245_v13 = vpack.c.bf16 %v24_v11, %v22_v10  ;;  %v39_v14 = vld [vmem:[%s362_s3 + $0x38] sm:$0xff]  ;;  %v27_v15 = vld [vmem:[%s363_s2 + $0x28] sm:$0xff]  ;;  %v36_v19 = vld [vmem:[%s362_s3 + $0x20] sm:$0xff]  ;;  %v211_v31 = vsub.s32 0, %v210_v30  ;;  %v215_v33 = vsub.s32 1, %v210_v30 }
   0x5   :  { %v29_v16 = vld [vmem:[%s363_s2 + $0x38] sm:$0xff]  ;;  %244 = vmatprep.subr.bf16.mxu0 %v243_v8  ;;  %238 = vmatpush1.bf16.msra.mxu1 %v237_v9  ;;  %v239_v17 = vpack.c.bf16 %v39_v14, %v37_v12  ;;  %v38_v20 = vld [vmem:[%s362_s3 + $0x30] sm:$0xff]  ;;  %v26_v21 = vld [vmem:[%s363_s2 + $0x20] sm:$0xff] }
   0x6   :  { %v247_v18 = vpack.c.bf16 %v29_v16, %v27_v15  ;;  %246 = vmatpush1.bf16.msra.mxu0 %v245_v13  ;;  %v241_v22 = vpack.c.bf16 %v38_v20, %v36_v19  ;;  %v28_v23 = vld [vmem:[%s363_s2 + $0x30] sm:$0xff]  ;;  %v30_v25 = vld [vmem:[%s364_s1] sm:$0xff]  ;;  %v31_v27 = vld [vmem:[%s364_s1 + $0x8] sm:$0xff] }
   0x7   :  { %240 = vmatprep.subr.bf16.mxu1 %v239_v17  ;;  %v249_v24 = vpack.c.bf16 %v28_v23, %v26_v21  ;;  %v20_v26 = vld [vmem:[%s365_s0] sm:$0xff]  ;;  %v21_v28 = vld [vmem:[%s365_s0 + $0x8] sm:$0xff] }
   0x8   :  { %248 = vmatprep.subr.bf16.mxu0 %v247_v18  ;;  %v207_v32 = vld [vmem:[%s366_s4] sm:$0x3] }
   0x9   :  { %242 = vmatpush1.bf16.msra.mxu1 %v241_v22  ;;  %v212_v35 = vrot.slane %v207_v32, %v211_v31  ;;  %v216_v38 = vrot.slane %v207_v32, %v215_v33 }
   0xa   :  { %250 = vmatpush1.bf16.msra.mxu0 %v249_v24 }
   0xc   :  { %231 = vmatmul.mubr.msk.f32.vlgmr.msra.gmra.mrb[0].mxu1 %vm40_vm0, %v30_v25 }
   0xd   :  { %233 = vmatmul.mubr.msk.f32.vlgmr.msra.gmra.mrb[0].mxu0 %vm40_vm0, %v20_v26  ;;  %117 = vmatprep.mubr.f32.mxu1 %v256_v3 }
   0xe   :  { %200 = vmatprep.mubr.f32.mxu0 %v256_v3 }
  0x10   :  { %232 = vmatmul.mubr.msk.f32.gmra.mrb[2].mxu1 %vm40_vm0, %v31_v27 }
  0x11   :  { %234 = vmatmul.mubr.msk.f32.gmra.mrb[2].mxu0 %vm40_vm0, %v21_v28 }
  0xdf   :  { %v113_v34 = vpop.f32.mrb[0].mxu1 }
  0xe0   :  { %v196_v36 = vpop.f32.mrb[0].mxu0  ;;  %v115_v37 = vpop.f32.mrb[1].mxu1 }
  0xe1   :  { %v197_v39 = vadd.f32 %v196_v36, %v113_v34  ;;  %v198_v40 = vpop.f32.mrb[1].mxu0 }
  0xe2   :  { %v199_v41 = vadd.f32 %v198_v40, %v115_v37 }
  0xe3   :  { %v219_v42 = vadd.f32 %v212_v35, %v197_v39  ;;  %v119_v43 = vpop.f32.mrb[2].mxu1 }
  0xe4   :  { %v220_v44 = vadd.f32 %v216_v38, %v199_v41  ;;  %v202_v45 = vpop.f32.mrb[2].mxu0  ;;  %v121_v46 = vpop.f32.mrb[3].mxu1 }
  0xe5   :  { %223 = vst [vmem:[%s367_s5] sm:$0xff] %v219_v42  ;;  %v203_v47 = vadd.f32 %v202_v45, %v119_v43  ;;  %v204_v48 = vpop.f32.mrb[3].mxu0 }
  0xe6   :  { %224 = vst [vmem:[%s367_s5 + $0x8] sm:$0xff] %v220_v44  ;;  %v205_v49 = vadd.f32 %v204_v48, %v121_v46 }
  0xe7   :  { %v221_v50 = vadd.f32 %v212_v35, %v203_v47 }
  0xe8   :  { %v222_v51 = vadd.f32 %v216_v38, %v205_v49 }
  0xe9   :  { %225 = vst [vmem:[%s367_s5 + $0x10] sm:$0xff] %v221_v50 }
  0xea   :  { %226 = vst [vmem:[%s367_s5 + $0x18] sm:$0xff] %v222_v51 }

// kernel: chimera_forward.7
= control target key start
LH: loop header
LB: loop body
LE: loop exit
PB: predicated region body
PF: predicated region fallthrough
CT: control target
= control target key end

     0   :  { %v133_v3 = vmov 0.0   ;;  %vm32_vm0 = vcmask 130048   ;;  %v22_v9 = vlaneseq  ;;  %s187_s1 = inlined_call_operand.vmem [shape: f32[16,256], index: 1, kind: input, shape index: {}]   ;;  %s188_s0 = inlined_call_operand.vmem [shape: f32[16,16], index: 0, kind: input, shape index: {}]   ;;  %s189_s2 = inlined_call_operand.vmem [shape: f32[1,256], index: 2, kind: input, shape index: {}]   ;;  %s190_s3 = inlined_call_operand.vmem [shape: f32[16,256], index: 3, kind: output, shape index: {}]  }
   0x1   :  { %v17_v0 = vld [vmem:[%s187_s1 + $0x8] sm:$0xff]  ;;  %v19_v1 = vld [vmem:[%s187_s1 + $0x18] sm:$0xff]  ;;  %v16_v2 = vld [vmem:[%s187_s1] sm:$0xff]  ;;  %103 = vmatprep.mubr.f32.mxu0 %v133_v3  ;;  %109 = vmatprep.mubr.f32.mxu1 %v133_v3 }
   0x2   :  { %v126_v4 = vpack.c.bf16 %v19_v1, %v17_v0  ;;  %v18_v5 = vld [vmem:[%s187_s1 + $0x10] sm:$0xff]  ;;  %v14_v7 = vld [vmem:[%s188_s0] sm:$0xff]  ;;  %v15_v8 = vld [vmem:[%s188_s0 + $0x8] sm:$0xff]  ;;  %v23_v10 = vshrl.u32 %v22_v9, 7 }
   0x3   :  { %v128_v6 = vpack.c.bf16 %v18_v5, %v16_v2  ;;  %v20_v12 = vld [vmem:[%s189_s2] sm:$0x3] }
   0x4   :  { %127 = vmatprep.subr.bf16.mxu0 %v126_v4  ;;  %130 = vmatprep.subr.bf16.mxu1 %v126_v4  ;;  %v24_v11 = vsub.s32 0, %v23_v10  ;;  %v28_v13 = vsub.s32 1, %v23_v10 }
   0x5   :  { %129 = vmatpush1.bf16.msra.mxu0 %v128_v6  ;;  %131 = vmatpush1.bf16.msra.mxu1 %v128_v6 }
   0x6   :  { %v25_v14 = vrot.slane %v20_v12, %v24_v11  ;;  %v29_v15 = vrot.slane %v20_v12, %v28_v13 }
   0x8   :  { %124 = vmatmul.mubr.msk.f32.vlgmr.msra.gmra.mrb[0].mxu0 %vm32_vm0, %v14_v7  ;;  %125 = vmatmul.mubr.msk.f32.vlgmr.msra.gmra.mrb[0].mxu1 %vm32_vm0, %v15_v8 }
  0xdb   :  { %v105_v16 = vpop.f32.mrb[0].mxu0  ;;  %v111_v17 = vpop.f32.mrb[0].mxu1 }
  0xdc   :  { %v106_v18 = vadd.f32 %v105_v16, %v25_v14  ;;  %v112_v19 = vadd.f32 %v111_v17, %v25_v14  ;;  %v107_v20 = vpop.f32.mrb[1].mxu0  ;;  %v113_v21 = vpop.f32.mrb[1].mxu1 }
  0xdd   :  { %v108_v22 = vadd.f32 %v107_v20, %v29_v15  ;;  %v114_v23 = vadd.f32 %v113_v21, %v29_v15 }
  0xde   :  { %116 = vst [vmem:[%s190_s3] sm:$0xff] %v106_v18  ;;  %118 = vst [vmem:[%s190_s3 + $0x10] sm:$0xff] %v112_v19 }
  0xdf   :  { %117 = vst [vmem:[%s190_s3 + $0x8] sm:$0xff] %v108_v22  ;;  %119 = vst [vmem:[%s190_s3 + $0x18] sm:$0xff] %v114_v23 }

// kernel: chimera_forward.8
= control target key start
LH: loop header
LB: loop body
LE: loop exit
PB: predicated region body
PF: predicated region fallthrough
CT: control target
= control target key end

     0   :  { %s2816_s9 = smov 0   ;;  %s2818_s10 = smov 0   ;;  %s3147_s0 = inlined_call_operand.vmem [shape: f32[8,2,256], index: 0, kind: input, shape index: {}]   ;;  %s3148_s1 = inlined_call_operand.vmem [shape: f32[2,32,128], index: 1, kind: input, shape index: {}]   ;;  %s3149_s2 = inlined_call_operand.vmem [shape: f32[2,8,2,32], index: 2, kind: output, shape index: {}]  }
   0x1   :  { %s2820_s11 = smov 0   ;;  %s2822_s12 = smov 0  }
   0x2   :  { %s2824_s13 = smov 0  }
   0x3 LB: > { %s24_s14 = sadd.s32 1, %s2782_s12  ;;  %p48_p1 = scmp.ne.s32.totalorder %s2774_s10, %s2770_s9  ;;  %s2786_s13 = sphi %s2824_s13, %s12_s13   ;;  %s2782_s12 = sphi %s2822_s12, %s3153_s12   ;;  %s2778_s11 = sphi %s2820_s11, %s3152_s11   ;;  %s2774_s10 = sphi %s2818_s10, %s3151_s10   ;;  %s2770_s9 = sphi %s2816_s9, %s3150_s9  }
   0x4   : > { %p26_p0 = scmp.ge.s32.totalorder %s24_s14, 2  ;;  %p49_p2 = scmp.eq.s32.totalorder %s2786_s13, 0 }
   0x5   : > { %s41_s16 = sadd.s32 1, %s2774_s10  ;;  %p2140_p5 = scmp.ge.s32.totalorder %s2786_s13, 2 }
   0x6   : > { %s3155_s14 = smov (%p26_p0, %s24_s14), 0  ;;  %p50_p3 = por %p49_p2, %p48_p1 }
   0x7   : > { %s37_s15 = ssub.s32 %s2782_s12, %s3155_s14  ;;  %136 = sbr.rel (%p2140_p5) target bundleno = 23 (0x17), region = 16 }
   0x8   : > { %p39_p4 = scmp.eq.s32.totalorder %s37_s15, 0 }
   0xa   : > { %s2851_s17 = scalar_select %p39_p4, %s2774_s10, %s41_s16  }
   0xe   : > { %139 = sbr.rel (!%p50_p3) target bundleno = 23 (0x17), region = 20  ;;  %s141_s18 = sand.u32 (%p50_p3), 1, %s2774_s10  }
   0xf   : > { %s2142_s19 = sshll.u32 (%p50_p3), %s2782_s12, 1  ;;  %s2141_s20 = sshll.u32 (%p50_p3), %s141_s18, 4 }
  0x10   : > { %s152_s23 = scalar_lea.vmem (%p50_p3), %s3147_s0, %s2142_s19  ;;  %s143_s24 = scalar_lea.vmem (%p50_p3), [#allocation4], %s2141_s20 }
  0x11   : > { %v168_v0 = vld [vmem:[%s152_s23] sm:$0x3] (%p50_p3)  ;;  %v170_v1 = vld [vmem:[%s152_s23 + $0x4] sm:$0x3] (%p50_p3)  ;;  %v172_v2 = vld [vmem:[%s152_s23 + $0x8] sm:$0x3] (%p50_p3) }
  0x12   : > { %169 = vst [vmem:[%s143_s24] sm:$0x3] (%p50_p3), %v168_v0  ;;  %171 = vst [vmem:[%s143_s24 + $0x2] sm:$0x3] (%p50_p3), %v170_v1  ;;  %v174_v3 = vld [vmem:[%s152_s23 + $0xc] sm:$0x3] (%p50_p3) }
  0x13   : > { %v176_v4 = vld [vmem:[%s152_s23 + $0x10] sm:$0x3] (%p50_p3)  ;;  %173 = vst [vmem:[%s143_s24 + $0x4] sm:$0x3] (%p50_p3), %v172_v2  ;;  %175 = vst [vmem:[%s143_s24 + $0x6] sm:$0x3] (%p50_p3), %v174_v3 }
  0x14   : > { %177 = vst [vmem:[%s143_s24 + $0x8] sm:$0x3] (%p50_p3), %v176_v4  ;;  %v178_v5 = vld [vmem:[%s152_s23 + $0x14] sm:$0x3] (%p50_p3)  ;;  %v180_v6 = vld [vmem:[%s152_s23 + $0x18] sm:$0x3] (%p50_p3) }
  0x15   : > { %v182_v7 = vld [vmem:[%s152_s23 + $0x1c] sm:$0x3]  ;;  %179 = vst [vmem:[%s143_s24 + $0xa] sm:$0x3] %v178_v5  ;;  %181 = vst [vmem:[%s143_s24 + $0xc] sm:$0x3] %v180_v6 }
  0x16   : > { %183 = vst [vmem:[%s143_s24 + $0xe] sm:$0x3] %v182_v7 }
  0x17 PF: > { %p2143_p6 = scmp.ge.s32.totalorder %s2786_s13, 1  ;;  %p229_p7 = scmp.lt.s32.totalorder %s2786_s13, 3 }
  0x19   : > { %p230_p8 = pnand %p2143_p6, %p229_p7 }
  0x1a   : > { %s236_s25 = sand.u32 (!%p230_p8), 1, %s2770_s9   ;;  %p275_p9 = scmp.lt.s32.totalorder (!%p230_p8), %s2778_s11, 1  ;;  %vm302_vm0 = vcmask (!%p230_p8), 254976   ;;  %v2788_v8 = vmov (!%p230_p8), 0.0  }
  0x1b   : > { %233 = sbr.rel (%p230_p8) target bundleno = 11292 (0x2c1c), region = 65  ;;  %s2144_s26 = sshll.u32 (!%p230_p8), %s236_s25, 4  ;;  %303 = vst.msk [vmem:[#allocation2] sm:$0x3] (!%p230_p8), %vm302_vm0, %v2788_v8  ;;  %304 = vst.msk [vmem:[#allocation3] sm:$0x3] (!%p230_p8), %vm302_vm0, %v2788_v8 }
  0x1c   : > { %s2882_s8 = scalar_lea.vmem (!%p230_p8), [#allocation4], %s2144_s26  ;;  %p2149_p10 = scmp.ne.s32.totalorder (!%p230_p8), %s2778_s11, 0 }
  0x22   : > { %s276_s27 = scalar_select %p275_p9, %s2778_s11, 1 }
  0x23   : > { %312 = sbr.rel (%p2149_p10) target bundleno = 5665 (0x1621), region = 77  ;;  %v2789_v14 = vmov (!%p2149_p10), 0.0|0.0   ;;  %vm2790_vm1 = vmmov (!%p2149_p10), 0   ;;  %v2791_v16 = vmov (!%p2149_p10), 0.0   ;;  %v313_v17 = vld [vmem:[#allocation2] sm:$0x3] (!%p2149_p10) }
  0x24   : > { %s2213_s28 = sshll.u32 %s276_s27, 5  ;;  %s2214_s29 = sshll.u32 %s276_s27, 4  ;;  %2471 = vmatprep.subr.bf16.mxu0 (!%p2149_p10), %v2789_v14  ;;  %2477 = vmatprep.subr.bf16.mxu1 (!%p2149_p10), %v2789_v14  ;;  %vm316_vm2 = vcmask (!%p2149_p10), 261120   ;;  %v315_v18 = vld [vmem:[%s2882_s8] sm:$0x3] (!%p2149_p10) }
  0x25   : > { %s279_s4 = scalar_lea.vmem %s3148_s1, %s2213_s28  ;;  %s2872_s7 = scalar_lea.vmem %s3149_s2, %s2214_s29  ;;  %2303 = vmatprep.mubr.msk.f32.mxu0 (!%p2149_p10), %vm2790_vm1, %v2791_v16  ;;  %2314 = vmatprep.mubr.msk.f32.mxu1 (!%p2149_p10), %vm2790_vm1, %v2791_v16  ;;  %v314_v23 = vld [vmem:[#allocation3] sm:$0x3] (!%p2149_p10)  ;;  %v2152_v38 = vld [vmem:[%s2882_s8 + $0x2] sm:$0x3] (!%p2149_p10)  ;;  %v2156_v56 = vld [vmem:[%s2882_s8 + $0x4] sm:$0x3] (!%p2149_p10) }
  0x26   : > { %v2874_v9 = vld [vmem:[%s279_s4] sm:$0xff]  ;;  %v2876_v10 = vld [vmem:[%s279_s4 + $0x8] sm:$0xff]  ;;  %v2878_v11 = vld [vmem:[%s279_s4 + $0x10] sm:$0xff]  ;;  %s2792_s9 = smov (!%p2149_p10), 64   ;;  %s2793_s15 = smov (!%p2149_p10), 32  }
  0x27   : > { %v2880_v12 = vld [vmem:[%s279_s4 + $0x18] sm:$0xff]  ;;  %v2887_v13 = vpack.c.bf16 (!%p2149_p10), %v2876_v10, %v2874_v9  ;;  %s2794_s16 = smov (!%p2149_p10), 96  }
  0x28   : > { %v2894_v15 = vpack.c.bf16 (!%p2149_p10), %v2880_v12, %v2878_v11 }
  0x29   : > { %2473 = vmatpush3.bf16.msra.mxu0 (!%p2149_p10), %v2887_v13  ;;  %2479 = vmatpush3.bf16.msra.mxu1 (!%p2149_p10), %v2887_v13 }
  0x2a   : > { %2474 = vmatprep.subr.bf16.mxu0 %v2789_v14  ;;  %2480 = vmatprep.subr.bf16.mxu1 %v2789_v14 }
  0x2d   : > { %2476 = vmatpush3.bf16.msra.mxu0 %v2894_v15  ;;  %2482 = vmatpush3.bf16.msra.mxu1 %v2894_v15 }
  0x2e   : > { %2483 = vmatprep.subr.bf16.mxu0 %v2789_v14  ;;  %2489 = vmatprep.subr.bf16.mxu1 %v2789_v14 }
  0x30   : > { %2304 = vmatmul.mubr.msk.f32.vlgmr.msra.gmra.mrb[0].mxu0 %vm316_vm2, %v313_v17 }
  0x31   : > { %2485 = vmatpush3.bf16.msra.mxu0 %v2887_v13  ;;  %2325 = vmatprep.mubr.msk.f32.mxu0 %vm2790_vm1, %v2791_v16 }
  0x32   : > { %2486 = vmatprep.subr.bf16.mxu0 %v2789_v14 }
  0x35   : > { %2488 = vmatpush3.bf16.msra.mxu0 %v2894_v15 }
  0x36   : > { %2495 = vmatprep.subr.bf16.mxu0 %v2789_v14 }
 0x103   : > { %v386_v19 = vpop.f32.mrb[0].mxu0 }
 0x104   : > { %v390_v20 = vadd.f32 %v386_v19, %v315_v18  ;;  %v2305_v21 = vpop.f32.mrb[1].mxu0  ;;  %v2160_v18 = vld [vmem:[%s2882_s8 + $0x6] sm:$0x3] }
 0x106   : > { %2620 = vtanh.f32 %v390_v20  ;;  %v2151_v24 = vmul.f32 -1.442695, %v390_v20 }
 0x108   : > { %2622 = vpow2.f32 %v2151_v24 }
 0x110   : > { %v2621_v22 = vpop.eup %2620 }
 0x111   : > { %404 = vrot.lane.b32.xlu0 %v2621_v22, %s2792_s9 }
 0x112   : > { %v2623_v25 = vpop.eup %2622 }
 0x113   : > { %v394_v26 = vadd.f32 1.0, %v2623_v25 }
 0x115   : > { %399 = vrot.lane.b32.xlu0 %v314_v23, %s2793_s15  ;;  %2624 = vrcp.f32 %v394_v26 }
 0x11f   : > { %v2625_v27 = vpop.eup %2624 }
 0x183   : > { %v405_v28 = vpop.permute.xlu0 %404 }
 0x184   : > { %v407_v29 = vmul.f32 %v2625_v27, %v405_v28 }
 0x186   : > { %409 = vrot.lane.b32.xlu1 %v407_v29, %s2793_s15 }
 0x187   : > { %v400_v30 = vpop.permute.xlu0 %399 }
 0x188   : > { %v402_v31 = vmul.f32 %v2625_v27, %v400_v30 }
 0x1f8   : > { %v410_v32 = vpop.permute.xlu1 %409 }
 0x1f9   : > { %v412_v33 = vadd.f32 %v410_v32, %v402_v31 }
 0x1fb   : > { %2626 = vtanh.f32 %v412_v33 }
 0x205   : > { %v2627_v34 = vpop.eup %2626 }
 0x206   : > { %415 = vrot.lane.b32.xlu1 %v2627_v34, %s2792_s9 }
 0x278   : > { %v416_v35 = vpop.permute.xlu1 %415 }
 0x279   : > { %v418_v36 = vmul.f32 %v2625_v27, %v416_v35 }
 0x27b   : > { %420 = vrot.lane.b32.xlu0 %v418_v36, %s2793_s15  ;;  %v2164_v36 = vld [vmem:[%s2882_s8 + $0x8] sm:$0x3] }
 0x2ed   : > { %v421_v37 = vpop.permute.xlu0 %420 }
 0x2ee   : > { %424 = vst.msk [vmem:[%s2872_s7] sm:$0x3] %vm302_vm0, %v421_v37  ;;  %2315 = vmatmul.mubr.msk.f32.vlgmr.msra.gmra.mrb[0].mxu1 %vm316_vm2, %v421_v37 }
 0x2ef   : > { %2491 = vmatpush3.bf16.msra.mxu1 %v2887_v13  ;;  %2336 = vmatprep.mubr.msk.f32.mxu1 %vm2790_vm1, %v2791_v16 }
 0x2f0   : > { %2492 = vmatprep.subr.bf16.mxu1 %v2789_v14 }
 0x2f3   : > { %2494 = vmatpush3.bf16.msra.mxu1 %v2894_v15 }
 0x2f4   : > { %2501 = vmatprep.subr.bf16.mxu1 %v2789_v14 }
 0x3c1   : > { %v495_v39 = vpop.f32.mrb[0].mxu1 }
 0x3c2   : > { %v499_v40 = vadd.f32 %v2152_v38, %v495_v39  ;;  %v2316_v41 = vpop.f32.mrb[1].mxu1 }
 0x3c4   : > { %2628 = vtanh.f32 %v499_v40  ;;  %v2154_v43 = vmul.f32 -1.442695, %v499_v40 }
 0x3c6   : > { %2630 = vpow2.f32 %v2154_v43 }
 0x3ce   : > { %v2629_v42 = vpop.eup %2628 }
 0x3cf   : > { %509 = vrot.lane.b32.xlu1 %v2629_v42, %s2792_s9 }
 0x3d0   : > { %v2631_v44 = vpop.eup %2630 }
 0x3d1   : > { %v503_v45 = vadd.f32 1.0, %v2631_v44 }
 0x3d3   : > { %2632 = vrcp.f32 %v503_v45 }
 0x3dd   : > { %v2633_v46 = vpop.eup %2632 }
 0x3de   : > { %v507_v49 = vmul.f32 %v2633_v46, %v412_v33 }
 0x441   : > { %v510_v47 = vpop.permute.xlu1 %509 }
 0x442   : > { %v512_v48 = vmul.f32 %v2633_v46, %v510_v47 }
 0x444   : > { %514 = vrot.lane.b32.xlu0 %v512_v48, %s2793_s15 }
 0x4b6   : > { %v515_v50 = vpop.permute.xlu0 %514 }
 0x4b7   : > { %v517_v51 = vadd.f32 %v515_v50, %v507_v49 }
 0x4b9   : > { %2634 = vtanh.f32 %v517_v51 }
 0x4c3   : > { %v2635_v52 = vpop.eup %2634 }
 0x4c4   : > { %520 = vrot.lane.b32.xlu1 %v2635_v52, %s2792_s9 }
 0x536   : > { %v521_v53 = vpop.permute.xlu1 %520 }
 0x537   : > { %v523_v54 = vmul.f32 %v2633_v46, %v521_v53 }
 0x539   : > { %525 = vrot.lane.b32.xlu0 %v523_v54, %s2793_s15  ;;  %v2168_v54 = vld [vmem:[%s2882_s8 + $0xa] sm:$0x3] }
 0x5ab   : > { %v526_v55 = vpop.permute.xlu0 %525 }
 0x5ac   : > { %2155 = vst.msk [vmem:[%s2872_s7 + $0x2] sm:$0x3] %vm302_vm0, %v526_v55  ;;  %2326 = vmatmul.mubr.msk.f32.vlgmr.msra.gmra.mrb[2].mxu0 %vm316_vm2, %v526_v55 }
 0x5ad   : > { %2497 = vmatpush3.bf16.msra.mxu0 %v2887_v13  ;;  %2347 = vmatprep.mubr.msk.f32.mxu0 %vm2790_vm1, %v2791_v16 }
 0x5ae   : > { %2498 = vmatprep.subr.bf16.mxu0 %v2789_v14 }
 0x5b1   : > { %2500 = vmatpush3.bf16.msra.mxu0 %v2894_v15 }
 0x5b2   : > { %2507 = vmatprep.subr.bf16.mxu0 %v2789_v14 }
 0x67f   : > { %v600_v57 = vpop.f32.mrb[2].mxu0 }
 0x680   : > { %v604_v58 = vadd.f32 %v2156_v56, %v600_v57  ;;  %v2327_v59 = vpop.f32.mrb[3].mxu0 }
 0x682   : > { %2636 = vtanh.f32 %v604_v58  ;;  %v2158_v61 = vmul.f32 -1.442695, %v604_v58 }
 0x684   : > { %2638 = vpow2.f32 %v2158_v61 }
 0x68c   : > { %v2637_v60 = vpop.eup %2636 }
 0x68d   : > { %614 = vrot.lane.b32.xlu1 %v2637_v60, %s2792_s9 }
 0x68e   : > { %v2639_v62 = vpop.eup %2638 }
 0x68f   : > { %v608_v63 = vadd.f32 1.0, %v2639_v62 }
 0x691   : > { %2640 = vrcp.f32 %v608_v63 }
 0x69b   : > { %v2641_v0 = vpop.eup %2640 }
 0x69c   : > { %v612_v3 = vmul.f32 %v2641_v0, %v517_v51 }
 0x6ff   : > { %v615_v1 = vpop.permute.xlu1 %614 }
 0x700   : > { %v617_v2 = vmul.f32 %v2641_v0, %v615_v1 }
 0x702   : > { %619 = vrot.lane.b32.xlu0 %v617_v2, %s2793_s15 }
 0x774   : > { %v620_v4 = vpop.permute.xlu0 %619 }
 0x775   : > { %v622_v5 = vadd.f32 %v620_v4, %v612_v3  ;;  %v2172_v4 = vld [vmem:[%s2882_s8 + $0xc] sm:$0x3] }
 0x777   : > { %2642 = vtanh.f32 %v622_v5 }
 0x781   : > { %v2643_v6 = vpop.eup %2642 }
 0x782   : > { %625 = vrot.lane.b32.xlu1 %v2643_v6, %s2792_s9 }
 0x7f4   : > { %v626_v7 = vpop.permute.xlu1 %625 }
 0x7f5   : > { %v628_v8 = vmul.f32 %v2641_v0, %v626_v7 }
 0x7f7   : > { %630 = vrot.lane.b32.xlu0 %v628_v8, %s2793_s15 }
 0x869   : > { %v631_v17 = vpop.permute.xlu0 %630 }
 0x86a   : > { %2159 = vst.msk [vmem:[%s2872_s7 + $0x4] sm:$0x3] %vm302_vm0, %v631_v17  ;;  %2337 = vmatmul.mubr.msk.f32.vlgmr.msra.gmra.mrb[2].mxu1 %vm316_vm2, %v631_v17 }
 0x86b   : > { %2503 = vmatpush3.bf16.msra.mxu1 %v2887_v13  ;;  %2358 = vmatprep.mubr.msk.f32.mxu1 %vm2790_vm1, %v2791_v16 }
 0x86c   : > { %2504 = vmatprep.subr.bf16.mxu1 %v2789_v14 }
 0x86f   : > { %2506 = vmatpush3.bf16.msra.mxu1 %v2894_v15 }
 0x870   : > { %2513 = vmatprep.subr.bf16.mxu1 %v2789_v14 }
 0x93d   : > { %v705_v19 = vpop.f32.mrb[2].mxu1 }
 0x93e   : > { %v709_v20 = vadd.f32 %v2160_v18, %v705_v19  ;;  %v2338_v21 = vpop.f32.mrb[3].mxu1 }
 0x940   : > { %2644 = vtanh.f32 %v709_v20  ;;  %v2162_v23 = vmul.f32 -1.442695, %v709_v20 }
 0x942   : > { %2646 = vpow2.f32 %v2162_v23 }
 0x94a   : > { %v2645_v22 = vpop.eup %2644 }
 0x94b   : > { %719 = vrot.lane.b32.xlu1 %v2645_v22, %s2792_s9 }
 0x94c   : > { %v2647_v24 = vpop.eup %2646 }
 0x94d   : > { %v713_v25 = vadd.f32 1.0, %v2647_v24 }
 0x94f   : > { %2648 = vrcp.f32 %v713_v25 }
 0x959   : > { %v2649_v26 = vpop.eup %2648 }
 0x95a   : > { %v717_v29 = vmul.f32 %v2649_v26, %v622_v5 }
 0x9bd   : > { %v720_v27 = vpop.permute.xlu1 %719 }
 0x9be   : > { %v722_v28 = vmul.f32 %v2649_v26, %v720_v27 }
 0x9c0   : > { %724 = vrot.lane.b32.xlu0 %v722_v28, %s2793_s15 }
 0xa32   : > { %v725_v30 = vpop.permute.xlu0 %724 }
 0xa33   : > { %v727_v31 = vadd.f32 %v725_v30, %v717_v29  ;;  %v2176_v30 = vld [vmem:[%s2882_s8 + $0xe] sm:$0x3] }
 0xa35   : > { %2650 = vtanh.f32 %v727_v31 }
 0xa3f   : > { %v2651_v32 = vpop.eup %2650 }
 0xa40   : > { %730 = vrot.lane.b32.xlu1 %v2651_v32, %s2792_s9 }
 0xab2   : > { %v731_v33 = vpop.permute.xlu1 %730 }
 0xab3   : > { %v733_v34 = vmul.f32 %v2649_v26, %v731_v33 }
 0xab5   : > { %735 = vrot.lane.b32.xlu0 %v733_v34, %s2793_s15 }
 0xb27   : > { %v736_v35 = vpop.permute.xlu0 %735 }
 0xb28   : > { %2163 = vst.msk [vmem:[%s2872_s7 + $0x6] sm:$0x3] %vm302_vm0, %v736_v35  ;;  %2348 = vmatmul.mubr.msk.f32.vlgmr.msra.gmra.mrb[4].mxu0 %vm316_vm2, %v736_v35 }
 0xb29   : > { %2509 = vmatpush3.bf16.msra.mxu0 %v2887_v13  ;;  %2369 = vmatprep.mubr.msk.f32.mxu0 %vm2790_vm1, %v2791_v16 }
 0xb2a   : > { %2510 = vmatprep.subr.bf16.mxu0 %v2789_v14 }
 0xb2d   : > { %2512 = vmatpush3.bf16.msra.mxu0 %v2894_v15 }
 0xbfb   : > { %v810_v37 = vpop.f32.mrb[4].mxu0 }
 0xbfc   : > { %v814_v38 = vadd.f32 %v2164_v36, %v810_v37  ;;  %v2349_v39 = vpop.f32.mrb[5].mxu0 }
 0xbfe   : > { %2652 = vtanh.f32 %v814_v38  ;;  %v2166_v41 = vmul.f32 -1.442695, %v814_v38 }
 0xc00   : > { %2654 = vpow2.f32 %v2166_v41 }
 0xc08   : > { %v2653_v40 = vpop.eup %2652 }
 0xc09   : > { %824 = vrot.lane.b32.xlu1 %v2653_v40, %s2792_s9 }
 0xc0a   : > { %v2655_v42 = vpop.eup %2654 }
 0xc0b   : > { %v818_v43 = vadd.f32 1.0, %v2655_v42 }
 0xc0d   : > { %2656 = vrcp.f32 %v818_v43 }
 0xc17   : > { %v2657_v44 = vpop.eup %2656 }
 0xc18   : > { %v822_v47 = vmul.f32 %v2657_v44, %v727_v31 }
 0xc7b   : > { %v825_v45 = vpop.permute.xlu1 %824 }
 0xc7c   : > { %v827_v46 = vmul.f32 %v2657_v44, %v825_v45 }
 0xc7e   : > { %829 = vrot.lane.b32.xlu0 %v827_v46, %s2793_s15 }
 0xcf0   : > { %v830_v48 = vpop.permute.xlu0 %829 }
 0xcf1   : > { %v832_v49 = vadd.f32 %v830_v48, %v822_v47 }
 0xcf3   : > { %2658 = vtanh.f32 %v832_v49 }
 0xcfd   : > { %v2659_v50 = vpop.eup %2658 }
 0xcfe   : > { %835 = vrot.lane.b32.xlu1 %v2659_v50, %s2792_s9 }
 0xd70   : > { %v836_v51 = vpop.permute.xlu1 %835 }
 0xd71   : > { %v838_v52 = vmul.f32 %v2657_v44, %v836_v51 }
 0xd73   : > { %840 = vrot.lane.b32.xlu0 %v838_v52, %s2793_s15 }
 0xde5   : > { %v841_v53 = vpop.permute.xlu0 %840 }
 0xde6   : > { %2167 = vst.msk [vmem:[%s2872_s7 + $0x8] sm:$0x3] %vm302_vm0, %v841_v53  ;;  %2359 = vmatmul.mubr.msk.f32.vlgmr.msra.gmra.mrb[4].mxu1 %vm316_vm2, %v841_v53 }
 0xde7   : > { %2515 = vmatpush3.bf16.msra.mxu1 %v2887_v13  ;;  %2380 = vmatprep.mubr.msk.f32.mxu1 %vm2790_vm1, %v2791_v16 }
 0xde8   : > { %2516 = vmatprep.subr.bf16.mxu1 %v2789_v14 }
 0xdeb   : > { %2518 = vmatpush3.bf16.msra.mxu1 %v2894_v15 }
 0xeb9   : > { %v915_v55 = vpop.f32.mrb[4].mxu1 }
 0xeba   : > { %v919_v56 = vadd.f32 %v2168_v54, %v915_v55  ;;  %v2360_v57 = vpop.f32.mrb[5].mxu1 }
 0xebc   : > { %2660 = vtanh.f32 %v919_v56  ;;  %v2170_v59 = vmul.f32 -1.442695, %v919_v56 }
 0xebe   : > { %2662 = vpow2.f32 %v2170_v59 }
 0xec6   : > { %v2661_v58 = vpop.eup %2660 }
 0xec7   : > { %929 = vrot.lane.b32.xlu1 %v2661_v58, %s2792_s9 }
 0xec8   : > { %v2663_v60 = vpop.eup %2662 }
 0xec9   : > { %v923_v61 = vadd.f32 1.0, %v2663_v60 }
 0xecb   : > { %2664 = vrcp.f32 %v923_v61 }
 0xed5   : > { %v2665_v13 = vpop.eup %2664 }
 0xed6   : > { %v927_v15 = vmul.f32 %v2665_v13, %v832_v49 }
 0xf39   : > { %v930_v16 = vpop.permute.xlu1 %929 }
 0xf3a   : > { %v932_v14 = vmul.f32 %v2665_v13, %v930_v16 }
 0xf3c   : > { %934 = vrot.lane.b32.xlu0 %v932_v14, %s2793_s15 }
 0xfae   : > { %v935_v62 = vpop.permute.xlu0 %934 }
 0xfaf   : > { %v937_v63 = vadd.f32 %v935_v62, %v927_v15 }
 0xfb1   : > { %2666 = vtanh.f32 %v937_v63 }
 0xfbb   : > { %v2667_v0 = vpop.eup %2666 }
 0xfbc   : > { %940 = vrot.lane.b32.xlu1 %v2667_v0, %s2792_s9 }
0x102e   : > { %v941_v1 = vpop.permute.xlu1 %940 }
0x102f   : > { %v943_v2 = vmul.f32 %v2665_v13, %v941_v1 }
0x1031   : > { %945 = vrot.lane.b32.xlu0 %v943_v2, %s2793_s15 }
0x10a3   : > { %v946_v3 = vpop.permute.xlu0 %945 }
0x10a4   : > { %2171 = vst.msk [vmem:[%s2872_s7 + $0xa] sm:$0x3] %vm302_vm0, %v946_v3  ;;  %2370 = vmatmul.mubr.msk.f32.vlgmr.msra.gmra.mrb[6].mxu0 %vm316_vm2, %v946_v3 }
0x1177   : > { %v1020_v5 = vpop.f32.mrb[6].mxu0 }
0x1178   : > { %v1024_v6 = vadd.f32 %v2172_v4, %v1020_v5  ;;  %v2371_v7 = vpop.f32.mrb[7].mxu0 }
0x117a   : > { %2668 = vtanh.f32 %v1024_v6  ;;  %v2174_v17 = vmul.f32 -1.442695, %v1024_v6 }
0x117c   : > { %2670 = vpow2.f32 %v2174_v17 }
0x1184   : > { %v2669_v8 = vpop.eup %2668 }
0x1185   : > { %1034 = vrot.lane.b32.xlu1 %v2669_v8, %s2792_s9 }
0x1186   : > { %v2671_v18 = vpop.eup %2670 }
0x1187   : > { %v1028_v19 = vadd.f32 1.0, %v2671_v18 }
0x1189   : > { %2672 = vrcp.f32 %v1028_v19 }
0x1193   : > { %v2673_v20 = vpop.eup %2672 }
0x1194   : > { %v1032_v23 = vmul.f32 %v2673_v20, %v937_v63 }
0x11f7   : > { %v1035_v21 = vpop.permute.xlu1 %1034 }
0x11f8   : > { %v1037_v22 = vmul.f32 %v2673_v20, %v1035_v21 }
0x11fa   : > { %1039 = vrot.lane.b32.xlu0 %v1037_v22, %s2793_s15 }
0x126c   : > { %v1040_v24 = vpop.permute.xlu0 %1039 }
0x126d   : > { %v1042_v25 = vadd.f32 %v1040_v24, %v1032_v23 }
0x126f   : > { %2674 = vtanh.f32 %v1042_v25 }
0x1279   : > { %v2675_v26 = vpop.eup %2674 }
0x127a   : > { %1045 = vrot.lane.b32.xlu1 %v2675_v26, %s2792_s9 }
0x12ec   : > { %v1046_v27 = vpop.permute.xlu1 %1045 }
0x12ed   : > { %v1048_v28 = vmul.f32 %v2673_v20, %v1046_v27 }
0x12ef   : > { %1050 = vrot.lane.b32.xlu0 %v1048_v28, %s2793_s15 }
0x1361   : > { %v1051_v29 = vpop.permute.xlu0 %1050 }
0x1362   : > { %2175 = vst.msk [vmem:[%s2872_s7 + $0xc] sm:$0x3] %vm302_vm0, %v1051_v29  ;;  %2381 = vmatmul.mubr.msk.f32.vlgmr.msra.gmra.mrb[6].mxu1 %vm316_vm2, %v1051_v29 }
0x1435   : > { %v1125_v31 = vpop.f32.mrb[6].mxu1 }
0x1436   : > { %v1129_v32 = vadd.f32 %v2176_v30, %v1125_v31  ;;  %v2382_v33 = vpop.f32.mrb[7].mxu1 }
0x1438   : > { %2676 = vtanh.f32 %v1129_v32  ;;  %v2178_v35 = vmul.f32 -1.442695, %v1129_v32 }
0x143a   : > { %2678 = vpow2.f32 %v2178_v35 }
0x1442   : > { %v2677_v34 = vpop.eup %2676 }
0x1443   : > { %1139 = vrot.lane.b32.xlu1 %v2677_v34, %s2792_s9 }
0x1444   : > { %v2679_v36 = vpop.eup %2678 }
0x1445   : > { %v1133_v37 = vadd.f32 1.0, %v2679_v36 }
0x1447   : > { %2680 = vrcp.f32 %v1133_v37 }
0x1451   : > { %v2681_v38 = vpop.eup %2680 }
0x1452   : > { %v1137_v41 = vmul.f32 %v2681_v38, %v1042_v25 }
0x14b5   : > { %v1140_v39 = vpop.permute.xlu1 %1139 }
0x14b6   : > { %v1142_v40 = vmul.f32 %v2681_v38, %v1140_v39 }
0x14b8   : > { %1144 = vrot.lane.b32.xlu0 %v1142_v40, %s2793_s15 }
0x152a   : > { %v1145_v42 = vpop.permute.xlu0 %1144 }
0x152b   : > { %v1147_v43 = vadd.f32 %v1145_v42, %v1137_v41 }
0x152d   : > { %2682 = vtanh.f32 %v1147_v43 }
0x1537   : > { %v2683_v44 = vpop.eup %2682 }
0x1538   : > { %1150 = vrot.lane.b32.xlu1 %v2683_v44, %s2792_s9 }
0x153c   : > { %1162 = vrot.lane.b32.xlu1 %v1147_v43, %s2794_s16 }
0x15aa   : > { %v1151_v45 = vpop.permute.xlu1 %1150 }
0x15ab   : > { %v1153_v46 = vmul.f32 %v2681_v38, %v1151_v45 }
0x15ad   : > { %1155 = vrot.lane.b32.xlu0 %v1153_v46, %s2793_s15 }
0x15ae   : > { %v1163_v47 = vpop.permute.xlu1 %1162 }
0x15af   : > { %1165 = vst.msk [vmem:[#allocation3] sm:$0x3] %vm302_vm0, %v1163_v47 }
0x161f   : > { %v1156_v48 = vpop.permute.xlu0 %1155 }
0x1620   : > { %2179 = vst.msk [vmem:[%s2872_s7 + $0xe] sm:$0x3] %vm302_vm0, %v1156_v48  ;;  %1160 = vst.msk [vmem:[#allocation2] sm:$0x3] %vm302_vm0, %v1156_v48 }
0x1621 PF: > { %p2180_p11 = scmp.ne.s32.totalorder %s2778_s11, 1 }
0x1622   : > { %v3011_v49 = vpack.c.bf16 (!%p2180_p11), %v2876_v10, %v2874_v9  ;;  %v2795_v50 = vmov (!%p2180_p11), 0.0|0.0   ;;  %v3018_v51 = vpack.c.bf16 (!%p2180_p11), %v2880_v12, %v2878_v11  ;;  %vm2796_vm3 = vmmov (!%p2180_p11), 0   ;;  %v2181_v10 = vld [vmem:[%s2882_s8 + $0xe] sm:$0x3] (!%p2180_p11)  ;;  %s2798_s11 = smov (!%p2180_p11), 64   ;;  %s2799_s18 = smov (!%p2180_p11), 32  }
0x1623   : > { %1169 = sbr.rel (%p2180_p11) target bundleno = 11292 (0x2c1c), region = 81  ;;  %2519 = vmatprep.subr.bf16.mxu0 (!%p2180_p11), %v2795_v50  ;;  %2525 = vmatprep.subr.bf16.mxu1 (!%p2180_p11), %v2795_v50  ;;  %v2797_v52 = vmov (!%p2180_p11), 0.0   ;;  %vm1174_vm4 = vcmask (!%p2180_p11), 261120   ;;  %v1171_v55 = vld [vmem:[#allocation3] sm:$0x3] (!%p2180_p11)  ;;  %s2800_s19 = smov (!%p2180_p11), 96  }
0x1624   : > { %2521 = vmatpush3.bf16.msra.mxu0 (!%p2180_p11), %v3011_v49  ;;  %2391 = vmatprep.mubr.msk.f32.mxu0 (!%p2180_p11), %vm2796_vm3, %v2797_v52  ;;  %v2185_v2 = vld [vmem:[%s2882_s8 + $0xc] sm:$0x3] (!%p2180_p11)  ;;  %v2189_v28 = vld [vmem:[%s2882_s8 + $0xa] sm:$0x3] (!%p2180_p11)  ;;  %v2193_v46 = vld [vmem:[%s2882_s8 + $0x8] sm:$0x3] (!%p2180_p11) }
0x1625   : > { %2522 = vmatprep.subr.bf16.mxu0 (!%p2180_p11), %v2795_v50  ;;  %2527 = vmatpush3.bf16.msra.mxu1 (!%p2180_p11), %v3011_v49 }
0x1626   : > { %2528 = vmatprep.subr.bf16.mxu1 (!%p2180_p11), %v2795_v50  ;;  %2402 = vmatprep.mubr.msk.f32.mxu1 (!%p2180_p11), %vm2796_vm3, %v2797_v52 }
0x1627   : > { %v1170_v9 = vld [vmem:[#allocation2] sm:$0x3] (!%p2180_p11) }
0x1628   : > { %2524 = vmatpush3.bf16.msra.mxu0 (!%p2180_p11), %v3018_v51 }
0x1629   : > { %2530 = vmatpush3.bf16.msra.mxu1 (!%p2180_p11), %v3018_v51  ;;  %2531 = vmatprep.subr.bf16.mxu0 (!%p2180_p11), %v2795_v50 }
0x162a   : > { %2537 = vmatprep.subr.bf16.mxu1 %v2795_v50 }
0x162b   : > { %2392 = vmatmul.mubr.msk.f32.vlgmr.msra.gmra.mrb[0].mxu0 %vm1174_vm4, %v1170_v9 }
0x162c   : > { %2533 = vmatpush3.bf16.msra.mxu0 %v3011_v49  ;;  %2413 = vmatprep.mubr.msk.f32.mxu0 %vm2796_vm3, %v2797_v52 }
0x162d   : > { %2534 = vmatprep.subr.bf16.mxu0 %v2795_v50 }
0x1630   : > { %2536 = vmatpush3.bf16.msra.mxu0 %v3018_v51 }
0x1631   : > { %2543 = vmatprep.subr.bf16.mxu0 %v2795_v50 }
0x16fe   : > { %v1244_v11 = vpop.f32.mrb[0].mxu0 }
0x16ff   : > { %v1248_v12 = vadd.f32 %v2181_v10, %v1244_v11  ;;  %v2393_v53 = vpop.f32.mrb[1].mxu0 }
0x1701   : > { %2684 = vtanh.f32 %v1248_v12  ;;  %v2183_v56 = vmul.f32 -1.442695, %v1248_v12 }
0x1703   : > { %2686 = vpow2.f32 %v2183_v56 }
0x170b   : > { %v2685_v54 = vpop.eup %2684 }
0x170c   : > { %1262 = vrot.lane.b32.xlu0 %v2685_v54, %s2798_s11 }
0x170d   : > { %v2687_v57 = vpop.eup %2686 }
0x170e   : > { %v1252_v58 = vadd.f32 1.0, %v2687_v57 }
0x1710   : > { %1257 = vrot.lane.b32.xlu0 %v1171_v55, %s2799_s18  ;;  %2688 = vrcp.f32 %v1252_v58 }
0x171a   : > { %v2689_v59 = vpop.eup %2688 }
0x177e   : > { %v1263_v60 = vpop.permute.xlu0 %1262 }
0x177f   : > { %v1265_v61 = vmul.f32 %v2689_v59, %v1263_v60 }
0x1781   : > { %1267 = vrot.lane.b32.xlu1 %v1265_v61, %s2799_s18 }
0x1782   : > { %v1258_v13 = vpop.permute.xlu0 %1257 }
0x1783   : > { %v1260_v16 = vmul.f32 %v2689_v59, %v1258_v13 }
0x17f3   : > { %v1268_v14 = vpop.permute.xlu1 %1267 }
0x17f4   : > { %v1270_v15 = vadd.f32 %v1268_v14, %v1260_v16  ;;  %v2197_v14 = vld [vmem:[%s2882_s8 + $0x6] sm:$0x3] }
0x17f6   : > { %2690 = vtanh.f32 %v1270_v15 }
0x1800   : > { %v2691_v62 = vpop.eup %2690 }
0x1801   : > { %1273 = vrot.lane.b32.xlu1 %v2691_v62, %s2798_s11 }
0x1873   : > { %v1274_v63 = vpop.permute.xlu1 %1273 }
0x1874   : > { %v1276_v0 = vmul.f32 %v2689_v59, %v1274_v63 }
0x1876   : > { %1278 = vrot.lane.b32.xlu0 %v1276_v0, %s2799_s18 }
0x18e8   : > { %v1279_v1 = vpop.permute.xlu0 %1278 }
0x18e9   : > { %2184 = vst.msk [vmem:[%s2872_s7 + $0xe] sm:$0x3] %vm302_vm0, %v1279_v1  ;;  %2403 = vmatmul.mubr.msk.f32.vlgmr.msra.gmra.mrb[0].mxu1 %vm1174_vm4, %v1279_v1 }
0x18ea   : > { %2539 = vmatpush3.bf16.msra.mxu1 %v3011_v49  ;;  %2424 = vmatprep.mubr.msk.f32.mxu1 %vm2796_vm3, %v2797_v52 }
0x18eb   : > { %2540 = vmatprep.subr.bf16.mxu1 %v2795_v50 }
0x18ee   : > { %2542 = vmatpush3.bf16.msra.mxu1 %v3018_v51 }
0x18ef   : > { %2549 = vmatprep.subr.bf16.mxu1 %v2795_v50 }
0x19bc   : > { %v1354_v3 = vpop.f32.mrb[0].mxu1 }
0x19bd   : > { %v1358_v4 = vadd.f32 %v2185_v2, %v1354_v3  ;;  %v2404_v5 = vpop.f32.mrb[1].mxu1 }
0x19bf   : > { %2692 = vtanh.f32 %v1358_v4  ;;  %v2187_v7 = vmul.f32 -1.442695, %v1358_v4 }
0x19c1   : > { %2694 = vpow2.f32 %v2187_v7 }
0x19c9   : > { %v2693_v6 = vpop.eup %2692 }
0x19ca   : > { %1368 = vrot.lane.b32.xlu1 %v2693_v6, %s2798_s11 }
0x19cb   : > { %v2695_v8 = vpop.eup %2694 }
0x19cc   : > { %v1362_v17 = vadd.f32 1.0, %v2695_v8 }
0x19ce   : > { %2696 = vrcp.f32 %v1362_v17 }
0x19d8   : > { %v2697_v18 = vpop.eup %2696 }
0x19d9   : > { %v1366_v21 = vmul.f32 %v2697_v18, %v1270_v15 }
0x1a3c   : > { %v1369_v19 = vpop.permute.xlu1 %1368 }
0x1a3d   : > { %v1371_v20 = vmul.f32 %v2697_v18, %v1369_v19 }
0x1a3f   : > { %1373 = vrot.lane.b32.xlu0 %v1371_v20, %s2799_s18 }
0x1ab1   : > { %v1374_v22 = vpop.permute.xlu0 %1373 }
0x1ab2   : > { %v1376_v23 = vadd.f32 %v1374_v22, %v1366_v21  ;;  %v2201_v22 = vld [vmem:[%s2882_s8 + $0x4] sm:$0x3] }
0x1ab4   : > { %2698 = vtanh.f32 %v1376_v23 }
0x1abe   : > { %v2699_v24 = vpop.eup %2698 }
0x1abf   : > { %1379 = vrot.lane.b32.xlu1 %v2699_v24, %s2798_s11 }
0x1b31   : > { %v1380_v25 = vpop.permute.xlu1 %1379 }
0x1b32   : > { %v1382_v26 = vmul.f32 %v2697_v18, %v1380_v25 }
0x1b34   : > { %1384 = vrot.lane.b32.xlu0 %v1382_v26, %s2799_s18 }
0x1ba6   : > { %v1385_v27 = vpop.permute.xlu0 %1384 }
0x1ba7   : > { %2188 = vst.msk [vmem:[%s2872_s7 + $0xc] sm:$0x3] %vm302_vm0, %v1385_v27  ;;  %2414 = vmatmul.mubr.msk.f32.vlgmr.msra.gmra.mrb[2].mxu0 %vm1174_vm4, %v1385_v27 }
0x1ba8   : > { %2545 = vmatpush3.bf16.msra.mxu0 %v3011_v49  ;;  %2435 = vmatprep.mubr.msk.f32.mxu0 %vm2796_vm3, %v2797_v52 }
0x1ba9   : > { %2546 = vmatprep.subr.bf16.mxu0 %v2795_v50 }
0x1bac   : > { %2548 = vmatpush3.bf16.msra.mxu0 %v3018_v51 }
0x1bad   : > { %2555 = vmatprep.subr.bf16.mxu0 %v2795_v50 }
0x1c7a   : > { %v1459_v29 = vpop.f32.mrb[2].mxu0 }
0x1c7b   : > { %v1463_v30 = vadd.f32 %v2189_v28, %v1459_v29  ;;  %v2415_v31 = vpop.f32.mrb[3].mxu0 }
0x1c7d   : > { %2700 = vtanh.f32 %v1463_v30  ;;  %v2191_v33 = vmul.f32 -1.442695, %v1463_v30 }
0x1c7f   : > { %2702 = vpow2.f32 %v2191_v33 }
0x1c87   : > { %v2701_v32 = vpop.eup %2700 }
0x1c88   : > { %1473 = vrot.lane.b32.xlu1 %v2701_v32, %s2798_s11 }
0x1c89   : > { %v2703_v34 = vpop.eup %2702 }
0x1c8a   : > { %v1467_v35 = vadd.f32 1.0, %v2703_v34 }
0x1c8c   : > { %2704 = vrcp.f32 %v1467_v35 }
0x1c96   : > { %v2705_v36 = vpop.eup %2704 }
0x1c97   : > { %v1471_v39 = vmul.f32 %v2705_v36, %v1376_v23 }
0x1cfa   : > { %v1474_v37 = vpop.permute.xlu1 %1473 }
0x1cfb   : > { %v1476_v38 = vmul.f32 %v2705_v36, %v1474_v37 }
0x1cfd   : > { %1478 = vrot.lane.b32.xlu0 %v1476_v38, %s2799_s18 }
0x1d6f   : > { %v1479_v40 = vpop.permute.xlu0 %1478 }
0x1d70   : > { %v1481_v41 = vadd.f32 %v1479_v40, %v1471_v39 }
0x1d72   : > { %2706 = vtanh.f32 %v1481_v41 }
0x1d7c   : > { %v2707_v42 = vpop.eup %2706 }
0x1d7d   : > { %1484 = vrot.lane.b32.xlu1 %v2707_v42, %s2798_s11 }
0x1def   : > { %v1485_v43 = vpop.permute.xlu1 %1484 }
0x1df0   : > { %v1487_v44 = vmul.f32 %v2705_v36, %v1485_v43  ;;  %v2205_v36 = vld [vmem:[%s2882_s8 + $0x2] sm:$0x3] }
0x1df2   : > { %1489 = vrot.lane.b32.xlu0 %v1487_v44, %s2799_s18 }
0x1e64   : > { %v1490_v45 = vpop.permute.xlu0 %1489 }
0x1e65   : > { %2192 = vst.msk [vmem:[%s2872_s7 + $0xa] sm:$0x3] %vm302_vm0, %v1490_v45  ;;  %2425 = vmatmul.mubr.msk.f32.vlgmr.msra.gmra.mrb[2].mxu1 %vm1174_vm4, %v1490_v45 }
0x1e66   : > { %2551 = vmatpush3.bf16.msra.mxu1 %v3011_v49  ;;  %2446 = vmatprep.mubr.msk.f32.mxu1 %vm2796_vm3, %v2797_v52 }
0x1e67   : > { %2552 = vmatprep.subr.bf16.mxu1 %v2795_v50 }
0x1e6a   : > { %2554 = vmatpush3.bf16.msra.mxu1 %v3018_v51 }
0x1e6b   : > { %2561 = vmatprep.subr.bf16.mxu1 %v2795_v50 }
0x1f38   : > { %v1564_v47 = vpop.f32.mrb[2].mxu1 }
0x1f39   : > { %v1568_v48 = vadd.f32 %v2193_v46, %v1564_v47  ;;  %v2426_v9 = vpop.f32.mrb[3].mxu1 }
0x1f3b   : > { %2708 = vtanh.f32 %v1568_v48  ;;  %v2195_v11 = vmul.f32 -1.442695, %v1568_v48 }
0x1f3d   : > { %2710 = vpow2.f32 %v2195_v11 }
0x1f45   : > { %v2709_v10 = vpop.eup %2708 }
0x1f46   : > { %1578 = vrot.lane.b32.xlu1 %v2709_v10, %s2798_s11 }
0x1f47   : > { %v2711_v12 = vpop.eup %2710 }
0x1f48   : > { %v1572_v53 = vadd.f32 1.0, %v2711_v12 }
0x1f4a   : > { %2712 = vrcp.f32 %v1572_v53 }
0x1f54   : > { %v2713_v54 = vpop.eup %2712 }
0x1f55   : > { %v1576_v57 = vmul.f32 %v2713_v54, %v1481_v41 }
0x1fb8   : > { %v1579_v55 = vpop.permute.xlu1 %1578 }
0x1fb9   : > { %v1581_v56 = vmul.f32 %v2713_v54, %v1579_v55 }
0x1fbb   : > { %1583 = vrot.lane.b32.xlu0 %v1581_v56, %s2799_s18 }
0x202d   : > { %v1584_v58 = vpop.permute.xlu0 %1583 }
0x202e   : > { %v1586_v59 = vadd.f32 %v1584_v58, %v1576_v57 }
0x2030   : > { %2714 = vtanh.f32 %v1586_v59 }
0x203a   : > { %v2715_v60 = vpop.eup %2714 }
0x203b   : > { %1589 = vrot.lane.b32.xlu1 %v2715_v60, %s2798_s11 }
0x20ad   : > { %v1590_v61 = vpop.permute.xlu1 %1589 }
0x20ae   : > { %v1592_v13 = vmul.f32 %v2713_v54, %v1590_v61  ;;  %v1914_v54 = vld [vmem:[%s2882_s8] sm:$0x3] }
0x20b0   : > { %1594 = vrot.lane.b32.xlu0 %v1592_v13, %s2799_s18 }
0x2122   : > { %v1595_v16 = vpop.permute.xlu0 %1594 }
0x2123   : > { %2196 = vst.msk [vmem:[%s2872_s7 + $0x8] sm:$0x3] %vm302_vm0, %v1595_v16  ;;  %2436 = vmatmul.mubr.msk.f32.vlgmr.msra.gmra.mrb[4].mxu0 %vm1174_vm4, %v1595_v16 }
0x2124   : > { %2557 = vmatpush3.bf16.msra.mxu0 %v3011_v49  ;;  %2457 = vmatprep.mubr.msk.f32.mxu0 %vm2796_vm3, %v2797_v52 }
0x2125   : > { %2558 = vmatprep.subr.bf16.mxu0 %v2795_v50 }
0x2128   : > { %2560 = vmatpush3.bf16.msra.mxu0 %v3018_v51 }
0x21f6   : > { %v1669_v15 = vpop.f32.mrb[4].mxu0 }
0x21f7   : > { %v1673_v62 = vadd.f32 %v2197_v14, %v1669_v15  ;;  %v2437_v63 = vpop.f32.mrb[5].mxu0 }
0x21f9   : > { %2716 = vtanh.f32 %v1673_v62  ;;  %v2199_v1 = vmul.f32 -1.442695, %v1673_v62 }
0x21fb   : > { %2718 = vpow2.f32 %v2199_v1 }
0x2203   : > { %v2717_v0 = vpop.eup %2716 }
0x2204   : > { %1683 = vrot.lane.b32.xlu1 %v2717_v0, %s2798_s11 }
0x2205   : > { %v2719_v2 = vpop.eup %2718 }
0x2206   : > { %v1677_v3 = vadd.f32 1.0, %v2719_v2 }
0x2208   : > { %2720 = vrcp.f32 %v1677_v3 }
0x2212   : > { %v2721_v4 = vpop.eup %2720 }
0x2213   : > { %v1681_v7 = vmul.f32 %v2721_v4, %v1586_v59 }
0x2276   : > { %v1684_v5 = vpop.permute.xlu1 %1683 }
0x2277   : > { %v1686_v6 = vmul.f32 %v2721_v4, %v1684_v5 }
0x2279   : > { %1688 = vrot.lane.b32.xlu0 %v1686_v6, %s2799_s18 }
0x22eb   : > { %v1689_v8 = vpop.permute.xlu0 %1688 }
0x22ec   : > { %v1691_v17 = vadd.f32 %v1689_v8, %v1681_v7 }
0x22ee   : > { %2722 = vtanh.f32 %v1691_v17 }
0x22f8   : > { %v2723_v18 = vpop.eup %2722 }
0x22f9   : > { %1694 = vrot.lane.b32.xlu1 %v2723_v18, %s2798_s11 }
0x236b   : > { %v1695_v19 = vpop.permute.xlu1 %1694 }
0x236c   : > { %v1697_v20 = vmul.f32 %v2721_v4, %v1695_v19 }
0x236e   : > { %1699 = vrot.lane.b32.xlu0 %v1697_v20, %s2799_s18 }
0x23e0   : > { %v1700_v21 = vpop.permute.xlu0 %1699 }
0x23e1   : > { %2200 = vst.msk [vmem:[%s2872_s7 + $0x6] sm:$0x3] %vm302_vm0, %v1700_v21  ;;  %2447 = vmatmul.mubr.msk.f32.vlgmr.msra.gmra.mrb[4].mxu1 %vm1174_vm4, %v1700_v21 }
0x23e2   : > { %2563 = vmatpush3.bf16.msra.mxu1 %v3011_v49  ;;  %2468 = vmatprep.mubr.msk.f32.mxu1 %vm2796_vm3, %v2797_v52 }
0x23e3   : > { %2564 = vmatprep.subr.bf16.mxu1 %v2795_v50 }
0x23e6   : > { %2566 = vmatpush3.bf16.msra.mxu1 %v3018_v51 }
0x24b4   : > { %v1774_v23 = vpop.f32.mrb[4].mxu1 }
0x24b5   : > { %v1778_v24 = vadd.f32 %v2201_v22, %v1774_v23  ;;  %v2448_v25 = vpop.f32.mrb[5].mxu1 }
0x24b7   : > { %2724 = vtanh.f32 %v1778_v24  ;;  %v2203_v27 = vmul.f32 -1.442695, %v1778_v24 }
0x24b9   : > { %2726 = vpow2.f32 %v2203_v27 }
0x24c1   : > { %v2725_v26 = vpop.eup %2724 }
0x24c2   : > { %1788 = vrot.lane.b32.xlu1 %v2725_v26, %s2798_s11 }
0x24c3   : > { %v2727_v28 = vpop.eup %2726 }
0x24c4   : > { %v1782_v29 = vadd.f32 1.0, %v2727_v28 }
0x24c6   : > { %2728 = vrcp.f32 %v1782_v29 }
0x24d0   : > { %v2729_v49 = vpop.eup %2728 }
0x24d1   : > { %v1786_v51 = vmul.f32 %v2729_v49, %v1691_v17 }
0x2534   : > { %v1789_v52 = vpop.permute.xlu1 %1788 }
0x2535   : > { %v1791_v50 = vmul.f32 %v2729_v49, %v1789_v52 }
0x2537   : > { %1793 = vrot.lane.b32.xlu0 %v1791_v50, %s2799_s18 }
0x25a9   : > { %v1794_v30 = vpop.permute.xlu0 %1793 }
0x25aa   : > { %v1796_v31 = vadd.f32 %v1794_v30, %v1786_v51 }
0x25ac   : > { %2730 = vtanh.f32 %v1796_v31 }
0x25b6   : > { %v2731_v32 = vpop.eup %2730 }
0x25b7   : > { %1799 = vrot.lane.b32.xlu1 %v2731_v32, %s2798_s11 }
0x2629   : > { %v1800_v33 = vpop.permute.xlu1 %1799 }
0x262a   : > { %v1802_v34 = vmul.f32 %v2729_v49, %v1800_v33 }
0x262c   : > { %1804 = vrot.lane.b32.xlu0 %v1802_v34, %s2799_s18 }
0x269e   : > { %v1805_v35 = vpop.permute.xlu0 %1804 }
0x269f   : > { %2204 = vst.msk [vmem:[%s2872_s7 + $0x4] sm:$0x3] %vm302_vm0, %v1805_v35  ;;  %2458 = vmatmul.mubr.msk.f32.vlgmr.msra.gmra.mrb[6].mxu0 %vm1174_vm4, %v1805_v35 }
0x2772   : > { %v1879_v37 = vpop.f32.mrb[6].mxu0 }
0x2773   : > { %v1883_v38 = vadd.f32 %v2205_v36, %v1879_v37  ;;  %v2459_v39 = vpop.f32.mrb[7].mxu0 }
0x2775   : > { %2732 = vtanh.f32 %v1883_v38  ;;  %v2207_v41 = vmul.f32 -1.442695, %v1883_v38 }
0x2777   : > { %2734 = vpow2.f32 %v2207_v41 }
0x277f   : > { %v2733_v40 = vpop.eup %2732 }
0x2780   : > { %1893 = vrot.lane.b32.xlu1 %v2733_v40, %s2798_s11 }
0x2781   : > { %v2735_v42 = vpop.eup %2734 }
0x2782   : > { %v1887_v43 = vadd.f32 1.0, %v2735_v42 }
0x2784   : > { %2736 = vrcp.f32 %v1887_v43 }
0x278e   : > { %v2737_v44 = vpop.eup %2736 }
0x278f   : > { %v1891_v47 = vmul.f32 %v2737_v44, %v1796_v31 }
0x27f2   : > { %v1894_v45 = vpop.permute.xlu1 %1893 }
0x27f3   : > { %v1896_v46 = vmul.f32 %v2737_v44, %v1894_v45 }
0x27f5   : > { %1898 = vrot.lane.b32.xlu0 %v1896_v46, %s2799_s18 }
0x2867   : > { %v1899_v48 = vpop.permute.xlu0 %1898 }
0x2868   : > { %v1901_v9 = vadd.f32 %v1899_v48, %v1891_v47 }
0x286a   : > { %2738 = vtanh.f32 %v1901_v9 }
0x2874   : > { %v2739_v10 = vpop.eup %2738 }
0x2875   : > { %1904 = vrot.lane.b32.xlu1 %v2739_v10, %s2798_s11 }
0x28e7   : > { %v1905_v11 = vpop.permute.xlu1 %1904 }
0x28e8   : > { %v1907_v12 = vmul.f32 %v2737_v44, %v1905_v11 }
0x28ea   : > { %1909 = vrot.lane.b32.xlu0 %v1907_v12, %s2799_s18 }
0x295c   : > { %v1910_v53 = vpop.permute.xlu0 %1909 }
0x295d   : > { %2208 = vst.msk [vmem:[%s2872_s7 + $0x2] sm:$0x3] %vm302_vm0, %v1910_v53  ;;  %2469 = vmatmul.mubr.msk.f32.vlgmr.msra.gmra.mrb[6].mxu1 %vm1174_vm4, %v1910_v53 }
0x2a30   : > { %v1983_v55 = vpop.f32.mrb[6].mxu1 }
0x2a31   : > { %v1987_v56 = vadd.f32 %v1983_v55, %v1914_v54  ;;  %v2470_v57 = vpop.f32.mrb[7].mxu1 }
0x2a33   : > { %2740 = vtanh.f32 %v1987_v56  ;;  %v2210_v59 = vmul.f32 -1.442695, %v1987_v56 }
0x2a35   : > { %2742 = vpow2.f32 %v2210_v59 }
0x2a3d   : > { %v2741_v58 = vpop.eup %2740 }
0x2a3e   : > { %1997 = vrot.lane.b32.xlu1 %v2741_v58, %s2798_s11 }
0x2a3f   : > { %v2743_v60 = vpop.eup %2742 }
0x2a40   : > { %v1991_v61 = vadd.f32 1.0, %v2743_v60 }
0x2a42   : > { %2744 = vrcp.f32 %v1991_v61 }
0x2a4c   : > { %v2745_v13 = vpop.eup %2744 }
0x2a4d   : > { %v1995_v15 = vmul.f32 %v2745_v13, %v1901_v9 }
0x2ab0   : > { %v1998_v16 = vpop.permute.xlu1 %1997 }
0x2ab1   : > { %v2000_v14 = vmul.f32 %v2745_v13, %v1998_v16 }
0x2ab3   : > { %2002 = vrot.lane.b32.xlu0 %v2000_v14, %s2799_s18 }
0x2b25   : > { %v2003_v62 = vpop.permute.xlu0 %2002 }
0x2b26   : > { %v2005_v63 = vadd.f32 %v2003_v62, %v1995_v15 }
0x2b28   : > { %2746 = vtanh.f32 %v2005_v63 }
0x2b32   : > { %v2747_v0 = vpop.eup %2746 }
0x2b33   : > { %2008 = vrot.lane.b32.xlu1 %v2747_v0, %s2798_s11 }
0x2b37   : > { %2019 = vrot.lane.b32.xlu1 %v2005_v63, %s2800_s19 }
0x2ba5   : > { %v2009_v1 = vpop.permute.xlu1 %2008 }
0x2ba6   : > { %v2011_v2 = vmul.f32 %v2745_v13, %v2009_v1 }
0x2ba8   : > { %2013 = vrot.lane.b32.xlu0 %v2011_v2, %s2799_s18 }
0x2ba9   : > { %v2020_v3 = vpop.permute.xlu1 %2019 }
0x2baa   : > { %2022 = vst.msk [vmem:[#allocation3] sm:$0x3] %vm302_vm0, %v2020_v3 }
0x2c1a   : > { %v2014_v4 = vpop.permute.xlu0 %2013 }
0x2c1b   : > { %2016 = vst.msk [vmem:[%s2872_s7] sm:$0x3] %vm302_vm0, %v2014_v4  ;;  %2017 = vst.msk [vmem:[#allocation2] sm:$0x3] %vm302_vm0, %v2014_v4 }
0x2c1c PF: > { %s12_s13 = sadd.s32 1, %s2786_s13   ;;  %s3150_s9 = smov %s2774_s10 }
0x2c1d   : > { %p9_p12 = scmp.ge.s32.totalorder %s12_s13, 4   ;;  %s3151_s10 = smov %s2851_s17 }
0x2c1e   : > { %s3152_s11 = smov %s2782_s12  ;;  %s3153_s12 = smov %s3155_s14 }
0x2c1f   :  { %11 = sbr.rel (!%p9_p12) target bundleno = 3 (0x3), region = 147 }

// kernel: chimera_forward.13
= control target key start
LH: loop header
LB: loop body
LE: loop exit
PB: predicated region body
PF: predicated region fallthrough
CT: control target
= control target key end

     0   :  { %v1288_v3 = vmov 0.0   ;;  %vm65_vm0 = vcmask 261120   ;;  %vm451_vm1 = vcmask 523264   ;;  %vm614_vm2 = vcmask 130048   ;;  %s1701_s3 = inlined_call_operand.vmem [shape: f32[32,320], index: 3, kind: input, shape index: {}]   ;;  %s1702_s1 = inlined_call_operand.vmem [shape: f32[16,32], index: 1, kind: input, shape index: {}]   ;;  %s1703_s2 = inlined_call_operand.vmem [shape: f32[32,320], index: 2, kind: input, shape index: {}]   ;;  %s1704_s8 = inlined_call_operand.vmem [shape: f32[320,16], index: 8, kind: input, shape index: {}]   ;;  %s1705_s0 = inlined_call_operand.vmem [shape: f32[16,32], index: 0, kind: input, shape index: {}]   ;;  %s1706_s4 = inlined_call_operand.vmem [shape: f32[1,320], index: 4, kind: input, shape index: {}]   ;;  %s1707_s9 = inlined_call_operand.vmem [shape: f32[16,320], index: 9, kind: input, shape index: {}]   ;;  %s1708_s6 = inlined_call_operand.vmem [shape: f32[32,128], index: 6, kind: input, shape index: {}]   ;;  %s1709_s5 = inlined_call_operand.vmem [shape: f32[32,128], index: 5, kind: input, shape index: {}]   ;;  %s1710_s10 = inlined_call_operand.vmem [shape: f32[16,320], index: 10, kind: output, shape index: {0}]   ;;  %s1711_s7 = inlined_call_operand.vmem [shape: f32[1,128], index: 7, kind: input, shape index: {}]   ;;  %s1712_s11 = inlined_call_operand.vmem [shape: f32[16,128], index: 11, kind: output, shape index: {1}]  }
   0x1   :  { %v54_v0 = vld [vmem:[%s1701_s3 + $0x8] sm:$0xff]  ;;  %v57_v1 = vld [vmem:[%s1701_s3 + $0x20] sm:$0xff]  ;;  %v55_v2 = vld [vmem:[%s1701_s3 + $0x10] sm:$0xff]  ;;  %136 = vmatprep.mubr.f32.mxu0 %v1288_v3 }
   0x2   :  { %v1153_v4 = vpack.c.bf16 %v57_v1, %v54_v0  ;;  %v58_v5 = vld [vmem:[%s1701_s3 + $0x28] sm:$0xff]  ;;  %v53_v6 = vld [vmem:[%s1701_s3] sm:$0xff]  ;;  %v56_v7 = vld [vmem:[%s1701_s3 + $0x18] sm:$0xff] }
   0x3   :  { %v1161_v8 = vpack.c.bf16 %v58_v5, %v55_v2  ;;  %v1155_v9 = vpack.c.bf16 %v56_v7, %v53_v6  ;;  %v60_v10 = vld [vmem:[%s1701_s3 + $0x38] sm:$0xff]  ;;  %v63_v11 = vld [vmem:[%s1701_s3 + $0x50] sm:$0xff]  ;;  %v61_v12 = vld [vmem:[%s1701_s3 + $0x40] sm:$0xff] }
   0x4   :  { %1154 = vmatprep.subr.bf16.mxu0 %v1153_v4  ;;  %v1157_v13 = vpack.c.bf16 %v63_v11, %v60_v10  ;;  %v64_v14 = vld [vmem:[%s1701_s3 + $0x58] sm:$0xff]  ;;  %v59_v15 = vld [vmem:[%s1701_s3 + $0x30] sm:$0xff]  ;;  %v62_v16 = vld [vmem:[%s1701_s3 + $0x48] sm:$0xff] }
   0x5   :  { %1162 = vmatprep.subr.bf16.mxu1 %v1161_v8  ;;  %1156 = vmatpush1.bf16.msra.mxu0 %v1155_v9  ;;  %v1165_v17 = vpack.c.bf16 %v64_v14, %v61_v12  ;;  %v1159_v18 = vpack.c.bf16 %v62_v16, %v59_v15  ;;  %v1389_v19 = vld [vmem:[%s1702_s1] sm:$0xff]  ;;  %v42_v20 = vld [vmem:[%s1703_s2 + $0x8] sm:$0xff]  ;;  %v43_v22 = vld [vmem:[%s1703_s2 + $0x10] sm:$0xff] }
   0x6   :  { %1164 = vmatpush3.bf16.msra.mxu1 %v1161_v8  ;;  %1158 = vmatprep.subr.bf16.mxu0 %v1157_v13  ;;  %v45_v21 = vld [vmem:[%s1703_s2 + $0x20] sm:$0xff]  ;;  %v46_v23 = vld [vmem:[%s1703_s2 + $0x28] sm:$0xff]  ;;  %v44_v27 = vld [vmem:[%s1703_s2 + $0x18] sm:$0xff] }
   0x7   :  { %1166 = vmatprep.subr.bf16.mxu1 %v1165_v17  ;;  %1091 = vmatprep.mubr.msk.f32.mxu1 %vm65_vm0, %v1389_v19  ;;  %v1169_v24 = vpack.c.bf16 %v45_v21, %v42_v20  ;;  %v1177_v25 = vpack.c.bf16 %v46_v23, %v43_v22  ;;  %v41_v26 = vld [vmem:[%s1703_s2] sm:$0xff]  ;;  %v48_v28 = vld [vmem:[%s1703_s2 + $0x38] sm:$0xff]  ;;  %v51_v29 = vld [vmem:[%s1703_s2 + $0x50] sm:$0xff] }
   0x8   :  { %v49_v30 = vld [vmem:[%s1703_s2 + $0x40] sm:$0xff]  ;;  %v52_v31 = vld [vmem:[%s1703_s2 + $0x58] sm:$0xff]  ;;  %v1171_v32 = vpack.c.bf16 %v44_v27, %v41_v26  ;;  %v1426_v33 = vld [vmem:[%s1702_s1 + $0x8] sm:$0xff]  ;;  %v1173_v36 = vpack.c.bf16 %v51_v29, %v48_v28 }
   0x9   :  { %1160 = vmatpush1.bf16.msra.mxu0 %v1159_v18  ;;  %v47_v34 = vld [vmem:[%s1703_s2 + $0x30] sm:$0xff]  ;;  %v50_v35 = vld [vmem:[%s1703_s2 + $0x48] sm:$0xff]  ;;  %v1181_v37 = vpack.c.bf16 %v52_v31, %v49_v30  ;;  %v427_v38 = vld [vmem:[%s1704_s8 + $0x80] sm:$0xff] }
   0xa   :  { %1168 = vmatpush3.bf16.msra.mxu1 %v1165_v17  ;;  %1170 = vmatprep.subr.bf16.mxu0 %v1169_v24  ;;  %v428_v39 = vld [vmem:[%s1704_s8 + $0x88] sm:$0xff]  ;;  %v1175_v40 = vpack.c.bf16 %v50_v35, %v47_v34  ;;  %v1447_v41 = vld [vmem:[%s1705_s0] sm:$0xff]  ;;  %v429_v45 = vld [vmem:[%s1704_s8 + $0x90] sm:$0xff] }
   0xb   :  { %1178 = vmatprep.subr.bf16.mxu1 %v1177_v25  ;;  %v1185_v42 = vpack.c.bf16 %v428_v39, %v427_v38  ;;  %v411_v43 = vld [vmem:[%s1704_s8] sm:$0xff]  ;;  %v412_v44 = vld [vmem:[%s1704_s8 + $0x8] sm:$0xff]  ;;  %v430_v46 = vld [vmem:[%s1704_s8 + $0x98] sm:$0xff] }
   0xc   :  { %986 = vmatmul.mubr.msk.f32.vlgmr.msra.gmra.mrb[0].mxu0 %vm65_vm0, %v1389_v19  ;;  %v443_v47 = vld [vmem:[%s1704_s8 + $0x100] sm:$0xff]  ;;  %v444_v48 = vld [vmem:[%s1704_s8 + $0x108] sm:$0xff]  ;;  %v1187_v51 = vpack.c.bf16 %v412_v44, %v411_v43  ;;  %v445_v52 = vld [vmem:[%s1704_s8 + $0x110] sm:$0xff]  ;;  %v1189_v54 = vpack.c.bf16 %v430_v46, %v429_v45 }
   0xd   :  { %1092 = vmatmul.mubr.msk.f32.vlgmr.msra.gmra.mrb[0].mxu1 %vm65_vm0, %v1426_v33  ;;  %1172 = vmatpush1.bf16.msra.mxu0 %v1171_v32  ;;  %v1217_v49 = vpack.c.bf16 %v444_v48, %v443_v47  ;;  %v1476_v50 = vld [vmem:[%s1705_s0 + $0x8] sm:$0xff]  ;;  %v446_v53 = vld [vmem:[%s1704_s8 + $0x118] sm:$0xff]  ;;  %v413_v55 = vld [vmem:[%s1704_s8 + $0x10] sm:$0xff] }
   0xe   :  { %1180 = vmatpush3.bf16.msra.mxu1 %v1177_v25  ;;  %142 = vmatprep.mubr.f32.mxu0 %v1288_v3  ;;  %v414_v56 = vld [vmem:[%s1704_s8 + $0x18] sm:$0xff]  ;;  %v431_v57 = vld [vmem:[%s1704_s8 + $0xa0] sm:$0xff]  ;;  %v1221_v58 = vpack.c.bf16 %v446_v53, %v445_v52  ;;  %v432_v59 = vld [vmem:[%s1704_s8 + $0xa8] sm:$0xff] }
   0xf   :  { %1174 = vmatprep.subr.bf16.mxu0 %v1173_v36  ;;  %1182 = vmatprep.subr.bf16.mxu1 %v1181_v37  ;;  %v447_v60 = vld [vmem:[%s1704_s8 + $0x120] sm:$0xff]  ;;  %v448_v61 = vld [vmem:[%s1704_s8 + $0x128] sm:$0xff]  ;;  %v1191_v62 = vpack.c.bf16 %v414_v56, %v413_v55  ;;  %v1193_v63 = vpack.c.bf16 %v432_v59, %v431_v57  ;;  %v433_v4 = vld [vmem:[%s1704_s8 + $0xb0] sm:$0xff] }
  0x10   :  { %987 = vmatmul.mubr.msk.f32.gmra.mrb[2].mxu0 %vm65_vm0, %v1426_v33  ;;  %1102 = vmatprep.mubr.msk.f32.mxu1 %vm65_vm0, %v1447_v41  ;;  %v415_v0 = vld [vmem:[%s1704_s8 + $0x20] sm:$0xff]  ;;  %v416_v1 = vld [vmem:[%s1704_s8 + $0x28] sm:$0xff]  ;;  %v1225_v2 = vpack.c.bf16 %v448_v61, %v447_v60  ;;  %v434_v5 = vld [vmem:[%s1704_s8 + $0xb8] sm:$0xff] }
  0x11   :  { %1176 = vmatpush1.bf16.msra.mxu0 %v1175_v40  ;;  %294 = vmatprep.mubr.f32.mxu0 %v1288_v3  ;;  %v1195_v6 = vpack.c.bf16 %v416_v1, %v415_v0  ;;  %v1197_v7 = vpack.c.bf16 %v434_v5, %v433_v4  ;;  %v417_v8 = vld [vmem:[%s1704_s8 + $0x30] sm:$0xff]  ;;  %v418_v9 = vld [vmem:[%s1704_s8 + $0x38] sm:$0xff]  ;;  %v435_v10 = vld [vmem:[%s1704_s8 + $0xc0] sm:$0xff]  ;;  %v384_v40 = vlaneseq }
  0x12   :  { %1184 = vmatpush3.bf16.msra.mxu1 %v1181_v37  ;;  %1186 = vmatprep.subr.bf16.mxu0 %v1185_v42  ;;  %v436_v11 = vld [vmem:[%s1704_s8 + $0xc8] sm:$0xff]  ;;  %v1199_v12 = vpack.c.bf16 %v418_v9, %v417_v8  ;;  %v419_v14 = vld [vmem:[%s1704_s8 + $0x40] sm:$0xff]  ;;  %v437_v16 = vld [vmem:[%s1704_s8 + $0xd0] sm:$0xff] }
  0x13   :  { %1218 = vmatprep.subr.bf16.mxu1 %v1217_v49  ;;  %v1201_v13 = vpack.c.bf16 %v436_v11, %v435_v10  ;;  %v420_v15 = vld [vmem:[%s1704_s8 + $0x48] sm:$0xff]  ;;  %v438_v17 = vld [vmem:[%s1704_s8 + $0xd8] sm:$0xff]  ;;  %v421_v21 = vld [vmem:[%s1704_s8 + $0x50] sm:$0xff]  ;;  %v385_v42 = vshrl.u32 %v384_v40, 7 }
  0x14   :  { %990 = vmatmul.mubr.msk.f32.vlgmr.msra.gmra.mrb[0].mxu0 %vm65_vm0, %v1447_v41  ;;  %v1203_v18 = vpack.c.bf16 %v420_v15, %v419_v14  ;;  %v1205_v20 = vpack.c.bf16 %v438_v17, %v437_v16  ;;  %v422_v22 = vld [vmem:[%s1704_s8 + $0x58] sm:$0xff]  ;;  %v439_v23 = vld [vmem:[%s1704_s8 + $0xe0] sm:$0xff]  ;;  %v440_v24 = vld [vmem:[%s1704_s8 + $0xe8] sm:$0xff] }
  0x15   :  { %1103 = vmatmul.mubr.msk.f32.vlgmr.msra.gmra.mrb[0].mxu1 %vm65_vm0, %v1476_v50  ;;  %300 = vmatprep.mubr.f32.mxu0 %v1288_v3  ;;  %v1207_v25 = vpack.c.bf16 %v422_v22, %v421_v21  ;;  %v1209_v26 = vpack.c.bf16 %v440_v24, %v439_v23  ;;  %v423_v27 = vld [vmem:[%s1704_s8 + $0x60] sm:$0xff]  ;;  %v424_v28 = vld [vmem:[%s1704_s8 + $0x68] sm:$0xff]  ;;  %v441_v30 = vld [vmem:[%s1704_s8 + $0xf0] sm:$0xff]  ;;  %v386_v43 = vsub.s32 0, %v385_v42  ;;  %v394_v45 = vsub.s32 2, %v385_v42 }
  0x16   :  { %1188 = vmatpush3.bf16.msra.mxu0 %v1187_v51  ;;  %1220 = vmatpush3.bf16.msra.mxu1 %v1217_v49  ;;  %v1211_v29 = vpack.c.bf16 %v424_v28, %v423_v27  ;;  %v442_v31 = vld [vmem:[%s1704_s8 + $0xf8] sm:$0xff]  ;;  %v449_v32 = vld [vmem:[%s1704_s8 + $0x130] sm:$0xff]  ;;  %v382_v44 = vld [vmem:[%s1706_s4] sm:$0x7]  ;;  %v390_v46 = vsub.s32 1, %v385_v42 }
  0x17   :  { %1190 = vmatprep.subr.bf16.mxu0 %v1189_v54  ;;  %1222 = vmatprep.subr.bf16.mxu1 %v1221_v58  ;;  %v1213_v34 = vpack.c.bf16 %v442_v31, %v441_v30  ;;  %v450_v35 = vld [vmem:[%s1704_s8 + $0x138] sm:$0xff]  ;;  %v425_v36 = vld [vmem:[%s1704_s8 + $0x70] sm:$0xff]  ;;  %v387_v47 = vrot.slane %v382_v44, %v386_v43  ;;  %v395_v48 = vrot.slane %v382_v44, %v394_v45  ;;  %v608_v9 = vld [vmem:[%s1707_s9] sm:$0xff] }
  0x18   :  { %991 = vmatmul.mubr.msk.f32.gmra.mrb[2].mxu0 %vm65_vm0, %v1476_v50  ;;  %v426_v37 = vld [vmem:[%s1704_s8 + $0x78] sm:$0xff]  ;;  %v1229_v38 = vpack.c.bf16 %v450_v35, %v449_v32  ;;  %v391_v49 = vrot.slane %v382_v44, %v390_v46  ;;  %v801_v23 = vld [vmem:[%s1708_s6] sm:$0xff]  ;;  %v802_v24 = vld [vmem:[%s1708_s6 + $0x8] sm:$0xff] }
  0x19   :  { %v1215_v39 = vpack.c.bf16 %v426_v37, %v425_v36  ;;  %v611_v10 = vld [vmem:[%s1707_s9 + $0x18] sm:$0xff]  ;;  %v1241_v27 = vpack.c.bf16 %v802_v24, %v801_v23  ;;  %v803_v28 = vld [vmem:[%s1708_s6 + $0x10] sm:$0xff]  ;;  %v797_v31 = vld [vmem:[%s1709_s5] sm:$0xff] }
  0x1a   :  { %1192 = vmatpush3.bf16.msra.mxu0 %v1191_v62  ;;  %1224 = vmatpush3.bf16.msra.mxu1 %v1221_v58  ;;  %v1235_v11 = vpack.c.bf16 %v611_v10, %v608_v9  ;;  %v798_v32 = vld [vmem:[%s1709_s5 + $0x8] sm:$0xff]  ;;  %v799_v35 = vld [vmem:[%s1709_s5 + $0x10] sm:$0xff]  ;;  %v800_v36 = vld [vmem:[%s1709_s5 + $0x18] sm:$0xff] }
  0x1b   :  { %1194 = vmatprep.subr.bf16.mxu0 %v1193_v63  ;;  %1226 = vmatprep.subr.bf16.mxu1 %v1225_v2  ;;  %v1253_v37 = vpack.c.bf16 %v800_v36, %v799_v35 }
  0x1e   :  { %1196 = vmatpush3.bf16.msra.mxu0 %v1195_v6  ;;  %1228 = vmatpush3.bf16.msra.mxu1 %v1225_v2  ;;  %v609_v6 = vld [vmem:[%s1707_s9 + $0x8] sm:$0xff] }
  0x1f   :  { %1198 = vmatprep.subr.bf16.mxu0 %v1197_v7  ;;  %1230 = vmatprep.subr.bf16.mxu1 %v1229_v38  ;;  %v612_v7 = vld [vmem:[%s1707_s9 + $0x20] sm:$0xff] }
  0x20   :  { %v1233_v8 = vpack.c.bf16 %v612_v7, %v609_v6 }
  0x22   :  { %1200 = vmatpush3.bf16.msra.mxu0 %v1199_v12  ;;  %1232 = vmatpush3.bf16.msra.mxu1 %v1229_v38  ;;  %v613_v12 = vld [vmem:[%s1707_s9 + $0x28] sm:$0xff] }
  0x23   :  { %1202 = vmatprep.subr.bf16.mxu0 %v1201_v13  ;;  %1257 = vmatprep.subr.bf16.mxu1 %v1233_v8 }
  0x26   :  { %1204 = vmatpush3.bf16.msra.mxu0 %v1203_v18 }
  0x27   :  { %1206 = vmatprep.subr.bf16.mxu0 %v1205_v20 }
  0x2a   :  { %1208 = vmatpush3.bf16.msra.mxu0 %v1207_v25 }
  0x2b   :  { %1210 = vmatprep.subr.bf16.mxu0 %v1209_v26 }
  0x2e   :  { %1212 = vmatpush3.bf16.msra.mxu0 %v1211_v29  ;;  %v804_v29 = vld [vmem:[%s1708_s6 + $0x18] sm:$0xff] }
  0x2f   :  { %1214 = vmatprep.subr.bf16.mxu0 %v1213_v34  ;;  %v1245_v30 = vpack.c.bf16 %v804_v29, %v803_v28  ;;  %v1249_v34 = vpack.c.bf16 %v798_v32, %v797_v31 }
  0x32   :  { %1216 = vmatpush3.bf16.msra.mxu0 %v1215_v39 }
  0x33   :  { %1234 = vmatprep.subr.bf16.mxu0 %v1233_v8 }
  0xe7   :  { %v296_v51 = vpop.f32.mrb[0].mxu0 }
  0xe8   :  { %v1584_v52 = vadd.f32 %v387_v47, %v296_v51  ;;  %v1104_v53 = vpop.f32.mrb[0].mxu1  ;;  %v298_v54 = vpop.f32.mrb[1].mxu0 }
  0xe9   :  { %v1586_v55 = vadd.f32 %v1104_v53, %v395_v48  ;;  %v1588_v56 = vadd.f32 %v391_v49, %v298_v54  ;;  %v373_v57 = vpop.f32.mrb[1].mxu1 }
  0xea   :  { %v1590_v58 = vadd.f32 %v395_v48, %v373_v57  ;;  %v405_v61 = vmul.f32 %v1584_v52, %v1584_v52 }
  0xeb   :  { %v406_v59 = vmul.f32 %v1588_v56, %v1588_v56  ;;  %v302_v60 = vpop.f32.mrb[2].mxu0  ;;  %v410_v1 = vmul.f32 %v1586_v55, %v1586_v55 }
  0xec   :  { %v407_v62 = vmul.f32 %v1590_v58, %v1590_v58  ;;  %v1598_v63 = vadd.f32 %v387_v47, %v302_v60  ;;  %v304_v0 = vpop.f32.mrb[3].mxu0 }
  0xed   :  { %v1602_v2 = vadd.f32 %v391_v49, %v304_v0  ;;  %522 = vmatprep.mubr.f32.mxu0 %v406_v59 }
  0xee   :  { %1121 = vmatprep.mubr.msk.f32.mxu1 %vm451_vm1, %v407_v62  ;;  %523 = vmatmul.mubr.f32.vlgmr.msra.gmra.mrb[4].mxu0 %v405_v61  ;;  %v408_v5 = vmul.f32 %v1598_v63, %v1598_v63  ;;  %v1004_v61 = vld [vmem:[%s1711_s7] ss:$0 sm:$0xff] }
  0xef   :  { %v409_v4 = vmul.f32 %v1602_v2, %v1602_v2  ;;  %1122 = vmatmul.mubr.msk.f32.vlgmr.msra.gmra.mrb[2].mxu1 %vm451_vm1, %v410_v1  ;;  %1236 = vmatpush1.bf16.msra.mxu0 %v1235_v11 }
  0xf0   :  { %691 = vmatprep.mubr.f32.mxu1 %v1288_v3  ;;  %1258 = vmatpush1.bf16.msra.mxu1 %v1235_v11 }
  0xf1   :  { %527 = vmatprep.mubr.f32.mxu0 %v409_v4 }
  0xf2   :  { %528 = vmatmul.mubr.f32.gmra.mrb[6].mxu0 %v408_v5 }
  0xf3   :  { %685 = vmatprep.mubr.f32.mxu0 %v1288_v3  ;;  %v610_v3 = vld [vmem:[%s1707_s9 + $0x10] sm:$0xff] }
  0xf4   :  { %v1237_v13 = vpack.c.bf16 %v613_v12, %v610_v3 }
  0xf6   :  { %1238 = vmatprep.subr.bf16.mxu1 %v1237_v13 }
 0x1c1   :  { %v1051_v14 = vpop.f32.mrb[4].mxu0 }
 0x1c2   :  { %v1123_v15 = vpop.f32.mrb[2].mxu1  ;;  %v1052_v16 = vpop.f32.mrb[5].mxu0 }
 0x1c3   :  { %v1053_v17 = vadd.f32 %v1052_v16, %v1051_v14  ;;  %v599_v18 = vpop.f32.mrb[3].mxu1 }
 0x1c5   :  { %v600_v20 = vadd.f32 %v1053_v17, %v599_v18  ;;  %v1054_v21 = vpop.f32.mrb[6].mxu0 }
 0x1c6   :  { %v1055_v22 = vpop.f32.mrb[7].mxu0 }
 0x1c7   :  { %v1056_v25 = vadd.f32 %v1055_v22, %v1054_v21  ;;  %996 = vmatmul.mubr.msk.f32.vlgmr.msra.gmra.mrb[8].mxu0 %vm614_vm2, %v600_v20 }
 0x1c9   :  { %v605_v26 = vadd.f32 %v1123_v15, %v1056_v25 }
 0x1cb   :  { %997 = vmatmul.mubr.msk.f32.vlgmr.msra.gmra.mrb[4].mxu1 %vm614_vm2, %v605_v26 }
 0x1cc   :  { %1240 = vmatpush3.bf16.msra.mxu1 %v1237_v13  ;;  %1128 = vmatprep.mubr.msk.f32.mxu1 %vm614_vm2, %v600_v20 }
 0x1cd   :  { %1242 = vmatprep.subr.bf16.mxu1 %v1241_v27 }
 0x1cf   :  { %1129 = vmatmul.mubr.msk.f32.vlgmr.msra.gmra.mrb[6].mxu1 %vm614_vm2, %v605_v26 }
 0x1d0   :  { %1244 = vmatpush3.bf16.msra.mxu1 %v1241_v27  ;;  %1139 = vmatprep.mubr.msk.f32.mxu1 %vm65_vm0, %v1389_v19 }
 0x1d1   :  { %1246 = vmatprep.subr.bf16.mxu1 %v1245_v30 }
 0x1d4   :  { %1248 = vmatpush3.bf16.msra.mxu1 %v1245_v30 }
 0x1d5   :  { %1250 = vmatprep.subr.bf16.mxu1 %v1249_v34 }
 0x1d7   :  { %1140 = vmatmul.mubr.msk.f32.vlgmr.msra.gmra.mrb[8].mxu1 %vm65_vm0, %v1426_v33 }
 0x1d8   :  { %1252 = vmatpush3.bf16.msra.mxu1 %v1249_v34  ;;  %1150 = vmatprep.mubr.msk.f32.mxu1 %vm65_vm0, %v1447_v41 }
 0x1d9   :  { %1254 = vmatprep.subr.bf16.mxu1 %v1253_v37 }
 0x1dc   :  { %1256 = vmatpush3.bf16.msra.mxu1 %v1253_v37 }
 0x1df   :  { %1151 = vmatmul.mubr.msk.f32.vlgmr.msra.gmra.mrb[8].mxu1 %vm65_vm0, %v1476_v50 }
 0x29a   :  { %v687_v19 = vpop.f32.mrb[8].mxu0 }
 0x29b   :  { %v773_v38 = vmax.f32 %v687_v19, 1e-24  ;;  %v689_v39 = vpop.f32.mrb[9].mxu0 }
 0x29c   :  { %v774_v40 = vmax.f32 %v689_v39, 1e-24 }
 0x29d   :  { %1268 = vrsqrt.f32 %v773_v38 }
 0x29e   :  { %1270 = vrsqrt.f32 %v774_v40  ;;  %v693_v42 = vpop.f32.mrb[4].mxu1 }
 0x29f   :  { %v776_v43 = vmax.f32 %v693_v42, 1e-24  ;;  %v695_v44 = vpop.f32.mrb[5].mxu1 }
 0x2a0   :  { %v777_v45 = vmax.f32 %v695_v44, 1e-24 }
 0x2a1   :  { %1272 = vrsqrt.f32 %v776_v43 }
 0x2a2   :  { %1274 = vrsqrt.f32 %v777_v45  ;;  %v1130_v33 = vpop.f32.mrb[6].mxu1 }
 0x2a3   :  { %v778_v46 = vmax.f32 %v1130_v33, 1e-24  ;;  %v764_v41 = vpop.f32.mrb[7].mxu1 }
 0x2a4   :  { %v775_v47 = vmax.f32 %v764_v41, 1e-24 }
 0x2a5   :  { %1276 = vrsqrt.f32 %v778_v46 }
 0x2a6   :  { %1278 = vrsqrt.f32 %v775_v47 }
 0x2a7   :  { %v1269_v48 = vpop.eup %1268 }
 0x2a8   :  { %v1271_v50 = vpop.eup %1270  ;;  %v785_v49 = vmul.f32 %v1269_v48, %v1584_v52 }
 0x2a9   :  { %v786_v51 = vmul.f32 %v1271_v50, %v1588_v56 }
 0x2aa   :  { %791 = vst [vmem:[%s1710_s10] sm:$0xff] %v785_v49 }
 0x2ab   :  { %v1273_v53 = vpop.eup %1272  ;;  %792 = vst [vmem:[%s1710_s10 + $0x8] sm:$0xff] %v786_v51 }
 0x2ac   :  { %v1275_v54 = vpop.eup %1274  ;;  %v788_v57 = vmul.f32 %v1273_v53, %v1598_v63 }
 0x2ad   :  { %v789_v59 = vmul.f32 %v1275_v54, %v1602_v2 }
 0x2ae   :  { %794 = vst [vmem:[%s1710_s10 + $0x18] sm:$0xff] %v788_v57 }
 0x2af   :  { %v1277_v52 = vpop.eup %1276  ;;  %795 = vst [vmem:[%s1710_s10 + $0x20] sm:$0xff] %v789_v59 }
 0x2b0   :  { %v1279_v56 = vpop.eup %1278  ;;  %v790_v60 = vmul.f32 %v1277_v52, %v1586_v55 }
 0x2b1   :  { %v787_v62 = vmul.f32 %v1279_v56, %v1590_v58 }
 0x2b2   :  { %796 = vst.msk [vmem:[%s1710_s10 + $0x28] sm:$0xff] %vm451_vm1, %v790_v60  ;;  %v1152_v63 = vpop.f32.mrb[8].mxu1 }
 0x2b3   :  { %793 = vst.msk [vmem:[%s1710_s10 + $0x10] sm:$0xff] %vm451_vm1, %v787_v62  ;;  %v963_v0 = vadd.f32 %v1152_v63, %v1004_v61  ;;  %v946_v1 = vpop.f32.mrb[9].mxu1 }
 0x2b4   :  { %v962_v55 = vadd.f32 %v1004_v61, %v946_v1 }
 0x2b5   :  { %v1006_v2 = vmul.f32 -1.442695, %v963_v0 }
 0x2b6   :  { %v1005_v4 = vmul.f32 -1.442695, %v962_v55 }
 0x2b7   :  { %1280 = vpow2.f32 %v1006_v2 }
 0x2b8   :  { %1282 = vpow2.f32 %v1005_v4 }
 0x2c1   :  { %v1281_v5 = vpop.eup %1280 }
 0x2c2   :  { %v1283_v58 = vpop.eup %1282  ;;  %v971_v6 = vadd.f32 1.0, %v1281_v5 }
 0x2c3   :  { %v970_v7 = vadd.f32 1.0, %v1283_v58 }
 0x2c4   :  { %1284 = vrcp.f32 %v971_v6 }
 0x2c5   :  { %1286 = vrcp.f32 %v970_v7 }
 0x2ce   :  { %v1285_v8 = vpop.eup %1284 }
 0x2cf   :  { %v1287_v9 = vpop.eup %1286  ;;  %977 = vst [vmem:[%s1712_s11 + $0x8] sm:$0xff] %v1285_v8 }
 0x2d0   :  { %976 = vst [vmem:[%s1712_s11] sm:$0xff] %v1287_v9 }

</bundles_post_ra>
